<compile_context>
chip_gen: v7x
topology: tpu7x:2x2x1
jax: 0.10.0
libtpu: 0.0.40
codegen_flags: <defaults>
</compile_context>

<pallas_src>
import jax
import jax.numpy as jnp
from jax.experimental import pallas as pl
from jax.experimental.pallas import tpu as pltpu

C_IN = 1056            # input channels / Linear in_features
H = W = 7              # spatial dims consumed entirely by the 7x7 avg-pool
HW = H * W             # 49
N_CLASSES = 10
CHANNEL_CHUNK = 352    # 1056 = 3 * 352; multiple of 16 -> sublane-aligned for f32 and bf16
N_CHUNKS = C_IN // CHANNEL_CHUNK


def classifier_kernel(x_ref, w_ref, b_ref, o_ref):
    # x_ref: (TN, 1056, 49)  input block (NCHW with HW flattened), f32/bf16, VMEM
    # w_ref: (1056, 10)      weight, pre-transposed and pre-scaled by 1/49, f32, VMEM
    # b_ref: (1, 10)         bias row, f32, VMEM
    # o_ref: (TN, 10)        logits, f32, VMEM
    tn = o_ref.shape[0]

    def chunk_body(j, acc):
        c0 = pl.multiple_of(j * CHANNEL_CHUNK, CHANNEL_CHUNK)
        xs = x_ref[:, pl.ds(c0, CHANNEL_CHUNK), :].astype(jnp.float32)
        # ReLU (VPU) then AvgPool2d(7) == sum over the 49 spatial positions
        # (lane-axis reduction); the 1/49 scale is folded into w_ref.
        pooled = jnp.sum(jnp.maximum(xs, 0.0), axis=-1)          # (TN, CHANNEL_CHUNK)
        ws = w_ref[pl.ds(c0, CHANNEL_CHUNK), :]                  # (CHANNEL_CHUNK, 10)
        return acc + jnp.dot(pooled, ws, preferred_element_type=jnp.float32)

    logits = jax.lax.fori_loop(
        0, N_CHUNKS, chunk_body, jnp.zeros((tn, N_CLASSES), jnp.float32))
    # Dropout: eval-mode identity.
    o_ref[...] = logits + b_ref[...]


def _round_up(x, m):
    return ((x + m - 1) // m) * m


def _auto_batch_tile(itemsize):
    """Pick batch tile + VMEM cap from the chip's VMEM capacity (generation-aware)."""
    try:
        vmem = int(getattr(pltpu.get_tpu_info(), "vmem_capacity_bytes", 0)) or (64 << 20)
    except Exception:
        vmem = 64 << 20  # conservative fallback: v7x per-TensorCore VMEM
    # Per batch row of the x block in VMEM: 2 pipeline buffers (lane dim 49 pads to
    # 128 lanes) + ~2 chunk-sized f32 elementwise temporaries inside the fori_loop.
    row_bytes = 2 * C_IN * 128 * itemsize + 2 * CHANNEL_CHUNK * 128 * 4
    fixed = 8 << 20    # weight/bias/output buffers + internal scratch headroom
    tn = int(((vmem - fixed) * 3 // 4) // row_bytes)
    tn = max(8, min(64, (tn // 8) * 8))
    # Scoped-VMEM cap: it is a cap (not a reservation), so be generous — the
    # 16/32 MiB defaults are too small for the double-buffered tiles above.
    vmem_limit = int(max(32 << 20, vmem - (8 << 20)))
    return tn, vmem_limit


def classifier_forward(x_nchw, weight, bias, *, batch_tile=None):
    """x_nchw: (N, 1056, 7, 7) f32/bf16 (PyTorch NCHW); weight: (10, 1056); bias: (10,)."""
    n, c, h, w = x_nchw.shape
    assert (c, h, w) == (C_IN, H, W), (c, h, w)
    itemsize = jnp.dtype(x_nchw.dtype).itemsize

    tn_auto, vmem_limit = _auto_batch_tile(itemsize)
    tn = tn_auto if batch_tile is None else int(batch_tile)
    tn = max(8, min(tn, _round_up(n, 8)))
    tn = (tn // 8) * 8                     # output block sublane dim must be 8-aligned
    n_pad = _round_up(n, tn)

    # Free, contiguous reshape (NO transpose): NCHW -> (N, C, H*W).
    x_flat = x_nchw.reshape(n, C_IN, HW)
    if n_pad != n:
        # Zero-pad the batch so blocks divide evenly; padded rows are sliced off below.
        x_flat = jnp.pad(x_flat, ((0, n_pad - n), (0, 0), (0, 0)))

    # Fold the 1/49 avg-pool scale into the (tiny) weight once; kernel uses a sum.
    w_scaled = (jnp.transpose(weight, (1, 0)) * (1.0 / HW)).astype(jnp.float32)  # (1056, 10)
    b_row = bias.reshape(1, N_CLASSES).astype(jnp.float32)                        # (1, 10)

    out = pl.pallas_call(
        classifier_kernel,
        out_shape=jax.ShapeDtypeStruct((n_pad, N_CLASSES), jnp.float32),
        grid=(n_pad // tn,),
        in_specs=[
            pl.BlockSpec((tn, C_IN, HW), lambda i: (i, 0, 0)),      # batch-tiled x
            pl.BlockSpec((C_IN, N_CLASSES), lambda i: (0, 0)),      # full weight (fetched once)
            pl.BlockSpec((1, N_CLASSES), lambda i: (0, 0)),         # full bias
        ],
        out_specs=pl.BlockSpec((tn, N_CLASSES), lambda i: (i, 0)),
        compiler_params=pltpu.CompilerParams(
            dimension_semantics=("parallel",),   # shard batch tiles across v7x's 2 TCs
            vmem_limit_bytes=vmem_limit,
        ),
    )(x_flat, w_scaled, b_row)
    return out[:n]


def init_params(key):
    # Mirror nn.Linear(1056, 10) default init: U(-1/sqrt(fan_in), 1/sqrt(fan_in))
    kw, kb = jax.random.split(key)
    bound = 1.0 / jnp.sqrt(jnp.float32(C_IN))
    weight = jax.random.uniform(kw, (N_CLASSES, C_IN), jnp.float32, -bound, bound)
    bias = jax.random.uniform(kb, (N_CLASSES,), jnp.float32, -bound, bound)
    return weight, bias


if __name__ == "__main__":
    key = jax.random.PRNGKey(0)
    k_x, k_p = jax.random.split(key)

    batch = 2
    x = jax.random.normal(k_x, (batch, C_IN, H, W), jnp.float32)  # NCHW like PyTorch
    weight, bias = init_params(k_p)

    out = classifier_forward(x, weight, bias)
    out = jax.block_until_ready(out)

    # Reference check in plain JAX (same math, no Pallas)
    ref = jnp.maximum(x, 0.0).mean(axis=(2, 3)) @ weight.T + bias
    assert out.shape == (batch, N_CLASSES)
    assert jnp.allclose(out, ref, atol=1e-4, rtol=1e-4), float(jnp.max(jnp.abs(out - ref)))

    print("KERNEL_OK")
</pallas_src>

<mosaic_0001>
module attributes {stable_mosaic.version = 11 : i64} {
  func.func @classifier_kernel(%arg0: i32, %arg1: memref<8x1056x49xf32, #tpu.memory_space<vmem>>, %arg2: memref<1056x10xf32, #tpu.memory_space<vmem>>, %arg3: memref<1x10xf32, #tpu.memory_space<vmem>>, %arg4: memref<8x10xf32, #tpu.memory_space<vmem>>) attributes {dimension_semantics = [#tpu.dimension_semantics<parallel>], iteration_bounds = array<i64: 1>, scalar_prefetch = 0 : i64, scratch_operands = 0 : i64, tpu.core_type = #tpu.core_type<tc>, window_params = [{transform_indices = @transform_0, window_bounds = array<i64: 8, 1056, 49>}, {pipeline_mode = #tpu.pipeline_mode<synchronous>, transform_indices = @transform_1, window_bounds = array<i64: 1056, 10>}, {pipeline_mode = #tpu.pipeline_mode<synchronous>, transform_indices = @transform_2, window_bounds = array<i64: 1, 10>}, {transform_indices = @transform_3, window_bounds = array<i64: 8, 10>}]} {
    %cst = arith.constant 0.000000e+00 : f32
    %0 = vector.broadcast %cst : f32 to vector<8x10xf32>
    %c0_i32 = arith.constant 0 : i32
    %c3_i32 = arith.constant 3 : i32
    %1 = arith.addi %c0_i32, %c3_i32 : i32
    %c1_i32 = arith.constant 1 : i32
    %2 = scf.for %arg5 = %c0_i32 to %1 step %c1_i32 iter_args(%arg6 = %0) -> (vector<8x10xf32>)  : i32 {
      %c352_i32 = arith.constant 352 : i32
      %7 = arith.muli %arg5, %c352_i32 : i32
      %8 = tpu.assume_multiple %7, 352 : i32
      %c0_4 = arith.constant 0 : index
      %9 = arith.index_cast %8 : i32 to index
      %c0_5 = arith.constant 0 : index
      %10 = vector.load %arg1[%c0_4, %9, %c0_5] : memref<8x1056x49xf32, #tpu.memory_space<vmem>>, vector<8x352x49xf32>
      %cst_6 = arith.constant 0.000000e+00 : f32
      %11 = vector.broadcast %cst_6 : f32 to vector<8x352x49xf32>
      %12 = arith.maximumf %10, %11 : vector<8x352x49xf32>
      %cst_7 = arith.constant dense<0.000000e+00> : vector<8x352xf32>
      %13 = vector.multi_reduction <add>, %12, %cst_7 [2] : vector<8x352x49xf32> to vector<8x352xf32>
      %14 = arith.index_cast %8 : i32 to index
      %c0_8 = arith.constant 0 : index
      %15 = vector.load %arg2[%14, %c0_8] : memref<1056x10xf32, #tpu.memory_space<vmem>>, vector<352x10xf32>
      %cst_9 = arith.constant dense<0.000000e+00> : vector<8x10xf32>
      %16 = tpu.matmul %13, %15, %cst_9 {dimension_numbers = #tpu.dot_dimension_numbers<[1], [0], [0], [1], [0, 0, 1, 1], [], []>} : vector<8x352xf32>, vector<352x10xf32>, vector<8x10xf32> -> vector<8x10xf32>
      %17 = arith.addf %arg6, %16 : vector<8x10xf32>
      scf.yield %17 : vector<8x10xf32>
    }
    %c3_i32_0 = arith.constant 3 : i32
    %c0 = arith.constant 0 : index
    %c0_1 = arith.constant 0 : index
    %3 = vector.load %arg3[%c0, %c0_1] : memref<1x10xf32, #tpu.memory_space<vmem>>, vector<1x10xf32>
    %4 = vector.broadcast %3 : vector<1x10xf32> to vector<8x10xf32>
    %5 = arith.addf %2, %4 : vector<8x10xf32>
    %c0_2 = arith.constant 0 : index
    %c0_3 = arith.constant 0 : index
    %6 = vector.load %arg4[%c0_2, %c0_3] : memref<8x10xf32, #tpu.memory_space<vmem>>, vector<8x10xf32>
    tpu.vector_store %arg4[%c0_2, %c0_3], %5 {strides = array<i32>} : memref<8x10xf32, #tpu.memory_space<vmem>>, vector<8x10xf32>,
    return
  }
  func.func @transform_0(%arg0: i32) -> (i32, i32, i32) {
    %c0_i32 = arith.constant 0 : i32
    %c0_i32_0 = arith.constant 0 : i32
    %c0_i32_1 = arith.constant 0 : i32
    return %arg0, %c0_i32, %c0_i32_0 : i32, i32, i32
  }
  func.func @transform_1(%arg0: i32) -> (i32, i32) {
    %c0_i32 = arith.constant 0 : i32
    %c0_i32_0 = arith.constant 0 : i32
    %c0_i32_1 = arith.constant 0 : i32
    return %c0_i32, %c0_i32_0 : i32, i32
  }
  func.func @transform_2(%arg0: i32) -> (i32, i32) {
    %c0_i32 = arith.constant 0 : i32
    %c0_i32_0 = arith.constant 0 : i32
    %c0_i32_1 = arith.constant 0 : i32
    return %c0_i32, %c0_i32_0 : i32, i32
  }
  func.func @transform_3(%arg0: i32) -> (i32, i32) {
    %c0_i32 = arith.constant 0 : i32
    %c0_i32_0 = arith.constant 0 : i32
    return %arg0, %c0_i32 : i32, i32
  }
}

</mosaic_0001>

<bundles_post_ra>
// kernel: tpu_custom_call.1
= control target key start
LH: loop header
LB: loop body
LE: loop exit
PB: predicated region body
PF: predicated region fallthrough
CT: control target
= control target key end

     0   :  { %8 = vsyncpa [#allocation3], 0  ;;  %v4371_v0 = vmov 0.0   ;;  %s4373_s12 = smov 0   ;;  %s6132_s0 = inlined_call_operand.vmem [shape: f32[8,1056,49], index: 0, kind: input, shape index: {}]   ;;  %s6133_s1 = inlined_call_operand.vmem [shape: f32[1056,10], index: 1, kind: input, shape index: {}]   ;;  %s6134_s2 = inlined_call_operand.vmem [shape: f32[1,10], index: 2, kind: input, shape index: {}]   ;;  %s6135_s3 = inlined_call_operand.hbm [shape: f32[8,10], index: 3, kind: output, shape index: {}]  }
   0x1 LB: > { %s22_s13 = smul.u32 352, %s4345_s12  ;;  %vm728_vm0 = vcmask 400384   ;;  %vm2193_vm1 = vcmask 130112   ;;  %vm2200_vm2 = vcmask 195712   ;;  %vm2207_vm3 = vcmask 261312   ;;  %s20_s12 = sadd.s32 1, %s4345_s12   ;;  %s4345_s12 = sphi %s4373_s12, %s20_s12   ;;  %v4341_v0 = vphi %v4371_v0, %v6166_v0  }
   0x2   : > { %vm2214_vm4 = vcmask 326912   ;;  %vm2221_vm5 = vcmask 392512   ;;  %vm2228_vm6 = vcmask 458112   ;;  %vm2235_vm7 = vcmask 523712   ;;  %p17_p0 = scmp.ge.s32.totalorder %s20_s12, 3  }
   0x3   : > { %s4387_s16 = scalar_lea.vmem %s6132_s0, %s22_s13  ;;  %vm2242_vm8 = vcmask 589312   ;;  %vm2249_vm9 = vcmask 654912   ;;  %vm6137_vm10 = vcmask 720512   ;;  %vm2263_vm11 = vcmask 786112   ;;  %s5748_s19 = scalar_lea.vmem %s6133_s1, %s22_s13 }
   0x4   : > { %v26_v1 = vld [vmem:[%s4387_s16 + $0x10] sm:$0xff]  ;;  %v24_v2 = vld [vmem:[%s4387_s16] sm:$0xff]  ;;  %v27_v3 = vld [vmem:[%s4387_s16 + $0x18] sm:$0xff]  ;;  %vm6136_vm12 = vcmask 851712   ;;  %vm2277_vm13 = vcmask 917312   ;;  %vm2284_vm14 = vcmask 982912  }
   0x5   : > { %v378_v4 = vmax.f32 %v26_v1, 0.0  ;;  %v376_v5 = vmax.f32 %v24_v2, 0.0  ;;  %v379_v6 = vmax.f32 %v27_v3, 0.0  ;;  %v25_v7 = vld [vmem:[%s4387_s16 + $0x8] sm:$0xff]  ;;  %v28_v10 = vld [vmem:[%s4387_s16 + $0x20] sm:$0xff]  ;;  %v31_v17 = vld [vmem:[%s4387_s16 + $0x38] sm:$0xff] }
   0x6   : > { %v377_v8 = vmax.f32 %v25_v7, 0.0  ;;  %v29_v9 = vld [vmem:[%s4387_s16 + $0x28] sm:$0xff]  ;;  %v380_v16 = vmax.f32 %v28_v10, 0.0  ;;  %v30_v18 = vld [vmem:[%s4387_s16 + $0x30] sm:$0xff]  ;;  %v383_v21 = vmax.f32 %v31_v17, 0.0  ;;  %v32_v24 = vld [vmem:[%s4387_s16 + $0x40] sm:$0xff] }
   0x7   : > { %v735_v11 = vsel %vm728_vm0, %v378_v4, 0.0  ;;  %v729_v12 = vsel %vm728_vm0, %v376_v5, 0.0  ;;  %v738_v13 = vsel %vm728_vm0, %v379_v6, 0.0  ;;  %v381_v15 = vmax.f32 %v29_v9, 0.0  ;;  %v33_v23 = vld [vmem:[%s4387_s16 + $0x48] sm:$0xff]  ;;  %v35_v29 = vld [vmem:[%s4387_s16 + $0x58] sm:$0xff] }
   0x8   : > { %736 = vadd.xlane.f32.xlu1 %v735_v11  ;;  %730 = vadd.xlane.f32.xlu0 %v729_v12  ;;  %v732_v14 = vsel %vm728_vm0, %v377_v8, 0.0  ;;  %v741_v20 = vsel %vm728_vm0, %v380_v16, 0.0  ;;  %v382_v22 = vmax.f32 %v30_v18, 0.0  ;;  %v750_v25 = vsel %vm728_vm0, %v383_v21, 0.0  ;;  %v34_v30 = vld [vmem:[%s4387_s16 + $0x50] sm:$0xff]  ;;  %v37_v35 = vld [vmem:[%s4387_s16 + $0x68] sm:$0xff] }
   0x9   : > { %v744_v19 = vsel %vm728_vm0, %v381_v15, 0.0  ;;  %v385_v27 = vmax.f32 %v33_v23, 0.0  ;;  %v384_v28 = vmax.f32 %v32_v24, 0.0  ;;  %v387_v33 = vmax.f32 %v35_v29, 0.0  ;;  %v36_v36 = vld [vmem:[%s4387_s16 + $0x60] sm:$0xff]  ;;  %v39_v41 = vld [vmem:[%s4387_s16 + $0x78] sm:$0xff] }
   0xa   : > { %v747_v26 = vsel %vm728_vm0, %v382_v22, 0.0  ;;  %v386_v34 = vmax.f32 %v34_v30, 0.0  ;;  %v389_v39 = vmax.f32 %v37_v35, 0.0  ;;  %v388_v40 = vmax.f32 %v36_v36, 0.0  ;;  %v38_v42 = vld [vmem:[%s4387_s16 + $0x70] sm:$0xff]  ;;  %v41_v47 = vld [vmem:[%s4387_s16 + $0x88] sm:$0xff] }
   0xb   : > { %v756_v31 = vsel %vm728_vm0, %v385_v27, 0.0  ;;  %v753_v32 = vsel %vm728_vm0, %v384_v28, 0.0  ;;  %v762_v37 = vsel %vm728_vm0, %v387_v33, 0.0  ;;  %v391_v45 = vmax.f32 %v39_v41, 0.0  ;;  %v40_v48 = vld [vmem:[%s4387_s16 + $0x80] sm:$0xff]  ;;  %v43_v53 = vld [vmem:[%s4387_s16 + $0x98] sm:$0xff] }
   0xc   : > { %739 = vadd.xlane.f32.xlu1 %v738_v13  ;;  %733 = vadd.xlane.f32.xlu0 %v732_v14  ;;  %v759_v38 = vsel %vm728_vm0, %v386_v34, 0.0  ;;  %v768_v43 = vsel %vm728_vm0, %v389_v39, 0.0  ;;  %v765_v44 = vsel %vm728_vm0, %v388_v40, 0.0  ;;  %v390_v46 = vmax.f32 %v38_v42, 0.0  ;;  %v42_v54 = vld [vmem:[%s4387_s16 + $0x90] sm:$0xff]  ;;  %v45_v59 = vld [vmem:[%s4387_s16 + $0xa8] sm:$0xff] }
   0xd   : > { %v774_v49 = vsel %vm728_vm0, %v391_v45, 0.0  ;;  %v393_v51 = vmax.f32 %v41_v47, 0.0  ;;  %v392_v52 = vmax.f32 %v40_v48, 0.0  ;;  %v395_v57 = vmax.f32 %v43_v53, 0.0  ;;  %v44_v60 = vld [vmem:[%s4387_s16 + $0xa0] sm:$0xff]  ;;  %v47_v2 = vld [vmem:[%s4387_s16 + $0xb8] sm:$0xff] }
   0xe   : > { %v771_v50 = vsel %vm728_vm0, %v390_v46, 0.0  ;;  %v394_v58 = vmax.f32 %v42_v54, 0.0  ;;  %v397_v63 = vmax.f32 %v45_v59, 0.0  ;;  %v396_v1 = vmax.f32 %v44_v60, 0.0  ;;  %v46_v3 = vld [vmem:[%s4387_s16 + $0xb0] sm:$0xff]  ;;  %v49_v8 = vld [vmem:[%s4387_s16 + $0xc8] sm:$0xff] }
   0xf   : > { %v780_v55 = vsel %vm728_vm0, %v393_v51, 0.0  ;;  %v777_v56 = vsel %vm728_vm0, %v392_v52, 0.0  ;;  %v786_v61 = vsel %vm728_vm0, %v395_v57, 0.0  ;;  %v399_v6 = vmax.f32 %v47_v2, 0.0  ;;  %v48_v9 = vld [vmem:[%s4387_s16 + $0xc0] sm:$0xff]  ;;  %v51_v14 = vld [vmem:[%s4387_s16 + $0xd8] sm:$0xff] }
  0x10   : > { %745 = vadd.xlane.f32.xlu1 %v744_v19  ;;  %742 = vadd.xlane.f32.xlu0 %v741_v20  ;;  %v783_v62 = vsel %vm728_vm0, %v394_v58, 0.0  ;;  %v792_v4 = vsel %vm728_vm0, %v397_v63, 0.0  ;;  %v789_v5 = vsel %vm728_vm0, %v396_v1, 0.0  ;;  %v398_v7 = vmax.f32 %v46_v3, 0.0  ;;  %v50_v15 = vld [vmem:[%s4387_s16 + $0xd0] sm:$0xff]  ;;  %v53_v20 = vld [vmem:[%s4387_s16 + $0xe8] sm:$0xff] }
  0x11   : > { %v798_v10 = vsel %vm728_vm0, %v399_v6, 0.0  ;;  %v401_v12 = vmax.f32 %v49_v8, 0.0  ;;  %v400_v13 = vmax.f32 %v48_v9, 0.0  ;;  %v403_v18 = vmax.f32 %v51_v14, 0.0  ;;  %v52_v21 = vld [vmem:[%s4387_s16 + $0xe0] sm:$0xff]  ;;  %v54_v27 = vld [vmem:[%s4387_s16 + $0xf0] sm:$0xff] }
  0x12   : > { %v795_v11 = vsel %vm728_vm0, %v398_v7, 0.0  ;;  %v402_v19 = vmax.f32 %v50_v15, 0.0  ;;  %v405_v24 = vmax.f32 %v53_v20, 0.0  ;;  %v56_v33 = vld [vmem:[%s4387_s16 + $0x100] sm:$0xff]  ;;  %v58_v39 = vld [vmem:[%s4387_s16 + $0x110] sm:$0xff]  ;;  %vm2291_vm15 = vcmask 1048512  }
  0x13   : > { %v804_v16 = vsel %vm728_vm0, %v401_v12, 0.0  ;;  %v801_v17 = vsel %vm728_vm0, %v400_v13, 0.0  ;;  %v810_v22 = vsel %vm728_vm0, %v403_v18, 0.0  ;;  %v60_v45 = vld [vmem:[%s4387_s16 + $0x120] sm:$0xff]  ;;  %v62_v51 = vld [vmem:[%s4387_s16 + $0x130] sm:$0xff]  ;;  %s4350_s22 = smov (%p17_p0), [#allocation2]  }
  0x14   : > { %751 = vadd.xlane.f32.xlu1 %v750_v25  ;;  %748 = vadd.xlane.f32.xlu0 %v747_v26  ;;  %v807_v23 = vsel %vm728_vm0, %v402_v19, 0.0  ;;  %v404_v25 = vmax.f32 %v52_v21, 0.0  ;;  %v55_v26 = vld [vmem:[%s4387_s16 + $0xf8] sm:$0xff]  ;;  %v816_v28 = vsel %vm728_vm0, %v405_v24, 0.0  ;;  %v64_v57 = vld [vmem:[%s4387_s16 + $0x140] sm:$0xff]  ;;  %v66_v63 = vld [vmem:[%s4387_s16 + $0x150] sm:$0xff] }
  0x15   : > { %v407_v30 = vmax.f32 %v55_v26, 0.0  ;;  %v68_v6 = vld [vmem:[%s4387_s16 + $0x420] sm:$0xff]  ;;  %v70_v12 = vld [vmem:[%s4387_s16 + $0x430] sm:$0xff]  ;;  %s4140_s23 = sshll.u32 (%p17_p0), %s4350_s22, 4  ;;  %s4141_s23 = int_to_ptr.vmem [resolvable:$true] %s4140_s23 }
  0x16   : > { %v813_v29 = vsel %vm728_vm0, %v404_v25, 0.0  ;;  %v72_v18 = vld [vmem:[%s4387_s16 + $0x440] sm:$0xff]  ;;  %v74_v24 = vld [vmem:[%s4387_s16 + $0x450] sm:$0xff]  ;;  %s4307_s24 = scalar_lea.vmem (%p17_p0), %s4141_s23, 128  ;;  %p4312_p2 = scmp.lt.s32.totalorder (%p17_p0), %s4141_s23, %s4141_s23 }
  0x17   : > { %v822_v34 = vsel %vm728_vm0, %v407_v30, 0.0  ;;  %v76_v30 = vld [vmem:[%s4387_s16 + $0x460] sm:$0xff]  ;;  %p4308_p1 = scmp.ne.s32.totalorder (%p17_p0), %s4141_s23, %s4307_s24  ;;  %p4313_p3 = scmp.lt.s32.totalorder (%p17_p0), %s4307_s24, %s4307_s24 }
  0x18   : > { %757 = vadd.xlane.f32.xlu1 %v756_v31  ;;  %754 = vadd.xlane.f32.xlu0 %v753_v32  ;;  %v406_v31 = vmax.f32 %v54_v27, 0.0  ;;  %v57_v32 = vld [vmem:[%s4387_s16 + $0x108] sm:$0xff] }
  0x19   : > { %v409_v36 = vmax.f32 %v57_v32, 0.0  ;;  %p4314_p4 = por (%p17_p0), %p4313_p3, %p4312_p2 }
  0x1a   : > { %v819_v35 = vsel %vm728_vm0, %v406_v31, 0.0 }
  0x1b   : > { %v828_v40 = vsel %vm728_vm0, %v409_v36, 0.0  ;;  %v78_v36 = vld [vmem:[%s4387_s16 + $0x470] sm:$0xff]  ;;  %p4315_p5 = pnand (%p17_p0), %p4314_p4, %p4308_p1 }
  0x1c   : > { %763 = vadd.xlane.f32.xlu1 %v762_v37  ;;  %760 = vadd.xlane.f32.xlu0 %v759_v38  ;;  %v408_v37 = vmax.f32 %v56_v33, 0.0  ;;  %v59_v38 = vld [vmem:[%s4387_s16 + $0x118] sm:$0xff] }
  0x1d   : > { %v411_v42 = vmax.f32 %v59_v38, 0.0 }
  0x1e   : > { %v825_v41 = vsel %vm728_vm0, %v408_v37, 0.0 }
  0x1f   : > { %v834_v46 = vsel %vm728_vm0, %v411_v42, 0.0  ;;  %v80_v42 = vld [vmem:[%s4387_s16 + $0x480] sm:$0xff] }
  0x20   : > { %769 = vadd.xlane.f32.xlu1 %v768_v43  ;;  %766 = vadd.xlane.f32.xlu0 %v765_v44  ;;  %v410_v43 = vmax.f32 %v58_v39, 0.0  ;;  %v61_v44 = vld [vmem:[%s4387_s16 + $0x128] sm:$0xff] }
  0x21   : > { %v413_v48 = vmax.f32 %v61_v44, 0.0 }
  0x22   : > { %v831_v47 = vsel %vm728_vm0, %v410_v43, 0.0 }
  0x23   : > { %v840_v52 = vsel %vm728_vm0, %v413_v48, 0.0  ;;  %v82_v48 = vld [vmem:[%s4387_s16 + $0x490] sm:$0xff] }
  0x24   : > { %775 = vadd.xlane.f32.xlu1 %v774_v49  ;;  %772 = vadd.xlane.f32.xlu0 %v771_v50  ;;  %v412_v49 = vmax.f32 %v60_v45, 0.0  ;;  %v63_v50 = vld [vmem:[%s4387_s16 + $0x138] sm:$0xff] }
  0x25   : > { %v415_v54 = vmax.f32 %v63_v50, 0.0 }
  0x26   : > { %v837_v53 = vsel %vm728_vm0, %v412_v49, 0.0 }
  0x27   : > { %v846_v58 = vsel %vm728_vm0, %v415_v54, 0.0  ;;  %v84_v54 = vld [vmem:[%s4387_s16 + $0x4a0] sm:$0xff] }
  0x28   : > { %781 = vadd.xlane.f32.xlu1 %v780_v55  ;;  %778 = vadd.xlane.f32.xlu0 %v777_v56  ;;  %v414_v55 = vmax.f32 %v62_v51, 0.0  ;;  %v65_v56 = vld [vmem:[%s4387_s16 + $0x148] sm:$0xff] }
  0x29   : > { %v417_v60 = vmax.f32 %v65_v56, 0.0 }
  0x2a   : > { %v843_v59 = vsel %vm728_vm0, %v414_v55, 0.0 }
  0x2b   : > { %v852_v1 = vsel %vm728_vm0, %v417_v60, 0.0  ;;  %v86_v60 = vld [vmem:[%s4387_s16 + $0x4b0] sm:$0xff] }
  0x2c   : > { %787 = vadd.xlane.f32.xlu1 %v786_v61  ;;  %784 = vadd.xlane.f32.xlu0 %v783_v62  ;;  %v416_v61 = vmax.f32 %v64_v57, 0.0  ;;  %v67_v62 = vld [vmem:[%s4387_s16 + $0x158] sm:$0xff] }
  0x2d   : > { %v419_v3 = vmax.f32 %v67_v62, 0.0 }
  0x2e   : > { %v849_v2 = vsel %vm728_vm0, %v416_v61, 0.0 }
  0x2f   : > { %v858_v7 = vsel %vm728_vm0, %v419_v3, 0.0  ;;  %v88_v3 = vld [vmem:[%s4387_s16 + $0x4c0] sm:$0xff] }
  0x30   : > { %793 = vadd.xlane.f32.xlu1 %v792_v4  ;;  %790 = vadd.xlane.f32.xlu0 %v789_v5  ;;  %v418_v4 = vmax.f32 %v66_v63, 0.0  ;;  %v69_v5 = vld [vmem:[%s4387_s16 + $0x428] sm:$0xff] }
  0x31   : > { %v421_v9 = vmax.f32 %v69_v5, 0.0 }
  0x32   : > { %v855_v8 = vsel %vm728_vm0, %v418_v4, 0.0 }
  0x33   : > { %v864_v13 = vsel %vm728_vm0, %v421_v9, 0.0  ;;  %v90_v9 = vld [vmem:[%s4387_s16 + $0x4d0] sm:$0xff] }
  0x34   : > { %799 = vadd.xlane.f32.xlu1 %v798_v10  ;;  %796 = vadd.xlane.f32.xlu0 %v795_v11  ;;  %v420_v10 = vmax.f32 %v68_v6, 0.0  ;;  %v71_v11 = vld [vmem:[%s4387_s16 + $0x438] sm:$0xff] }
  0x35   : > { %v423_v15 = vmax.f32 %v71_v11, 0.0 }
  0x36   : > { %v861_v14 = vsel %vm728_vm0, %v420_v10, 0.0 }
  0x37   : > { %v870_v19 = vsel %vm728_vm0, %v423_v15, 0.0  ;;  %v92_v15 = vld [vmem:[%s4387_s16 + $0x4e0] sm:$0xff] }
  0x38   : > { %805 = vadd.xlane.f32.xlu1 %v804_v16  ;;  %802 = vadd.xlane.f32.xlu0 %v801_v17  ;;  %v422_v16 = vmax.f32 %v70_v12, 0.0  ;;  %v73_v17 = vld [vmem:[%s4387_s16 + $0x448] sm:$0xff] }
  0x39   : > { %v425_v21 = vmax.f32 %v73_v17, 0.0 }
  0x3a   : > { %v867_v20 = vsel %vm728_vm0, %v422_v16, 0.0 }
  0x3b   : > { %v876_v25 = vsel %vm728_vm0, %v425_v21, 0.0  ;;  %v94_v21 = vld [vmem:[%s4387_s16 + $0x4f0] sm:$0xff] }
  0x3c   : > { %811 = vadd.xlane.f32.xlu1 %v810_v22  ;;  %808 = vadd.xlane.f32.xlu0 %v807_v23  ;;  %v424_v22 = vmax.f32 %v72_v18, 0.0  ;;  %v75_v23 = vld [vmem:[%s4387_s16 + $0x458] sm:$0xff] }
  0x3d   : > { %v427_v27 = vmax.f32 %v75_v23, 0.0 }
  0x3e   : > { %v873_v26 = vsel %vm728_vm0, %v424_v22, 0.0  ;;  %v2182_v22 = vlaneseq }
  0x3f   : > { %v882_v31 = vsel %vm728_vm0, %v427_v27, 0.0  ;;  %v97_v27 = vld [vmem:[%s4387_s16 + $0x508] sm:$0xff] }
  0x40   : > { %817 = vadd.xlane.f32.xlu1 %v816_v28  ;;  %814 = vadd.xlane.f32.xlu0 %v813_v29  ;;  %v426_v28 = vmax.f32 %v74_v24, 0.0  ;;  %v77_v29 = vld [vmem:[%s4387_s16 + $0x468] sm:$0xff] }
  0x41   : > { %v429_v33 = vmax.f32 %v77_v29, 0.0  ;;  %v4533_v29 = vand.u32 127, %v2182_v22 }
  0x42   : > { %v879_v32 = vsel %vm728_vm0, %v426_v28, 0.0  ;;  %v96_v28 = vld [vmem:[%s4387_s16 + $0x500] sm:$0xff] }
  0x43   : > { %v888_v37 = vsel %vm728_vm0, %v429_v33, 0.0  ;;  %v448_v33 = vmax.f32 %v96_v28, 0.0  ;;  %v107_v28 = vld [vmem:[%s4387_s16 + $0x558] sm:$0xff] }
  0x44   : > { %823 = vadd.xlane.f32.xlu1 %v822_v34  ;;  %820 = vadd.xlane.f32.xlu0 %v819_v35  ;;  %v428_v34 = vmax.f32 %v76_v30, 0.0  ;;  %v79_v35 = vld [vmem:[%s4387_s16 + $0x478] sm:$0xff]  ;;  %v449_v30 = vmax.f32 %v97_v27, 0.0 }
  0x45   : > { %v431_v39 = vmax.f32 %v79_v35, 0.0  ;;  %v4538_v35 = vshrl.u32 %v2182_v22, 7 }
  0x46   : > { %v885_v38 = vsel %vm728_vm0, %v428_v34, 0.0  ;;  %v99_v34 = vld [vmem:[%s4387_s16 + $0x518] sm:$0xff] }
  0x47   : > { %v894_v43 = vsel %vm728_vm0, %v431_v39, 0.0  ;;  %v2195_v39 = vadd.s32 4294967280, %v4533_v29 }
  0x48   : > { %829 = vadd.xlane.f32.xlu1 %v828_v40  ;;  %826 = vadd.xlane.f32.xlu0 %v825_v41  ;;  %v430_v40 = vmax.f32 %v78_v36, 0.0  ;;  %v81_v41 = vld [vmem:[%s4387_s16 + $0x488] sm:$0xff]  ;;  %v2202_v36 = vadd.s32 4294967272, %v4533_v29 }
  0x49   : > { %v433_v45 = vmax.f32 %v81_v41, 0.0  ;;  %v451_v41 = vmax.f32 %v99_v34, 0.0 }
  0x4a   : > { %v891_v44 = vsel %vm728_vm0, %v430_v40, 0.0  ;;  %v948_v40 = vsel %vm728_vm0, %v449_v30, 0.0 }
  0x4b   : > { %v900_v49 = vsel %vm728_vm0, %v433_v45, 0.0 }
  0x4c   : > { %835 = vadd.xlane.f32.xlu1 %v834_v46  ;;  %832 = vadd.xlane.f32.xlu0 %v831_v47  ;;  %v432_v46 = vmax.f32 %v80_v42, 0.0  ;;  %v83_v47 = vld [vmem:[%s4387_s16 + $0x498] sm:$0xff]  ;;  %v101_v42 = vld [vmem:[%s4387_s16 + $0x528] sm:$0xff] }
  0x4d   : > { %v435_v51 = vmax.f32 %v83_v47, 0.0 }
  0x4e   : > { %v897_v50 = vsel %vm728_vm0, %v432_v46, 0.0  ;;  %v945_v46 = vsel %vm728_vm0, %v448_v33, 0.0 }
  0x4f   : > { %v906_v55 = vsel %vm728_vm0, %v435_v51, 0.0  ;;  %v4555_v51 = vsub.s32 %v2202_v36, %v4538_v35 }
  0x50   : > { %841 = vadd.xlane.f32.xlu1 %v840_v52  ;;  %838 = vadd.xlane.f32.xlu0 %v837_v53  ;;  %v434_v52 = vmax.f32 %v82_v48, 0.0  ;;  %v85_v53 = vld [vmem:[%s4387_s16 + $0x4a8] sm:$0xff]  ;;  %v2216_v48 = vadd.s32 4294967256, %v4533_v29 }
  0x51   : > { %v437_v57 = vmax.f32 %v85_v53, 0.0  ;;  %v4561_v53 = vsub.s32 %v2195_v39, %v4538_v35 }
  0x52   : > { %v903_v56 = vsel %vm728_vm0, %v434_v52, 0.0 }
  0x53   : > { %v912_v61 = vsel %vm728_vm0, %v437_v57, 0.0 }
  0x54   : > { %847 = vadd.xlane.f32.xlu1 %v846_v58  ;;  %844 = vadd.xlane.f32.xlu0 %v843_v59  ;;  %v436_v58 = vmax.f32 %v84_v54, 0.0  ;;  %v87_v59 = vld [vmem:[%s4387_s16 + $0x4b8] sm:$0xff]  ;;  %v453_v54 = vmax.f32 %v101_v42, 0.0  ;;  %v459_v42 = vmax.f32 %v107_v28, 0.0 }
  0x55   : > { %v439_v63 = vmax.f32 %v87_v59, 0.0 }
  0x56   : > { %v909_v62 = vsel %vm728_vm0, %v436_v58, 0.0 }
  0x57   : > { %v918_v4 = vsel %vm728_vm0, %v439_v63, 0.0  ;;  %v103_v63 = vld [vmem:[%s4387_s16 + $0x538] sm:$0xff] }
  0x58   : > { %853 = vadd.xlane.f32.xlu1 %v852_v1  ;;  %850 = vadd.xlane.f32.xlu0 %v849_v2  ;;  %v438_v1 = vmax.f32 %v86_v60, 0.0  ;;  %v89_v2 = vld [vmem:[%s4387_s16 + $0x4c8] sm:$0xff]  ;;  %v4566_v60 = vsub.s32 %v2216_v48, %v4538_v35 }
  0x59   : > { %v441_v6 = vmax.f32 %v89_v2, 0.0 }
  0x5a   : > { %v915_v5 = vsel %vm728_vm0, %v438_v1, 0.0  ;;  %v102_v1 = vld [vmem:[%s4387_s16 + $0x530] sm:$0xff] }
  0x5b   : > { %v924_v10 = vsel %vm728_vm0, %v441_v6, 0.0 }
  0x5c   : > { %859 = vadd.xlane.f32.xlu1 %v858_v7  ;;  %856 = vadd.xlane.f32.xlu0 %v855_v8  ;;  %v440_v7 = vmax.f32 %v88_v3, 0.0  ;;  %v91_v8 = vld [vmem:[%s4387_s16 + $0x4d8] sm:$0xff] }
  0x5d   : > { %v443_v12 = vmax.f32 %v91_v8, 0.0 }
  0x5e   : > { %v921_v11 = vsel %vm728_vm0, %v440_v7, 0.0  ;;  %v960_v7 = vsel %vm728_vm0, %v453_v54, 0.0  ;;  %v2272_v54 = vadd.s32 4294967192, %v4533_v29 }
  0x5f   : > { %v930_v16 = vsel %vm728_vm0, %v443_v12, 0.0 }
  0x60   : > { %865 = vadd.xlane.f32.xlu1 %v864_v13  ;;  %862 = vadd.xlane.f32.xlu0 %v861_v14  ;;  %v442_v13 = vmax.f32 %v90_v9, 0.0  ;;  %v93_v14 = vld [vmem:[%s4387_s16 + $0x4e8] sm:$0xff] }
  0x61   : > { %v445_v18 = vmax.f32 %v93_v14, 0.0 }
  0x62   : > { %v927_v17 = vsel %vm728_vm0, %v442_v13, 0.0 }
  0x63   : > { %v936_v23 = vsel %vm728_vm0, %v445_v18, 0.0  ;;  %v105_v18 = vld [vmem:[%s4387_s16 + $0x548] sm:$0xff] }
  0x64   : > { %871 = vadd.xlane.f32.xlu1 %v870_v19  ;;  %868 = vadd.xlane.f32.xlu0 %v867_v20  ;;  %v444_v19 = vmax.f32 %v92_v15, 0.0  ;;  %v95_v20 = vld [vmem:[%s4387_s16 + $0x4f8] sm:$0xff]  ;;  %v457_v27 = vmax.f32 %v105_v18, 0.0 }
  0x66   : > { %v933_v24 = vsel %vm728_vm0, %v444_v19, 0.0 }
  0x68   : > { %877 = vadd.xlane.f32.xlu1 %v876_v25  ;;  %874 = vadd.xlane.f32.xlu0 %v873_v26  ;;  %v447_v25 = vmax.f32 %v95_v20, 0.0  ;;  %v446_v26 = vmax.f32 %v94_v21, 0.0 }
  0x6c   : > { %883 = vadd.xlane.f32.xlu1 %v882_v31  ;;  %880 = vadd.xlane.f32.xlu0 %v879_v32  ;;  %v942_v31 = vsel %vm728_vm0, %v447_v25, 0.0  ;;  %v939_v32 = vsel %vm728_vm0, %v446_v26, 0.0 }
  0x70   : > { %889 = vadd.xlane.f32.xlu1 %v888_v37  ;;  %886 = vadd.xlane.f32.xlu0 %v885_v38  ;;  %v2188_v37 = vadd.s32 4294967288, %v4533_v29  ;;  %v98_v38 = vld [vmem:[%s4387_s16 + $0x510] sm:$0xff] }
  0x71   : > { %v450_v47 = vmax.f32 %v98_v38, 0.0 }
  0x72   : > { %v4558_v52 = vsub.s32 %v2188_v37, %v4538_v35  ;;  %v106_v37 = vld [vmem:[%s4387_s16 + $0x550] sm:$0xff] }
  0x73   : > { %v951_v59 = vsel %vm728_vm0, %v450_v47, 0.0 }
  0x74   : > { %895 = vadd.xlane.f32.xlu1 %v894_v43  ;;  %892 = vadd.xlane.f32.xlu0 %v891_v44  ;;  %v100_v43 = vld [vmem:[%s4387_s16 + $0x520] sm:$0xff] }
  0x78   : > { %901 = vadd.xlane.f32.xlu1 %v900_v49  ;;  %898 = vadd.xlane.f32.xlu0 %v897_v50  ;;  %v2209_v49 = vadd.s32 4294967264, %v4533_v29  ;;  %v4552_v50 = vsub.s32 %v4533_v29, %v4538_v35 }
  0x7c   : > { %907 = vadd.xlane.f32.xlu1 %v906_v55  ;;  %904 = vadd.xlane.f32.xlu0 %v903_v56  ;;  %v452_v55 = vmax.f32 %v100_v43, 0.0  ;;  %v954_v56 = vsel %vm728_vm0, %v451_v41, 0.0  ;;  %v2251_v41 = vadd.s32 4294967216, %v4533_v29 }
  0x7e   : > { %v957_v8 = vsel %vm728_vm0, %v452_v55, 0.0  ;;  %v2265_v55 = vadd.s32 4294967200, %v4533_v29 }
  0x80   : > { %913 = vadd.xlane.f32.xlu1 %v912_v61  ;;  %910 = vadd.xlane.f32.xlu0 %v909_v62  ;;  %v4569_v61 = vsub.s32 %v2209_v49, %v4538_v35  ;;  %v2230_v62 = vadd.s32 4294967240, %v4533_v29 }
  0x82   : > { %v4584_v15 = vsub.s32 %v2230_v62, %v4538_v35  ;;  %v4625_v62 = vsub.s32 %v2251_v41, %v4538_v35 }
  0x84   : > { %919 = vadd.xlane.f32.xlu1 %v918_v4  ;;  %916 = vadd.xlane.f32.xlu0 %v915_v5  ;;  %v2223_v5 = vadd.s32 4294967248, %v4533_v29 }
  0x86   : > { %v4593_v22 = vsub.s32 %v2223_v5, %v4538_v35 }
  0x88   : > { %925 = vadd.xlane.f32.xlu1 %v924_v10  ;;  %922 = vadd.xlane.f32.xlu0 %v921_v11  ;;  %v455_v10 = vmax.f32 %v103_v63, 0.0  ;;  %v454_v11 = vmax.f32 %v102_v1, 0.0  ;;  %v108_v63 = vld [vmem:[%s4387_s16 + $0x560] sm:$0xff]  ;;  %v978_v1 = vsel %vm728_vm0, %v459_v42, 0.0 }
  0x8a   : > { %v966_v25 = vsel %vm728_vm0, %v455_v10, 0.0  ;;  %v963_v26 = vsel %vm728_vm0, %v454_v11, 0.0  ;;  %v460_v10 = vmax.f32 %v108_v63, 0.0  ;;  %v117_v63 = vld [vmem:[%s4387_s16 + $0x868] sm:$0xff] }
  0x8c   : > { %931 = vadd.xlane.f32.xlu1 %v930_v16  ;;  %928 = vadd.xlane.f32.xlu0 %v927_v17  ;;  %v2244_v16 = vadd.s32 4294967224, %v4533_v29  ;;  %v2237_v17 = vadd.s32 4294967232, %v4533_v29 }
  0x8e   : > { %v4602_v33 = vsub.s32 %v2244_v16, %v4538_v35  ;;  %v4605_v34 = vsub.s32 %v2237_v17, %v4538_v35  ;;  %v111_v16 = vld [vmem:[%s4387_s16 + $0x578] sm:$0xff]  ;;  %v110_v17 = vld [vmem:[%s4387_s16 + $0x570] sm:$0xff] }
  0x90   : > { %937 = vadd.xlane.f32.xlu1 %v936_v23  ;;  %934 = vadd.xlane.f32.xlu0 %v933_v24  ;;  %v104_v23 = vld [vmem:[%s4387_s16 + $0x540] sm:$0xff] }
  0x91   : > { %v456_v36 = vmax.f32 %v104_v23, 0.0 }
  0x93   : > { %v969_v49 = vsel %vm728_vm0, %v456_v36, 0.0 }
  0x94   : > { %943 = vadd.xlane.f32.xlu1 %v942_v31  ;;  %940 = vadd.xlane.f32.xlu0 %v939_v32 }
  0x95   : > { %v737_v44 = vpop.xlane.xlu1 %736  ;;  %v731_v45 = vpop.xlane.xlu0 %730 }
  0x96   : > { %v2187_v2 = vrot.slane %v731_v45, %v4552_v50  ;;  %v2199_v6 = vrot.slane %v737_v44, %v4561_v53  ;;  %v972_v44 = vsel %vm728_vm0, %v457_v27, 0.0  ;;  %v458_v45 = vmax.f32 %v106_v37, 0.0 }
  0x98   : > { %949 = vadd.xlane.f32.xlu1 %v948_v40  ;;  %946 = vadd.xlane.f32.xlu0 %v945_v46  ;;  %v2258_v40 = vadd.s32 4294967208, %v4533_v29 }
  0x99   : > { %v740_v57 = vpop.xlane.xlu1 %739  ;;  %v734_v58 = vpop.xlane.xlu0 %733 }
  0x9a   : > { %v2206_v3 = vrot.slane %v740_v57, %v4555_v51  ;;  %v2192_v4 = vrot.slane %v734_v58, %v4558_v52 }
  0x9c   : > { %v2194_v9 = vsel %vm2193_vm1, %v2192_v4, %v2187_v2  ;;  %955 = vadd.xlane.f32.xlu1 %v954_v56  ;;  %952 = vadd.xlane.f32.xlu0 %v951_v59  ;;  %v109_v56 = vld [vmem:[%s4387_s16 + $0x568] sm:$0xff]  ;;  %v4622_v59 = vsub.s32 %v2258_v40, %v4538_v35 }
  0x9d   : > { %v2201_v12 = vsel %vm2200_vm2, %v2199_v6, %v2194_v9  ;;  %v746_v13 = vpop.xlane.xlu1 %745  ;;  %v743_v14 = vpop.xlane.xlu0 %742  ;;  %v461_v4 = vmax.f32 %v109_v56, 0.0  ;;  %v4636_v9 = vsub.s32 %v2265_v55, %v4538_v35 }
  0x9e   : > { %v2220_v19 = vrot.slane %v746_v13, %v4566_v60  ;;  %v2208_v20 = vsel %vm2207_vm3, %v2206_v3, %v2201_v12  ;;  %v2213_v21 = vrot.slane %v743_v14, %v4569_v61  ;;  %v975_v3 = vsel %vm728_vm0, %v458_v45, 0.0 }
  0x9f   : > { %v2286_v13 = vadd.s32 4294967176, %v4533_v29  ;;  %v2279_v14 = vadd.s32 4294967184, %v4533_v29  ;;  %v113_v29 = vld [vmem:[%s4387_s16 + $0x848] sm:$0xff] }
  0xa0   : > { %v2215_v24 = vsel %vm2214_vm4, %v2213_v21, %v2208_v20  ;;  %961 = vadd.xlane.f32.xlu1 %v960_v7  ;;  %958 = vadd.xlane.f32.xlu0 %v957_v8  ;;  %v4633_v8 = vsub.s32 %v2272_v54, %v4538_v35  ;;  %v465_v37 = vmax.f32 %v113_v29, 0.0  ;;  %v121_v29 = vld [vmem:[%s4387_s16 + $0x888] sm:$0xff] }
  0xa1   : > { %v752_v30 = vpop.xlane.xlu1 %751  ;;  %v2222_v31 = vsel %vm2221_vm5, %v2220_v19, %v2215_v24  ;;  %v749_v32 = vpop.xlane.xlu0 %748  ;;  %v984_v19 = vsel %vm728_vm0, %v461_v4, 0.0  ;;  %v981_v24 = vsel %vm728_vm0, %v460_v10, 0.0 }
  0xa2   : > { %v2234_v38 = vrot.slane %v752_v30, %v4584_v15  ;;  %v2227_v39 = vrot.slane %v749_v32, %v4593_v22  ;;  %v4652_v30 = vsub.s32 %v2286_v13, %v4538_v35  ;;  %v112_v32 = vld [vmem:[%s4387_s16 + $0x840] sm:$0xff]  ;;  %v996_v56 = vsel %vm728_vm0, %v465_v37, 0.0 }
  0xa3   : > { %v473_v37 = vmax.f32 %v121_v29, 0.0 }
  0xa4   : > { %v2229_v43 = vsel %vm2228_vm6, %v2227_v39, %v2222_v31  ;;  %967 = vadd.xlane.f32.xlu1 %v966_v25  ;;  %964 = vadd.xlane.f32.xlu0 %v963_v26  ;;  %v463_v25 = vmax.f32 %v111_v16, 0.0  ;;  %v462_v26 = vmax.f32 %v110_v17, 0.0  ;;  %v4655_v31 = vsub.s32 %v2279_v14, %v4538_v35  ;;  %v115_v35 = vld [vmem:[%s4387_s16 + $0x858] sm:$0xff]  ;;  %v118_v17 = vld [vmem:[%s4387_s16 + $0x870] sm:$0xff] }
  0xa5   : > { %v758_v46 = vpop.xlane.xlu1 %757  ;;  %v2236_v47 = vsel %vm2235_vm7, %v2234_v38, %v2229_v43  ;;  %v755_v48 = vpop.xlane.xlu0 %754  ;;  %v464_v43 = vmax.f32 %v112_v32, 0.0  ;;  %v119_v16 = vld [vmem:[%s4387_s16 + $0x878] sm:$0xff]  ;;  %v120_v32 = vld [vmem:[%s4387_s16 + $0x880] sm:$0xff] }
  0xa6   : > { %v2248_v57 = vrot.slane %v758_v46, %v4602_v33  ;;  %v2241_v58 = vrot.slane %v755_v48, %v4605_v34  ;;  %v990_v41 = vsel %vm728_vm0, %v463_v25, 0.0  ;;  %v987_v42 = vsel %vm728_vm0, %v462_v26, 0.0  ;;  %v114_v46 = vld [vmem:[%s4387_s16 + $0x850] sm:$0xff] }
  0xa7   : > { %v467_v48 = vmax.f32 %v115_v35, 0.0  ;;  %v471_v25 = vmax.f32 %v119_v16, 0.0  ;;  %v470_v26 = vmax.f32 %v118_v17, 0.0 }
  0xa8   : > { %v2243_v2 = vsel %vm2242_vm8, %v2241_v58, %v2236_v47  ;;  %973 = vadd.xlane.f32.xlu1 %v972_v44  ;;  %970 = vadd.xlane.f32.xlu0 %v969_v49  ;;  %v466_v58 = vmax.f32 %v114_v46, 0.0  ;;  %v122_v46 = vld [vmem:[%s4387_s16 + $0x890] sm:$0xff] }
  0xa9   : > { %v764_v5 = vpop.xlane.xlu1 %763  ;;  %v2250_v6 = vsel %vm2249_vm9, %v2248_v57, %v2243_v2  ;;  %v761_v7 = vpop.xlane.xlu0 %760  ;;  %v993_v57 = vsel %vm728_vm0, %v464_v43, 0.0  ;;  %v1002_v10 = vsel %vm728_vm0, %v467_v48, 0.0  ;;  %v472_v43 = vmax.f32 %v120_v32, 0.0 }
  0xaa   : > { %v2262_v11 = vrot.slane %v764_v5, %v4622_v59  ;;  %v2255_v12 = vrot.slane %v761_v7, %v4625_v62  ;;  %v469_v5 = vmax.f32 %v117_v63, 0.0  ;;  %v1020_v48 = vsel %vm728_vm0, %v473_v37, 0.0  ;;  %v128_v37 = vld [vmem:[%s4387_s16 + $0x8c0] sm:$0xff] }
  0xab   : > { %v474_v63 = vmax.f32 %v122_v46, 0.0 }
  0xac   : > { %v2257_v18 = vsel %vm6137_vm10, %v2255_v12, %v2250_v6  ;;  %979 = vadd.xlane.f32.xlu1 %v978_v1  ;;  %976 = vadd.xlane.f32.xlu0 %v975_v3  ;;  %v116_v3 = vld [vmem:[%s4387_s16 + $0x860] sm:$0xff] }
  0xad   : > { %v770_v20 = vpop.xlane.xlu1 %769  ;;  %v2264_v21 = vsel %vm2263_vm11, %v2262_v11, %v2257_v18  ;;  %v767_v23 = vpop.xlane.xlu0 %766  ;;  %v999_v11 = vsel %vm728_vm0, %v466_v58, 0.0  ;;  %v468_v12 = vmax.f32 %v116_v3, 0.0 }
  0xae   : > { %v2276_v27 = vrot.slane %v770_v20, %v4633_v8  ;;  %v2269_v28 = vrot.slane %v767_v23, %v4636_v9 }
  0xb0   : > { %v2271_v36 = vsel %vm6136_vm12, %v2269_v28, %v2264_v21  ;;  %985 = vadd.xlane.f32.xlu1 %v984_v19  ;;  %982 = vadd.xlane.f32.xlu0 %v981_v24  ;;  %v1008_v19 = vsel %vm728_vm0, %v469_v5, 0.0  ;;  %v1005_v24 = vsel %vm728_vm0, %v468_v12, 0.0 }
  0xb1   : > { %v776_v38 = vpop.xlane.xlu1 %775  ;;  %v2278_v39 = vsel %vm2277_vm13, %v2276_v27, %v2271_v36  ;;  %v773_v40 = vpop.xlane.xlu0 %772 }
  0xb2   : > { %v2290_v44 = vrot.slane %v776_v38, %v4652_v30  ;;  %v2283_v45 = vrot.slane %v773_v40, %v4655_v31 }
  0xb4   : > { %v2285_v47 = vsel %vm2284_vm14, %v2283_v45, %v2278_v39  ;;  %991 = vadd.xlane.f32.xlu1 %v990_v41  ;;  %988 = vadd.xlane.f32.xlu0 %v987_v42  ;;  %v1014_v41 = vsel %vm728_vm0, %v471_v25, 0.0  ;;  %v1011_v42 = vsel %vm728_vm0, %v470_v26, 0.0  ;;  %v123_v45 = vld [vmem:[%s4387_s16 + $0x898] sm:$0xff] }
  0xb5   : > { %v4668_v49 = vsel %vm2291_vm15, %v2290_v44, %v2285_v47  ;;  %v782_v54 = vpop.xlane.xlu1 %781  ;;  %v779_v55 = vpop.xlane.xlu0 %778  ;;  %v475_v58 = vmax.f32 %v123_v45, 0.0 }
  0xb6   : > { %v2300_v1 = vrot.slane %v782_v54, %v4558_v52  ;;  %v2296_v2 = vrot.slane %v779_v55, %v4552_v50 }
  0xb7   : > { %v1026_v12 = vsel %vm728_vm0, %v475_v58, 0.0 }
  0xb8   : > { %v2301_v4 = vsel %vm2193_vm1, %v2300_v1, %v2296_v2  ;;  %997 = vadd.xlane.f32.xlu1 %v996_v56  ;;  %994 = vadd.xlane.f32.xlu0 %v993_v57  ;;  %v1017_v57 = vsel %vm728_vm0, %v472_v43, 0.0  ;;  %v125_v1 = vld [vmem:[%s4387_s16 + $0x8a8] sm:$0xff] }
  0xb9   : > { %v788_v6 = vpop.xlane.xlu1 %787  ;;  %v785_v7 = vpop.xlane.xlu0 %784 }
  0xba   : > { %v2310_v13 = vrot.slane %v788_v6, %v4555_v51  ;;  %v2305_v14 = vrot.slane %v785_v7, %v4561_v53  ;;  %v477_v6 = vmax.f32 %v125_v1, 0.0 }
  0xbc   : > { %v2306_v18 = vsel %vm2200_vm2, %v2305_v14, %v2301_v4  ;;  %1003 = vadd.xlane.f32.xlu1 %v1002_v10  ;;  %1000 = vadd.xlane.f32.xlu0 %v999_v11  ;;  %v124_v4 = vld [vmem:[%s4387_s16 + $0x8a0] sm:$0xff] }
  0xbd   : > { %v794_v20 = vpop.xlane.xlu1 %793  ;;  %v2311_v21 = vsel %vm2207_vm3, %v2310_v13, %v2306_v18  ;;  %v791_v23 = vpop.xlane.xlu0 %790  ;;  %v1023_v13 = vsel %vm728_vm0, %v474_v63, 0.0  ;;  %v476_v14 = vmax.f32 %v124_v4, 0.0  ;;  %v127_v18 = vld [vmem:[%s4387_s16 + $0x8b8] sm:$0xff] }
  0xbe   : > { %v2320_v27 = vrot.slane %v794_v20, %v4566_v60  ;;  %v2315_v28 = vrot.slane %v791_v23, %v4569_v61  ;;  %v479_v29 = vmax.f32 %v127_v18, 0.0 }
  0xbf   : > { %v1029_v26 = vsel %vm728_vm0, %v476_v14, 0.0 }
  0xc0   : > { %v2316_v36 = vsel %vm2214_vm4, %v2315_v28, %v2311_v21  ;;  %1009 = vadd.xlane.f32.xlu1 %v1008_v19  ;;  %1006 = vadd.xlane.f32.xlu0 %v1005_v24  ;;  %v126_v19 = vld [vmem:[%s4387_s16 + $0x8b0] sm:$0xff]  ;;  %v1032_v21 = vsel %vm728_vm0, %v477_v6, 0.0  ;;  %v129_v28 = vld [vmem:[%s4387_s16 + $0x8c8] sm:$0xff]  ;;  %v1038_v43 = vsel %vm728_vm0, %v479_v29, 0.0  ;;  %v132_v6 = vld [vmem:[%s4387_s16 + $0x8e0] sm:$0xff] }
  0xc1   : > { %v800_v38 = vpop.xlane.xlu1 %799  ;;  %v2321_v39 = vsel %vm2221_vm5, %v2320_v27, %v2316_v36  ;;  %v797_v40 = vpop.xlane.xlu0 %796  ;;  %v478_v27 = vmax.f32 %v126_v19, 0.0  ;;  %v135_v19 = vld [vmem:[%s4387_s16 + $0x8f8] sm:$0xff] }
  0xc2   : > { %v2330_v35 = vrot.slane %v800_v38, %v4584_v15  ;;  %v2325_v44 = vrot.slane %v797_v40, %v4593_v22 }
  0xc4   : > { %v2326_v47 = vsel %vm2228_vm6, %v2325_v44, %v2321_v39  ;;  %1015 = vadd.xlane.f32.xlu1 %v1014_v41  ;;  %1012 = vadd.xlane.f32.xlu0 %v1011_v42  ;;  %v481_v39 = vmax.f32 %v129_v28, 0.0  ;;  %v480_v44 = vmax.f32 %v128_v37, 0.0 }
  0xc5   : > { %v806_v54 = vpop.xlane.xlu1 %805  ;;  %v2331_v55 = vsel %vm2235_vm7, %v2330_v35, %v2326_v47  ;;  %v803_v56 = vpop.xlane.xlu0 %802  ;;  %v1035_v35 = vsel %vm728_vm0, %v478_v27, 0.0  ;;  %v131_v47 = vld [vmem:[%s4387_s16 + $0x8d8] sm:$0xff]  ;;  %v487_v27 = vmax.f32 %v135_v19, 0.0 }
  0xc6   : > { %v2340_v2 = vrot.slane %v806_v54, %v4602_v33  ;;  %v2335_v3 = vrot.slane %v803_v56, %v4605_v34  ;;  %v1041_v63 = vsel %vm728_vm0, %v480_v44, 0.0  ;;  %v483_v1 = vmax.f32 %v131_v47, 0.0 }
  0xc8   : > { %v2336_v5 = vsel %vm2242_vm8, %v2335_v3, %v2331_v55  ;;  %1021 = vadd.xlane.f32.xlu1 %v1020_v48  ;;  %1018 = vadd.xlane.f32.xlu0 %v1017_v57  ;;  %v130_v48 = vld [vmem:[%s4387_s16 + $0x8d0] sm:$0xff]  ;;  %v1044_v55 = vsel %vm728_vm0, %v481_v39, 0.0  ;;  %v133_v3 = vld [vmem:[%s4387_s16 + $0x8e8] sm:$0xff] }
  0xc9   : > { %v812_v7 = vpop.xlane.xlu1 %811  ;;  %v2341_v10 = vsel %vm2249_vm9, %v2340_v2, %v2336_v5  ;;  %v809_v11 = vpop.xlane.xlu0 %808  ;;  %v482_v2 = vmax.f32 %v130_v48, 0.0  ;;  %v139_v48 = vld [vmem:[%s4387_s16 + $0x918] sm:$0xff] }
  0xca   : > { %v2350_v16 = vrot.slane %v812_v7, %v4622_v59  ;;  %v2345_v17 = vrot.slane %v809_v11, %v4625_v62 }
  0xcb   : > { %v1047_v14 = vsel %vm728_vm0, %v482_v2, 0.0 }
  0xcc   : > { %v2346_v20 = vsel %vm6137_vm10, %v2345_v17, %v2341_v10  ;;  %1027 = vadd.xlane.f32.xlu1 %v1026_v12  ;;  %1024 = vadd.xlane.f32.xlu0 %v1023_v13  ;;  %v485_v10 = vmax.f32 %v133_v3, 0.0  ;;  %v1050_v13 = vsel %vm728_vm0, %v483_v1, 0.0  ;;  %v491_v3 = vmax.f32 %v139_v48, 0.0 }
  0xcd   : > { %v818_v23 = vpop.xlane.xlu1 %817  ;;  %v2351_v24 = vsel %vm2263_vm11, %v2350_v16, %v2346_v20  ;;  %v815_v25 = vpop.xlane.xlu0 %814  ;;  %v484_v16 = vmax.f32 %v132_v6, 0.0  ;;  %v134_v20 = vld [vmem:[%s4387_s16 + $0x8f0] sm:$0xff] }
  0xce   : > { %v2360_v32 = vrot.slane %v818_v23, %v4633_v8  ;;  %v2355_v36 = vrot.slane %v815_v25, %v4636_v9  ;;  %v1056_v23 = vsel %vm728_vm0, %v485_v10, 0.0  ;;  %v486_v28 = vmax.f32 %v134_v20, 0.0  ;;  %v140_v10 = vld [vmem:[%s4387_s16 + $0x920] sm:$0xff] }
  0xcf   : > { %v1053_v29 = vsel %vm728_vm0, %v484_v16, 0.0  ;;  %v492_v19 = vmax.f32 %v140_v10, 0.0 }
  0xd0   : > { %v2356_v38 = vsel %vm6136_vm12, %v2355_v36, %v2351_v24  ;;  %1033 = vadd.xlane.f32.xlu1 %v1032_v21  ;;  %1030 = vadd.xlane.f32.xlu0 %v1029_v26  ;;  %v1059_v44 = vsel %vm728_vm0, %v486_v28, 0.0 }
  0xd1   : > { %v824_v40 = vpop.xlane.xlu1 %823  ;;  %v2361_v41 = vsel %vm2277_vm13, %v2360_v32, %v2356_v38  ;;  %v821_v42 = vpop.xlane.xlu0 %820  ;;  %v137_v32 = vld [vmem:[%s4387_s16 + $0x908] sm:$0xff]  ;;  %v136_v38 = vld [vmem:[%s4387_s16 + $0x900] sm:$0xff] }
  0xd2   : > { %v2370_v45 = vrot.slane %v824_v40, %v4652_v30  ;;  %v2365_v46 = vrot.slane %v821_v42, %v4655_v31  ;;  %v489_v40 = vmax.f32 %v137_v32, 0.0  ;;  %v1077_v32 = vsel %vm728_vm0, %v492_v19, 0.0 }
  0xd4   : > { %v2366_v54 = vsel %vm2284_vm14, %v2365_v46, %v2361_v41  ;;  %1039 = vadd.xlane.f32.xlu1 %v1038_v43  ;;  %1036 = vadd.xlane.f32.xlu0 %v1035_v35  ;;  %v1062_v35 = vsel %vm728_vm0, %v487_v27, 0.0 }
  0xd5   : > { %v4734_v56 = vsel %vm2291_vm15, %v2370_v45, %v2366_v54  ;;  %v830_v57 = vpop.xlane.xlu1 %829  ;;  %v827_v58 = vpop.xlane.xlu0 %826  ;;  %v488_v45 = vmax.f32 %v136_v38, 0.0  ;;  %v138_v54 = vld [vmem:[%s4387_s16 + $0x910] sm:$0xff]  ;;  %v145_v38 = vld [vmem:[%s4387_s16 + $0x948] sm:$0xff] }
  0xd6   : > { %v2379_v4 = vrot.slane %v830_v57, %v4558_v52  ;;  %v2375_v5 = vrot.slane %v827_v58, %v4552_v50  ;;  %v1068_v57 = vsel %vm728_vm0, %v489_v40, 0.0 }
  0xd7   : > { %v1065_v2 = vsel %vm728_vm0, %v488_v45, 0.0 }
  0xd8   : > { %v2380_v7 = vsel %vm2193_vm1, %v2379_v4, %v2375_v5  ;;  %1045 = vadd.xlane.f32.xlu1 %v1044_v55  ;;  %1042 = vadd.xlane.f32.xlu0 %v1041_v63  ;;  %v490_v4 = vmax.f32 %v138_v54, 0.0  ;;  %v141_v5 = vld [vmem:[%s4387_s16 + $0x928] sm:$0xff] }
  0xd9   : > { %v836_v11 = vpop.xlane.xlu1 %835  ;;  %v833_v12 = vpop.xlane.xlu0 %832 }
  0xda   : > { %v2389_v17 = vrot.slane %v836_v11, %v4555_v51  ;;  %v2384_v18 = vrot.slane %v833_v12, %v4561_v53  ;;  %v493_v12 = vmax.f32 %v141_v5, 0.0 }
  0xdc   : > { %v2385_v21 = vsel %vm2200_vm2, %v2384_v18, %v2380_v7  ;;  %1051 = vadd.xlane.f32.xlu1 %v1050_v13  ;;  %1048 = vadd.xlane.f32.xlu0 %v1047_v14  ;;  %v1071_v18 = vsel %vm728_vm0, %v490_v4, 0.0 }
  0xdd   : > { %v842_v24 = vpop.xlane.xlu1 %841  ;;  %v2390_v25 = vsel %vm2207_vm3, %v2389_v17, %v2385_v21  ;;  %v839_v26 = vpop.xlane.xlu0 %838  ;;  %v1074_v17 = vsel %vm728_vm0, %v491_v3, 0.0 }
  0xde   : > { %v2399_v36 = vrot.slane %v842_v24, %v4566_v60  ;;  %v2394_v37 = vrot.slane %v839_v26, %v4569_v61  ;;  %v142_v24 = vld [vmem:[%s4387_s16 + $0x930] sm:$0xff]  ;;  %v1080_v26 = vsel %vm728_vm0, %v493_v12, 0.0  ;;  %v148_v12 = vld [vmem:[%s4387_s16 + $0x960] sm:$0xff] }
  0xe0   : > { %v2395_v39 = vsel %vm2214_vm4, %v2394_v37, %v2390_v25  ;;  %1057 = vadd.xlane.f32.xlu1 %v1056_v23  ;;  %1054 = vadd.xlane.f32.xlu0 %v1053_v29  ;;  %v143_v23 = vld [vmem:[%s4387_s16 + $0x938] sm:$0xff]  ;;  %v494_v37 = vmax.f32 %v142_v24, 0.0 }
  0xe1   : > { %v848_v41 = vpop.xlane.xlu1 %847  ;;  %v2400_v42 = vsel %vm2221_vm5, %v2399_v36, %v2395_v39  ;;  %v845_v43 = vpop.xlane.xlu0 %844  ;;  %v495_v36 = vmax.f32 %v143_v23, 0.0 }
  0xe2   : > { %v2409_v46 = vrot.slane %v848_v41, %v4584_v15  ;;  %v2404_v47 = vrot.slane %v845_v43, %v4593_v22  ;;  %v144_v41 = vld [vmem:[%s4387_s16 + $0x940] sm:$0xff]  ;;  %v497_v43 = vmax.f32 %v145_v38, 0.0 }
  0xe3   : > { %v1086_v45 = vsel %vm728_vm0, %v495_v36, 0.0 }
  0xe4   : > { %v2405_v55 = vsel %vm2228_vm6, %v2404_v47, %v2400_v42  ;;  %1063 = vadd.xlane.f32.xlu1 %v1062_v35  ;;  %1060 = vadd.xlane.f32.xlu0 %v1059_v44  ;;  %v496_v47 = vmax.f32 %v144_v41, 0.0  ;;  %v153_v41 = vld [vmem:[%s4387_s16 + $0x988] sm:$0xff] }
  0xe5   : > { %v854_v58 = vpop.xlane.xlu1 %853  ;;  %v2410_v63 = vsel %vm2235_vm7, %v2409_v46, %v2405_v55  ;;  %v851_v1 = vpop.xlane.xlu0 %850  ;;  %v1083_v46 = vsel %vm728_vm0, %v494_v37, 0.0  ;;  %v147_v55 = vld [vmem:[%s4387_s16 + $0x958] sm:$0xff] }
  0xe6   : > { %v2419_v6 = vrot.slane %v854_v58, %v4602_v33  ;;  %v2414_v7 = vrot.slane %v851_v1, %v4605_v34  ;;  %v1089_v4 = vsel %vm728_vm0, %v496_v47, 0.0  ;;  %v499_v5 = vmax.f32 %v147_v55, 0.0 }
  0xe8   : > { %v2415_v11 = vsel %vm2242_vm8, %v2414_v7, %v2410_v63  ;;  %1069 = vadd.xlane.f32.xlu1 %v1068_v57  ;;  %1066 = vadd.xlane.f32.xlu0 %v1065_v2  ;;  %v146_v57 = vld [vmem:[%s4387_s16 + $0x950] sm:$0xff]  ;;  %v1092_v63 = vsel %vm728_vm0, %v497_v43, 0.0  ;;  %v149_v7 = vld [vmem:[%s4387_s16 + $0x968] sm:$0xff]  ;;  %v1098_v19 = vsel %vm728_vm0, %v499_v5, 0.0 }
  0xe9   : > { %v860_v13 = vpop.xlane.xlu1 %859  ;;  %v2420_v14 = vsel %vm2249_vm9, %v2419_v6, %v2415_v11  ;;  %v857_v16 = vpop.xlane.xlu0 %856  ;;  %v498_v6 = vmax.f32 %v146_v57, 0.0 }
  0xea   : > { %v2429_v20 = vrot.slane %v860_v13, %v4622_v59  ;;  %v2424_v21 = vrot.slane %v857_v16, %v4625_v62 }
  0xec   : > { %v2425_v25 = vsel %vm6137_vm10, %v2424_v21, %v2420_v14  ;;  %1075 = vadd.xlane.f32.xlu1 %v1074_v17  ;;  %1072 = vadd.xlane.f32.xlu0 %v1071_v18  ;;  %v501_v14 = vmax.f32 %v149_v7, 0.0  ;;  %v500_v21 = vmax.f32 %v148_v12, 0.0 }
  0xed   : > { %v4783_v29 = vsel %vm2263_vm11, %v2429_v20, %v2425_v25  ;;  %v866_v27 = vpop.xlane.xlu1 %865  ;;  %v863_v28 = vpop.xlane.xlu0 %862  ;;  %v1095_v20 = vsel %vm728_vm0, %v498_v6, 0.0  ;;  %v151_v25 = vld [vmem:[%s4387_s16 + $0x978] sm:$0xff] }
  0xee   : > { %v2438_v39 = vrot.slane %v866_v27, %v4558_v52  ;;  %v2434_v40 = vrot.slane %v863_v28, %v4552_v50  ;;  %v1104_v28 = vsel %vm728_vm0, %v501_v14, 0.0  ;;  %v1101_v38 = vsel %vm728_vm0, %v500_v21, 0.0 }
  0xf0   : > { %v2439_v42 = vsel %vm2193_vm1, %v2438_v39, %v2434_v40  ;;  %1081 = vadd.xlane.f32.xlu1 %v1080_v26  ;;  %1078 = vadd.xlane.f32.xlu0 %v1077_v32  ;;  %v150_v26 = vld [vmem:[%s4387_s16 + $0x970] sm:$0xff]  ;;  %v503_v39 = vmax.f32 %v151_v25, 0.0 }
  0xf1   : > { %v872_v35 = vpop.xlane.xlu1 %871  ;;  %v869_v44 = vpop.xlane.xlu0 %868  ;;  %v502_v40 = vmax.f32 %v150_v26, 0.0 }
  0xf2   : > { %v2448_v48 = vrot.slane %v872_v35, %v4555_v51  ;;  %v2443_v54 = vrot.slane %v869_v44, %v4561_v53  ;;  %v152_v35 = vld [vmem:[%s4387_s16 + $0x980] sm:$0xff] }
  0xf3   : > { %v1107_v55 = vsel %vm728_vm0, %v502_v40, 0.0  ;;  %v504_v57 = vmax.f32 %v152_v35, 0.0 }
  0xf4   : > { %v2444_v58 = vsel %vm2200_vm2, %v2443_v54, %v2439_v42  ;;  %1087 = vadd.xlane.f32.xlu1 %v1086_v45  ;;  %1084 = vadd.xlane.f32.xlu0 %v1083_v46  ;;  %v505_v45 = vmax.f32 %v153_v41, 0.0  ;;  %v1110_v54 = vsel %vm728_vm0, %v503_v39, 0.0 }
  0xf5   : > { %v878_v1 = vpop.xlane.xlu1 %877  ;;  %v2449_v2 = vsel %vm2207_vm3, %v2448_v48, %v2444_v58  ;;  %v875_v3 = vpop.xlane.xlu0 %874 }
  0xf6   : > { %v2458_v10 = vrot.slane %v878_v1, %v4566_v60  ;;  %v2453_v11 = vrot.slane %v875_v3, %v4569_v61  ;;  %v155_v1 = vld [vmem:[%s4387_s16 + $0x998] sm:$0xff] }
  0xf8   : > { %v2454_v13 = vsel %vm2214_vm4, %v2453_v11, %v2449_v2  ;;  %1093 = vadd.xlane.f32.xlu1 %v1092_v63  ;;  %1090 = vadd.xlane.f32.xlu0 %v1089_v4  ;;  %v154_v2 = vld [vmem:[%s4387_s16 + $0x990] sm:$0xff]  ;;  %v1116_v4 = vsel %vm728_vm0, %v505_v45, 0.0  ;;  %v507_v11 = vmax.f32 %v155_v1, 0.0 }
  0xf9   : > { %v884_v16 = vpop.xlane.xlu1 %883  ;;  %v2459_v17 = vsel %vm2221_vm5, %v2458_v10, %v2454_v13  ;;  %v881_v18 = vpop.xlane.xlu0 %880  ;;  %v1113_v10 = vsel %vm728_vm0, %v504_v57, 0.0  ;;  %v506_v12 = vmax.f32 %v154_v2, 0.0  ;;  %v157_v13 = vld [vmem:[%s4387_s16 + $0xc68] sm:$0xff] }
  0xfa   : > { %v2468_v23 = vrot.slane %v884_v16, %v4584_v15  ;;  %v2463_v24 = vrot.slane %v881_v18, %v4593_v22 }
  0xfb   : > { %v1119_v25 = vsel %vm728_vm0, %v506_v12, 0.0 }
  0xfc   : > { %v2464_v27 = vsel %vm2228_vm6, %v2463_v24, %v2459_v17  ;;  %1099 = vadd.xlane.f32.xlu1 %v1098_v19  ;;  %1096 = vadd.xlane.f32.xlu0 %v1095_v20  ;;  %v156_v17 = vld [vmem:[%s4387_s16 + $0xc60] sm:$0xff]  ;;  %v509_v19 = vmax.f32 %v157_v13, 0.0  ;;  %v1122_v24 = vsel %vm728_vm0, %v507_v11, 0.0 }
  0xfd   : > { %v890_v32 = vpop.xlane.xlu1 %889  ;;  %v2469_v36 = vsel %vm2235_vm7, %v2468_v23, %v2464_v27  ;;  %v887_v37 = vpop.xlane.xlu0 %886  ;;  %v508_v26 = vmax.f32 %v156_v17, 0.0  ;;  %v165_v17 = vld [vmem:[%s4387_s16 + $0xca8] sm:$0xff] }
  0xfe   : > { %v2478_v42 = vrot.slane %v890_v32, %v4602_v33  ;;  %v2473_v43 = vrot.slane %v887_v37, %v4605_v34  ;;  %v159_v32 = vld [vmem:[%s4387_s16 + $0xc78] sm:$0xff] }
 0x100   : > { %v2474_v44 = vsel %vm2242_vm8, %v2473_v43, %v2469_v36  ;;  %1105 = vadd.xlane.f32.xlu1 %v1104_v28  ;;  %1102 = vadd.xlane.f32.xlu0 %v1101_v38  ;;  %v158_v36 = vld [vmem:[%s4387_s16 + $0xc70] sm:$0xff]  ;;  %v1128_v38 = vsel %vm728_vm0, %v509_v19, 0.0  ;;  %v511_v43 = vmax.f32 %v159_v32, 0.0 }
 0x101   : > { %v896_v46 = vpop.xlane.xlu1 %895  ;;  %v2479_v47 = vsel %vm2249_vm9, %v2478_v42, %v2474_v44  ;;  %v893_v48 = vpop.xlane.xlu0 %892  ;;  %v1125_v42 = vsel %vm728_vm0, %v508_v26, 0.0  ;;  %v510_v35 = vmax.f32 %v158_v36, 0.0  ;;  %v161_v44 = vld [vmem:[%s4387_s16 + $0xc88] sm:$0xff] }
 0x102   : > { %v2488_v58 = vrot.slane %v896_v46, %v4622_v59  ;;  %v2483_v63 = vrot.slane %v893_v48, %v4625_v62  ;;  %v160_v48 = vld [vmem:[%s4387_s16 + $0xc80] sm:$0xff] }
 0x103   : > { %v1131_v1 = vsel %vm728_vm0, %v510_v35, 0.0 }
 0x104   : > { %v2484_v3 = vsel %vm6137_vm10, %v2483_v63, %v2479_v47  ;;  %1111 = vadd.xlane.f32.xlu1 %v1110_v54  ;;  %1108 = vadd.xlane.f32.xlu0 %v1107_v55  ;;  %v513_v55 = vmax.f32 %v161_v44, 0.0  ;;  %v1134_v63 = vsel %vm728_vm0, %v511_v43, 0.0 }
 0x105   : > { %v902_v5 = vpop.xlane.xlu1 %901  ;;  %v2489_v6 = vsel %vm2263_vm11, %v2488_v58, %v2484_v3  ;;  %v899_v7 = vpop.xlane.xlu0 %898 }
 0x106   : > { %v2498_v14 = vrot.slane %v902_v5, %v4633_v8  ;;  %v2493_v16 = vrot.slane %v899_v7, %v4636_v9  ;;  %v162_v5 = vld [vmem:[%s4387_s16 + $0xc90] sm:$0xff]  ;;  %v1140_v7 = vsel %vm728_vm0, %v513_v55, 0.0 }
 0x108   : > { %v2494_v18 = vsel %vm6136_vm12, %v2493_v16, %v2489_v6  ;;  %1117 = vadd.xlane.f32.xlu1 %v1116_v4  ;;  %1114 = vadd.xlane.f32.xlu0 %v1113_v10  ;;  %vm3950_vm12 = vcmask 1041409   ;;  %v163_v4 = vld [vmem:[%s4387_s16 + $0xc98] sm:$0xff]  ;;  %v514_v16 = vmax.f32 %v162_v5, 0.0 }
 0x109   : > { %v908_v20 = vpop.xlane.xlu1 %907  ;;  %v2499_v21 = vsel %vm2277_vm13, %v2498_v14, %v2494_v18  ;;  %v905_v23 = vpop.xlane.xlu0 %904  ;;  %v515_v14 = vmax.f32 %v163_v4, 0.0 }
 0x10a   : > { %v2508_v27 = vrot.slane %v908_v20, %v4652_v30  ;;  %v2503_v28 = vrot.slane %v905_v23, %v4655_v31  ;;  %v164_v20 = vld [vmem:[%s4387_s16 + $0xca0] sm:$0xff]  ;;  %v517_v23 = vmax.f32 %v165_v17, 0.0 }
 0x10b   : > { %v516_v32 = vmax.f32 %v164_v20, 0.0 }
 0x10c   : > { %v2504_v37 = vsel %vm2284_vm14, %v2503_v28, %v2499_v21  ;;  %1123 = vadd.xlane.f32.xlu1 %v1122_v24  ;;  %1120 = vadd.xlane.f32.xlu0 %v1119_v25  ;;  %v1143_v28 = vsel %vm728_vm0, %v514_v16, 0.0 }
 0x10d   : > { %v2509_v39 = vsel %vm2291_vm15, %v2508_v27, %v2504_v37  ;;  %v914_v40 = vpop.xlane.xlu1 %913  ;;  %v911_v41 = vpop.xlane.xlu0 %910  ;;  %v1146_v27 = vsel %vm728_vm0, %v515_v14, 0.0  ;;  %v1149_v44 = vsel %vm728_vm0, %v516_v32, 0.0 }
 0x10e   : > { %v4852_v45 = vsel %vm3950_vm12, %v2509_v39, %v4668_v49  ;;  %v2517_v46 = vrot.slane %v914_v40, %v4558_v52  ;;  %v2513_v47 = vrot.slane %v911_v41, %v4552_v50  ;;  %v512_v49 = vmax.f32 %v160_v48, 0.0  ;;  %v166_v39 = vld [vmem:[%s4387_s16 + $0xcb0] sm:$0xff]  ;;  %v169_v48 = vld [vmem:[%s4387_s16 + $0xcc8] sm:$0xff] }
 0x10f   : > { %v1152_v41 = vsel %vm728_vm0, %v517_v23, 0.0 }
 0x110   : > { %v2518_v54 = vsel %vm2193_vm1, %v2517_v46, %v2513_v47  ;;  %1129 = vadd.xlane.f32.xlu1 %v1128_v38  ;;  %1126 = vadd.xlane.f32.xlu0 %v1125_v42  ;;  %v1137_v13 = vsel %vm728_vm0, %v512_v49, 0.0  ;;  %v167_v38 = vld [vmem:[%s4387_s16 + $0xcb8] sm:$0xff]  ;;  %v518_v47 = vmax.f32 %v166_v39, 0.0 }
 0x111   : > { %v920_v57 = vpop.xlane.xlu1 %919  ;;  %v917_v58 = vpop.xlane.xlu0 %916  ;;  %v519_v46 = vmax.f32 %v167_v38, 0.0 }
 0x112   : > { %v2527_v2 = vrot.slane %v920_v57, %v4555_v51  ;;  %v2522_v3 = vrot.slane %v917_v58, %v4561_v53  ;;  %v168_v57 = vld [vmem:[%s4387_s16 + $0xcc0] sm:$0xff]  ;;  %v1155_v4 = vsel %vm728_vm0, %v518_v47, 0.0 }
 0x113   : > { %v520_v5 = vmax.f32 %v168_v57, 0.0 }
 0x114   : > { %v2523_v6 = vsel %vm2200_vm2, %v2522_v3, %v2518_v54  ;;  %1135 = vadd.xlane.f32.xlu1 %v1134_v63  ;;  %1132 = vadd.xlane.f32.xlu0 %v1131_v1  ;;  %v521_v63 = vmax.f32 %v169_v48, 0.0  ;;  %v1158_v3 = vsel %vm728_vm0, %v519_v46, 0.0 }
 0x115   : > { %v926_v10 = vpop.xlane.xlu1 %925  ;;  %v2528_v11 = vsel %vm2207_vm3, %v2527_v2, %v2523_v6  ;;  %v923_v12 = vpop.xlane.xlu0 %922 }
 0x116   : > { %v2537_v18 = vrot.slane %v926_v10, %v4566_v60  ;;  %v2532_v19 = vrot.slane %v923_v12, %v4569_v61  ;;  %v171_v10 = vld [vmem:[%s4387_s16 + $0xcd8] sm:$0xff] }
 0x118   : > { %v2533_v21 = vsel %vm2214_vm4, %v2532_v19, %v2528_v11  ;;  %1141 = vadd.xlane.f32.xlu1 %v1140_v7  ;;  %1138 = vadd.xlane.f32.xlu0 %v1137_v13  ;;  %v170_v11 = vld [vmem:[%s4387_s16 + $0xcd0] sm:$0xff]  ;;  %v1164_v13 = vsel %vm728_vm0, %v521_v63, 0.0  ;;  %v523_v19 = vmax.f32 %v171_v10, 0.0 }
 0x119   : > { %v932_v24 = vpop.xlane.xlu1 %931  ;;  %v2538_v25 = vsel %vm2221_vm5, %v2537_v18, %v2533_v21  ;;  %v929_v26 = vpop.xlane.xlu0 %928  ;;  %v1161_v18 = vsel %vm728_vm0, %v520_v5, 0.0  ;;  %v522_v20 = vmax.f32 %v170_v11, 0.0  ;;  %v173_v21 = vld [vmem:[%s4387_s16 + $0xce8] sm:$0xff] }
 0x11a   : > { %v2547_v36 = vrot.slane %v932_v24, %v4584_v15  ;;  %v2542_v37 = vrot.slane %v929_v26, %v4593_v22 }
 0x11b   : > { %v1167_v38 = vsel %vm728_vm0, %v522_v20, 0.0 }
 0x11c   : > { %v2543_v40 = vsel %vm2228_vm6, %v2542_v37, %v2538_v25  ;;  %1147 = vadd.xlane.f32.xlu1 %v1146_v27  ;;  %1144 = vadd.xlane.f32.xlu0 %v1143_v28  ;;  %v172_v25 = vld [vmem:[%s4387_s16 + $0xce0] sm:$0xff]  ;;  %v525_v27 = vmax.f32 %v173_v21, 0.0  ;;  %v1170_v37 = vsel %vm728_vm0, %v523_v19, 0.0 }
 0x11d   : > { %v938_v42 = vpop.xlane.xlu1 %937  ;;  %v2548_v43 = vsel %vm2235_vm7, %v2547_v36, %v2543_v40  ;;  %v935_v35 = vpop.xlane.xlu0 %934  ;;  %v524_v39 = vmax.f32 %v172_v25, 0.0  ;;  %v181_v25 = vld [vmem:[%s4387_s16 + $0xd28] sm:$0xff] }
 0x11e   : > { %v2557_v54 = vrot.slane %v938_v42, %v4602_v33  ;;  %v2552_v55 = vrot.slane %v935_v35, %v4605_v34  ;;  %v175_v42 = vld [vmem:[%s4387_s16 + $0xcf8] sm:$0xff] }
 0x120   : > { %v2553_v58 = vsel %vm2242_vm8, %v2552_v55, %v2548_v43  ;;  %1153 = vadd.xlane.f32.xlu1 %v1152_v41  ;;  %1150 = vadd.xlane.f32.xlu0 %v1149_v44  ;;  %v174_v43 = vld [vmem:[%s4387_s16 + $0xcf0] sm:$0xff]  ;;  %v1176_v44 = vsel %vm728_vm0, %v525_v27, 0.0  ;;  %v527_v55 = vmax.f32 %v175_v42, 0.0 }
 0x121   : > { %v944_v1 = vpop.xlane.xlu1 %943  ;;  %v2558_v49 = vsel %vm2249_vm9, %v2557_v54, %v2553_v58  ;;  %v941_v2 = vpop.xlane.xlu0 %940  ;;  %v1173_v54 = vsel %vm728_vm0, %v524_v39, 0.0  ;;  %v526_v57 = vmax.f32 %v174_v43, 0.0  ;;  %v177_v58 = vld [vmem:[%s4387_s16 + $0xd08] sm:$0xff] }
 0x122   : > { %v2567_v6 = vrot.slane %v944_v1, %v4622_v59  ;;  %v2562_v7 = vrot.slane %v941_v2, %v4625_v62  ;;  %v176_v2 = vld [vmem:[%s4387_s16 + $0xd00] sm:$0xff] }
 0x123   : > { %v1179_v10 = vsel %vm728_vm0, %v526_v57, 0.0 }
 0x124   : > { %v2563_v12 = vsel %vm6137_vm10, %v2562_v7, %v2558_v49  ;;  %1159 = vadd.xlane.f32.xlu1 %v1158_v3  ;;  %1156 = vadd.xlane.f32.xlu0 %v1155_v4  ;;  %vm6138_vm10 = vcmask 851712   ;;  %v529_v4 = vmax.f32 %v177_v58, 0.0  ;;  %v1182_v7 = vsel %vm728_vm0, %v527_v55, 0.0 }
 0x125   : > { %v950_v14 = vpop.xlane.xlu1 %949  ;;  %v2568_v16 = vsel %vm2263_vm11, %v2567_v6, %v2563_v12  ;;  %v947_v17 = vpop.xlane.xlu0 %946 }
 0x126   : > { %v2577_v23 = vrot.slane %v950_v14, %v4633_v8  ;;  %v2572_v24 = vrot.slane %v947_v17, %v4636_v9  ;;  %v178_v14 = vld [vmem:[%s4387_s16 + $0xd10] sm:$0xff]  ;;  %v1188_v17 = vsel %vm728_vm0, %v529_v4, 0.0 }
 0x128   : > { %v2573_v26 = vsel %vm6138_vm10, %v2572_v24, %v2568_v16  ;;  %1165 = vadd.xlane.f32.xlu1 %v1164_v13  ;;  %1162 = vadd.xlane.f32.xlu0 %v1161_v18  ;;  %v179_v13 = vld [vmem:[%s4387_s16 + $0xd18] sm:$0xff]  ;;  %v530_v24 = vmax.f32 %v178_v14, 0.0  ;;  %vm6139_vm10 = vcmask 720512  }
 0x129   : > { %v956_v28 = vpop.xlane.xlu1 %955  ;;  %v2578_v32 = vsel %vm2277_vm13, %v2577_v23, %v2573_v26  ;;  %v953_v36 = vpop.xlane.xlu0 %952  ;;  %v531_v23 = vmax.f32 %v179_v13, 0.0 }
 0x12a   : > { %v2587_v40 = vrot.slane %v956_v28, %v4652_v30  ;;  %v2582_v41 = vrot.slane %v953_v36, %v4655_v31  ;;  %v180_v28 = vld [vmem:[%s4387_s16 + $0xd20] sm:$0xff]  ;;  %v533_v36 = vmax.f32 %v181_v25, 0.0 }
 0x12b   : > { %v532_v42 = vmax.f32 %v180_v28, 0.0 }
 0x12c   : > { %v2583_v35 = vsel %vm2284_vm14, %v2582_v41, %v2578_v32  ;;  %1171 = vadd.xlane.f32.xlu1 %v1170_v37  ;;  %1168 = vadd.xlane.f32.xlu0 %v1167_v38  ;;  %v1191_v41 = vsel %vm728_vm0, %v530_v24, 0.0 }
 0x12d   : > { %v2588_v46 = vsel %vm2291_vm15, %v2587_v40, %v2583_v35  ;;  %v962_v47 = vpop.xlane.xlu1 %961  ;;  %v959_v48 = vpop.xlane.xlu0 %958  ;;  %v1194_v40 = vsel %vm728_vm0, %v531_v23, 0.0  ;;  %v1197_v58 = vsel %vm728_vm0, %v532_v42, 0.0 }
 0x12e   : > { %v4919_v63 = vsel %vm3950_vm12, %v2588_v46, %v4734_v56  ;;  %v2596_v1 = vrot.slane %v962_v47, %v4558_v52  ;;  %v2592_v49 = vrot.slane %v959_v48, %v4552_v50  ;;  %v528_v56 = vmax.f32 %v176_v2, 0.0  ;;  %v182_v46 = vld [vmem:[%s4387_s16 + $0xd30] sm:$0xff]  ;;  %v185_v2 = vld [vmem:[%s4387_s16 + $0xd48] sm:$0xff] }
 0x12f   : > { %v1200_v48 = vsel %vm728_vm0, %v533_v36, 0.0 }
 0x130   : > { %v2597_v3 = vsel %vm2193_vm1, %v2596_v1, %v2592_v49  ;;  %1177 = vadd.xlane.f32.xlu1 %v1176_v44  ;;  %1174 = vadd.xlane.f32.xlu0 %v1173_v54  ;;  %v1185_v21 = vsel %vm728_vm0, %v528_v56, 0.0  ;;  %v183_v44 = vld [vmem:[%s4387_s16 + $0xd38] sm:$0xff]  ;;  %v534_v49 = vmax.f32 %v182_v46, 0.0 }
 0x131   : > { %v968_v5 = vpop.xlane.xlu1 %967  ;;  %v965_v6 = vpop.xlane.xlu0 %964  ;;  %v535_v1 = vmax.f32 %v183_v44, 0.0 }
 0x132   : > { %v2606_v11 = vrot.slane %v968_v5, %v4555_v51  ;;  %v2601_v12 = vrot.slane %v965_v6, %v4561_v53  ;;  %v184_v5 = vld [vmem:[%s4387_s16 + $0xd40] sm:$0xff]  ;;  %v1203_v13 = vsel %vm728_vm0, %v534_v49, 0.0 }
 0x133   : > { %v536_v14 = vmax.f32 %v184_v5, 0.0  ;;  %v193_v5 = vld [vmem:[%s4387_s16 + $0xd88] sm:$0xff] }
 0x134   : > { %v2602_v16 = vsel %vm2200_vm2, %v2601_v12, %v2597_v3  ;;  %1183 = vadd.xlane.f32.xlu1 %v1182_v7  ;;  %1180 = vadd.xlane.f32.xlu0 %v1179_v10  ;;  %v537_v7 = vmax.f32 %v185_v2, 0.0  ;;  %v1206_v12 = vsel %vm728_vm0, %v535_v1, 0.0 }
 0x135   : > { %v974_v18 = vpop.xlane.xlu1 %973  ;;  %v2607_v19 = vsel %vm2207_vm3, %v2606_v11, %v2602_v16  ;;  %v971_v20 = vpop.xlane.xlu0 %970 }
 0x136   : > { %v2616_v26 = vrot.slane %v974_v18, %v4566_v60  ;;  %v2611_v27 = vrot.slane %v971_v20, %v4569_v61  ;;  %v187_v18 = vld [vmem:[%s4387_s16 + $0xd58] sm:$0xff] }
 0x138   : > { %v2612_v32 = vsel %vm2214_vm4, %v2611_v27, %v2607_v19  ;;  %1189 = vadd.xlane.f32.xlu1 %v1188_v17  ;;  %1186 = vadd.xlane.f32.xlu0 %v1185_v21  ;;  %v186_v19 = vld [vmem:[%s4387_s16 + $0xd50] sm:$0xff]  ;;  %v1212_v21 = vsel %vm728_vm0, %v537_v7, 0.0  ;;  %v539_v27 = vmax.f32 %v187_v18, 0.0 }
 0x139   : > { %v980_v37 = vpop.xlane.xlu1 %979  ;;  %v2617_v38 = vsel %vm2221_vm5, %v2616_v26, %v2612_v32  ;;  %v977_v39 = vpop.xlane.xlu0 %976  ;;  %v1209_v26 = vsel %vm728_vm0, %v536_v14, 0.0  ;;  %v538_v28 = vmax.f32 %v186_v19, 0.0  ;;  %v189_v32 = vld [vmem:[%s4387_s16 + $0xd68] sm:$0xff] }
 0x13a   : > { %v2626_v43 = vrot.slane %v980_v37, %v4584_v15  ;;  %v2621_v35 = vrot.slane %v977_v39, %v4593_v22  ;;  %v188_v39 = vld [vmem:[%s4387_s16 + $0xd60] sm:$0xff] }
 0x13b   : > { %v1215_v44 = vsel %vm728_vm0, %v538_v28, 0.0 }
 0x13c   : > { %v2622_v47 = vsel %vm2228_vm6, %v2621_v35, %v2617_v38  ;;  %1195 = vadd.xlane.f32.xlu1 %v1194_v40  ;;  %1192 = vadd.xlane.f32.xlu0 %v1191_v41  ;;  %v541_v41 = vmax.f32 %v189_v32, 0.0  ;;  %v1218_v35 = vsel %vm728_vm0, %v539_v27, 0.0 }
 0x13d   : > { %v986_v54 = vpop.xlane.xlu1 %985  ;;  %v2627_v55 = vsel %vm2235_vm7, %v2626_v43, %v2622_v47  ;;  %v983_v57 = vpop.xlane.xlu0 %982 }
 0x13e   : > { %v2636_v3 = vrot.slane %v986_v54, %v4602_v33  ;;  %v2631_v4 = vrot.slane %v983_v57, %v4605_v34  ;;  %v190_v54 = vld [vmem:[%s4387_s16 + $0xd70] sm:$0xff]  ;;  %v1224_v57 = vsel %vm728_vm0, %v541_v41, 0.0 }
 0x140   : > { %v2632_v6 = vsel %vm2242_vm8, %v2631_v4, %v2627_v55  ;;  %1201 = vadd.xlane.f32.xlu1 %v1200_v48  ;;  %1198 = vadd.xlane.f32.xlu0 %v1197_v58  ;;  %v191_v48 = vld [vmem:[%s4387_s16 + $0xd78] sm:$0xff]  ;;  %v542_v4 = vmax.f32 %v190_v54, 0.0 }
 0x141   : > { %v992_v10 = vpop.xlane.xlu1 %991  ;;  %v2637_v56 = vsel %vm2249_vm9, %v2636_v3, %v2632_v6  ;;  %v989_v11 = vpop.xlane.xlu0 %988  ;;  %v543_v3 = vmax.f32 %v191_v48, 0.0 }
 0x142   : > { %v2646_v16 = vrot.slane %v992_v10, %v4622_v59  ;;  %v2641_v17 = vrot.slane %v989_v11, %v4625_v62  ;;  %v192_v10 = vld [vmem:[%s4387_s16 + $0xd80] sm:$0xff]  ;;  %v545_v11 = vmax.f32 %v193_v5, 0.0 }
 0x143   : > { %v544_v18 = vmax.f32 %v192_v10, 0.0 }
 0x144   : > { %v2642_v20 = vsel %vm6139_vm10, %v2641_v17, %v2637_v56  ;;  %1207 = vadd.xlane.f32.xlu1 %v1206_v12  ;;  %1204 = vadd.xlane.f32.xlu0 %v1203_v13  ;;  %v1227_v17 = vsel %vm728_vm0, %v542_v4, 0.0 }
 0x145   : > { %v2647_v23 = vsel %vm2263_vm11, %v2646_v16, %v2642_v20  ;;  %v998_v24 = vpop.xlane.xlu1 %997  ;;  %v995_v25 = vpop.xlane.xlu0 %994  ;;  %v1230_v16 = vsel %vm728_vm0, %v543_v3, 0.0  ;;  %v1233_v32 = vsel %vm728_vm0, %v544_v18, 0.0 }
 0x146   : > { %v4970_v36 = vsel %vm3950_vm12, %v2647_v23, %v4783_v29  ;;  %v2655_v37 = vrot.slane %v998_v24, %v4558_v52  ;;  %v2651_v38 = vrot.slane %v995_v25, %v4552_v50  ;;  %v540_v29 = vmax.f32 %v188_v39, 0.0  ;;  %v194_v23 = vld [vmem:[%s4387_s16 + $0xd90] sm:$0xff]  ;;  %v197_v39 = vld [vmem:[%s4387_s16 + $0xda8] sm:$0xff]  ;;  %vm6140_vm12 = vmmov %vm6139_vm10 }
 0x147   : > { %v1236_v25 = vsel %vm728_vm0, %v545_v11, 0.0  ;;  %vm6141_vm10 = vcmask 851712  }
 0x148   : > { %v2656_v40 = vsel %vm2193_vm1, %v2655_v37, %v2651_v38  ;;  %1213 = vadd.xlane.f32.xlu1 %v1212_v21  ;;  %1210 = vadd.xlane.f32.xlu0 %v1209_v26  ;;  %v1221_v2 = vsel %vm728_vm0, %v540_v29, 0.0  ;;  %v195_v21 = vld [vmem:[%s4387_s16 + $0xd98] sm:$0xff]  ;;  %v546_v38 = vmax.f32 %v194_v23, 0.0 }
 0x149   : > { %v1004_v42 = vpop.xlane.xlu1 %1003  ;;  %v1001_v43 = vpop.xlane.xlu0 %1000  ;;  %v547_v37 = vmax.f32 %v195_v21, 0.0 }
 0x14a   : > { %v2665_v46 = vrot.slane %v1004_v42, %v4555_v51  ;;  %v2660_v47 = vrot.slane %v1001_v43, %v4561_v53  ;;  %v196_v42 = vld [vmem:[%s4387_s16 + $0xda0] sm:$0xff]  ;;  %v1239_v48 = vsel %vm728_vm0, %v546_v38, 0.0 }
 0x14b   : > { %v548_v54 = vmax.f32 %v196_v42, 0.0 }
 0x14c   : > { %v2661_v55 = vsel %vm2200_vm2, %v2660_v47, %v2656_v40  ;;  %1219 = vadd.xlane.f32.xlu1 %v1218_v35  ;;  %1216 = vadd.xlane.f32.xlu0 %v1215_v44  ;;  %v549_v35 = vmax.f32 %v197_v39, 0.0  ;;  %v1242_v47 = vsel %vm728_vm0, %v547_v37, 0.0 }
 0x14d   : > { %v1010_v58 = vpop.xlane.xlu1 %1009  ;;  %v2666_v1 = vsel %vm2207_vm3, %v2665_v46, %v2661_v55  ;;  %v1007_v49 = vpop.xlane.xlu0 %1006 }
 0x14e   : > { %v2675_v6 = vrot.slane %v1010_v58, %v4566_v60  ;;  %v2670_v7 = vrot.slane %v1007_v49, %v4569_v61  ;;  %v199_v58 = vld [vmem:[%s4387_s16 + $0xdb8] sm:$0xff] }
 0x150   : > { %v2671_v56 = vsel %vm2214_vm4, %v2670_v7, %v2666_v1  ;;  %1225 = vadd.xlane.f32.xlu1 %v1224_v57  ;;  %1222 = vadd.xlane.f32.xlu0 %v1221_v2  ;;  %v198_v1 = vld [vmem:[%s4387_s16 + $0xdb0] sm:$0xff]  ;;  %v1248_v2 = vsel %vm728_vm0, %v549_v35, 0.0  ;;  %v551_v7 = vmax.f32 %v199_v58, 0.0 }
 0x151   : > { %v1016_v12 = vpop.xlane.xlu1 %1015  ;;  %v2676_v13 = vsel %vm2221_vm5, %v2675_v6, %v2671_v56  ;;  %v1013_v14 = vpop.xlane.xlu0 %1012  ;;  %v1245_v6 = vsel %vm728_vm0, %v548_v54, 0.0  ;;  %v550_v10 = vmax.f32 %v198_v1, 0.0  ;;  %v201_v56 = vld [vmem:[%s4387_s16 + $0x1088] sm:$0xff] }
 0x152   : > { %v2685_v19 = vrot.slane %v1016_v12, %v4584_v15  ;;  %v2680_v20 = vrot.slane %v1013_v14, %v4593_v22 }
 0x153   : > { %v1251_v21 = vsel %vm728_vm0, %v550_v10, 0.0 }
 0x154   : > { %v2681_v24 = vsel %vm2228_vm6, %v2680_v20, %v2676_v13  ;;  %1231 = vadd.xlane.f32.xlu1 %v1230_v16  ;;  %1228 = vadd.xlane.f32.xlu0 %v1227_v17  ;;  %v200_v13 = vld [vmem:[%s4387_s16 + $0x1080] sm:$0xff]  ;;  %v553_v16 = vmax.f32 %v201_v56, 0.0  ;;  %v1254_v20 = vsel %vm728_vm0, %v551_v7, 0.0 }
 0x155   : > { %v1022_v26 = vpop.xlane.xlu1 %1021  ;;  %v2686_v27 = vsel %vm2235_vm7, %v2685_v19, %v2681_v24  ;;  %v1019_v28 = vpop.xlane.xlu0 %1018  ;;  %v552_v23 = vmax.f32 %v200_v13, 0.0  ;;  %v209_v13 = vld [vmem:[%s4387_s16 + $0x10c8] sm:$0xff] }
 0x156   : > { %v2695_v40 = vrot.slane %v1022_v26, %v4602_v33  ;;  %v2690_v41 = vrot.slane %v1019_v28, %v4605_v34  ;;  %v203_v26 = vld [vmem:[%s4387_s16 + $0x1098] sm:$0xff] }
 0x158   : > { %v2691_v43 = vsel %vm2242_vm8, %v2690_v41, %v2686_v27  ;;  %1237 = vadd.xlane.f32.xlu1 %v1236_v25  ;;  %1234 = vadd.xlane.f32.xlu0 %v1233_v32  ;;  %v202_v27 = vld [vmem:[%s4387_s16 + $0x1090] sm:$0xff]  ;;  %v1260_v32 = vsel %vm728_vm0, %v553_v16, 0.0  ;;  %v555_v41 = vmax.f32 %v203_v26, 0.0 }
 0x159   : > { %v1028_v44 = vpop.xlane.xlu1 %1027  ;;  %v2696_v29 = vsel %vm2249_vm9, %v2695_v40, %v2691_v43  ;;  %v1025_v46 = vpop.xlane.xlu0 %1024  ;;  %v1257_v40 = vsel %vm728_vm0, %v552_v23, 0.0  ;;  %v554_v42 = vmax.f32 %v202_v27, 0.0  ;;  %v205_v43 = vld [vmem:[%s4387_s16 + $0x10a8] sm:$0xff] }
 0x15a   : > { %v2705_v55 = vrot.slane %v1028_v44, %v4622_v59  ;;  %v2700_v57 = vrot.slane %v1025_v46, %v4625_v62  ;;  %v204_v46 = vld [vmem:[%s4387_s16 + $0x10a0] sm:$0xff] }
 0x15b   : > { %v1263_v58 = vsel %vm728_vm0, %v554_v42, 0.0 }
 0x15c   : > { %v2701_v49 = vsel %vm6140_vm12, %v2700_v57, %v2696_v29  ;;  %1243 = vadd.xlane.f32.xlu1 %v1242_v47  ;;  %1240 = vadd.xlane.f32.xlu0 %v1239_v48  ;;  %vm3952_vm12 = vcmask 1042434   ;;  %v557_v48 = vmax.f32 %v205_v43, 0.0  ;;  %v1266_v57 = vsel %vm728_vm0, %v555_v41, 0.0 }
 0x15d   : > { %v1034_v3 = vpop.xlane.xlu1 %1033  ;;  %v2706_v4 = vsel %vm2263_vm11, %v2705_v55, %v2701_v49  ;;  %v1031_v5 = vpop.xlane.xlu0 %1030 }
 0x15e   : > { %v2715_v11 = vrot.slane %v1034_v3, %v4633_v8  ;;  %v2710_v12 = vrot.slane %v1031_v5, %v4636_v9  ;;  %v206_v3 = vld [vmem:[%s4387_s16 + $0x10b0] sm:$0xff]  ;;  %v1272_v5 = vsel %vm728_vm0, %v557_v48, 0.0 }
 0x160   : > { %v2711_v14 = vsel %vm6141_vm10, %v2710_v12, %v2706_v4  ;;  %1249 = vadd.xlane.f32.xlu1 %v1248_v2  ;;  %1246 = vadd.xlane.f32.xlu0 %v1245_v6  ;;  %v207_v2 = vld [vmem:[%s4387_s16 + $0x10b8] sm:$0xff]  ;;  %v558_v12 = vmax.f32 %v206_v3, 0.0  ;;  %vm6142_vm10 = vcmask 720512  }
 0x161   : > { %v1040_v17 = vpop.xlane.xlu1 %1039  ;;  %v2716_v18 = vsel %vm2277_vm13, %v2715_v11, %v2711_v14  ;;  %v1037_v19 = vpop.xlane.xlu0 %1036  ;;  %v559_v11 = vmax.f32 %v207_v2, 0.0 }
 0x162   : > { %v2725_v24 = vrot.slane %v1040_v17, %v4652_v30  ;;  %v2720_v25 = vrot.slane %v1037_v19, %v4655_v31  ;;  %v208_v17 = vld [vmem:[%s4387_s16 + $0x10c0] sm:$0xff]  ;;  %v561_v19 = vmax.f32 %v209_v13, 0.0 }
 0x163   : > { %v560_v26 = vmax.f32 %v208_v17, 0.0 }
 0x164   : > { %v2721_v28 = vsel %vm2284_vm14, %v2720_v25, %v2716_v18  ;;  %1255 = vadd.xlane.f32.xlu1 %v1254_v20  ;;  %1252 = vadd.xlane.f32.xlu0 %v1251_v21  ;;  %v1275_v25 = vsel %vm728_vm0, %v558_v12, 0.0 }
 0x165   : > { %v2726_v37 = vsel %vm2291_vm15, %v2725_v24, %v2721_v28  ;;  %v1046_v38 = vpop.xlane.xlu1 %1045  ;;  %v1043_v39 = vpop.xlane.xlu0 %1042  ;;  %v1278_v24 = vsel %vm728_vm0, %v559_v11, 0.0  ;;  %v1281_v43 = vsel %vm728_vm0, %v560_v26, 0.0 }
 0x166   : > { %v5037_v35 = vsel %vm3952_vm12, %v2726_v37, %v4852_v45  ;;  %v2734_v44 = vrot.slane %v1046_v38, %v4558_v52  ;;  %v2730_v29 = vrot.slane %v1043_v39, %v4552_v50  ;;  %v556_v45 = vmax.f32 %v204_v46, 0.0  ;;  %v210_v37 = vld [vmem:[%s4387_s16 + $0x10d0] sm:$0xff]  ;;  %v213_v46 = vld [vmem:[%s4387_s16 + $0x10e8] sm:$0xff] }
 0x167   : > { %v1284_v39 = vsel %vm728_vm0, %v561_v19, 0.0 }
 0x168   : > { %v2735_v47 = vsel %vm2193_vm1, %v2734_v44, %v2730_v29  ;;  %1261 = vadd.xlane.f32.xlu1 %v1260_v32  ;;  %1258 = vadd.xlane.f32.xlu0 %v1257_v40  ;;  %v1269_v56 = vsel %vm728_vm0, %v556_v45, 0.0  ;;  %v211_v32 = vld [vmem:[%s4387_s16 + $0x10d8] sm:$0xff]  ;;  %v562_v29 = vmax.f32 %v210_v37, 0.0 }
 0x169   : > { %v1052_v54 = vpop.xlane.xlu1 %1051  ;;  %v1049_v55 = vpop.xlane.xlu0 %1048  ;;  %v563_v44 = vmax.f32 %v211_v32, 0.0 }
 0x16a   : > { %v2744_v1 = vrot.slane %v1052_v54, %v4555_v51  ;;  %v2739_v49 = vrot.slane %v1049_v55, %v4561_v53  ;;  %v212_v54 = vld [vmem:[%s4387_s16 + $0x10e0] sm:$0xff]  ;;  %v1287_v2 = vsel %vm728_vm0, %v562_v29, 0.0 }
 0x16b   : > { %v564_v3 = vmax.f32 %v212_v54, 0.0 }
 0x16c   : > { %v2740_v4 = vsel %vm2200_vm2, %v2739_v49, %v2735_v47  ;;  %1267 = vadd.xlane.f32.xlu1 %v1266_v57  ;;  %1264 = vadd.xlane.f32.xlu0 %v1263_v58  ;;  %v565_v57 = vmax.f32 %v213_v46, 0.0  ;;  %v1290_v49 = vsel %vm728_vm0, %v563_v44, 0.0 }
 0x16d   : > { %v1058_v6 = vpop.xlane.xlu1 %1057  ;;  %v2745_v7 = vsel %vm2207_vm3, %v2744_v1, %v2740_v4  ;;  %v1055_v10 = vpop.xlane.xlu0 %1054 }
 0x16e   : > { %v2754_v14 = vrot.slane %v1058_v6, %v4566_v60  ;;  %v2749_v16 = vrot.slane %v1055_v10, %v4569_v61  ;;  %v215_v6 = vld [vmem:[%s4387_s16 + $0x10f8] sm:$0xff] }
 0x170   : > { %v2750_v18 = vsel %vm2214_vm4, %v2749_v16, %v2745_v7  ;;  %1273 = vadd.xlane.f32.xlu1 %v1272_v5  ;;  %1270 = vadd.xlane.f32.xlu0 %v1269_v56  ;;  %v214_v7 = vld [vmem:[%s4387_s16 + $0x10f0] sm:$0xff]  ;;  %v1296_v56 = vsel %vm728_vm0, %v565_v57, 0.0  ;;  %v567_v16 = vmax.f32 %v215_v6, 0.0 }
 0x171   : > { %v1064_v20 = vpop.xlane.xlu1 %1063  ;;  %v2755_v21 = vsel %vm2221_vm5, %v2754_v14, %v2750_v18  ;;  %v1061_v23 = vpop.xlane.xlu0 %1060  ;;  %v1293_v14 = vsel %vm728_vm0, %v564_v3, 0.0  ;;  %v566_v17 = vmax.f32 %v214_v7, 0.0  ;;  %v217_v18 = vld [vmem:[%s4387_s16 + $0x1108] sm:$0xff] }
 0x172   : > { %v2764_v27 = vrot.slane %v1064_v20, %v4584_v15  ;;  %v2759_v28 = vrot.slane %v1061_v23, %v4593_v22 }
 0x173   : > { %v1299_v32 = vsel %vm728_vm0, %v566_v17, 0.0 }
 0x174   : > { %v2760_v38 = vsel %vm2228_vm6, %v2759_v28, %v2755_v21  ;;  %1279 = vadd.xlane.f32.xlu1 %v1278_v24  ;;  %1276 = vadd.xlane.f32.xlu0 %v1275_v25  ;;  %v216_v21 = vld [vmem:[%s4387_s16 + $0x1100] sm:$0xff]  ;;  %v569_v24 = vmax.f32 %v217_v18, 0.0  ;;  %v1302_v28 = vsel %vm728_vm0, %v567_v16, 0.0 }
 0x175   : > { %v1070_v40 = vpop.xlane.xlu1 %1069  ;;  %v2765_v41 = vsel %vm2235_vm7, %v2764_v27, %v2760_v38  ;;  %v1067_v42 = vpop.xlane.xlu0 %1066  ;;  %v568_v37 = vmax.f32 %v216_v21, 0.0  ;;  %v262_v21 = vld [vmem:[%s4387_s16 + $0x1530] sm:$0xff] }
 0x176   : > { %v2774_v47 = vrot.slane %v1070_v40, %v4602_v33  ;;  %v2769_v48 = vrot.slane %v1067_v42, %v4605_v34  ;;  %v219_v40 = vld [vmem:[%s4387_s16 + $0x1118] sm:$0xff] }
 0x178   : > { %v2770_v55 = vsel %vm2242_vm8, %v2769_v48, %v2765_v41  ;;  %1285 = vadd.xlane.f32.xlu1 %v1284_v39  ;;  %1282 = vadd.xlane.f32.xlu0 %v1281_v43  ;;  %v218_v41 = vld [vmem:[%s4387_s16 + $0x1110] sm:$0xff]  ;;  %v1308_v43 = vsel %vm728_vm0, %v569_v24, 0.0  ;;  %v571_v48 = vmax.f32 %v219_v40, 0.0 }
 0x179   : > { %v1076_v58 = vpop.xlane.xlu1 %1075  ;;  %v2775_v45 = vsel %vm2249_vm9, %v2774_v47, %v2770_v55  ;;  %v1073_v1 = vpop.xlane.xlu0 %1072  ;;  %v1305_v47 = vsel %vm728_vm0, %v568_v37, 0.0  ;;  %v570_v54 = vmax.f32 %v218_v41, 0.0  ;;  %v260_v55 = vld [vmem:[%s4387_s16 + $0x1520] sm:$0xff] }
 0x17a   : > { %v2784_v4 = vrot.slane %v1076_v58, %v4622_v59  ;;  %v2779_v5 = vrot.slane %v1073_v1, %v4625_v62  ;;  %v220_v1 = vld [vmem:[%s4387_s16 + $0x1120] sm:$0xff] }
 0x17b   : > { %v1311_v6 = vsel %vm728_vm0, %v570_v54, 0.0 }
 0x17c   : > { %v2780_v10 = vsel %vm6142_vm10, %v2779_v5, %v2775_v45  ;;  %1291 = vadd.xlane.f32.xlu1 %v1290_v49  ;;  %1288 = vadd.xlane.f32.xlu0 %v1287_v2  ;;  %vm6143_vm10 = vcmask 851712   ;;  %v612_v2 = vmax.f32 %v260_v55, 0.0  ;;  %v1314_v5 = vsel %vm728_vm0, %v571_v48, 0.0 }
 0x17d   : > { %v1082_v11 = vpop.xlane.xlu1 %1081  ;;  %v2785_v12 = vsel %vm2263_vm11, %v2784_v4, %v2780_v10  ;;  %v1079_v13 = vpop.xlane.xlu0 %1078 }
 0x17e   : > { %v2794_v19 = vrot.slane %v1082_v11, %v4633_v8  ;;  %v2789_v20 = vrot.slane %v1079_v13, %v4636_v9  ;;  %v261_v11 = vld [vmem:[%s4387_s16 + $0x1528] sm:$0xff]  ;;  %v1437_v13 = vsel %vm728_vm0, %v612_v2, 0.0 }
 0x180   : > { %v2790_v23 = vsel %vm6143_vm10, %v2789_v20, %v2785_v12  ;;  %1297 = vadd.xlane.f32.xlu1 %v1296_v56  ;;  %1294 = vadd.xlane.f32.xlu0 %v1293_v14  ;;  %v244_v56 = vld [vmem:[%s4387_s16 + $0x14a0] sm:$0xff]  ;;  %v613_v20 = vmax.f32 %v261_v11, 0.0  ;;  %vm6144_vm10 = vcmask 720512  }
 0x181   : > { %v1088_v25 = vpop.xlane.xlu1 %1087  ;;  %v2795_v26 = vsel %vm2277_vm13, %v2794_v19, %v2790_v23  ;;  %v1085_v27 = vpop.xlane.xlu0 %1084  ;;  %v596_v19 = vmax.f32 %v244_v56, 0.0 }
 0x182   : > { %v2804_v38 = vrot.slane %v1088_v25, %v4652_v30  ;;  %v2799_v39 = vrot.slane %v1085_v27, %v4655_v31  ;;  %v245_v25 = vld [vmem:[%s4387_s16 + $0x14a8] sm:$0xff]  ;;  %v614_v27 = vmax.f32 %v262_v21, 0.0 }
 0x183   : > { %v597_v40 = vmax.f32 %v245_v25, 0.0 }
 0x184   : > { %v2800_v42 = vsel %vm2284_vm14, %v2799_v39, %v2795_v26  ;;  %1303 = vadd.xlane.f32.xlu1 %v1302_v28  ;;  %1300 = vadd.xlane.f32.xlu0 %v1299_v32  ;;  %v1440_v39 = vsel %vm728_vm0, %v613_v20, 0.0 }
 0x185   : > { %v2805_v44 = vsel %vm2291_vm15, %v2804_v38, %v2800_v42  ;;  %v1094_v29 = vpop.xlane.xlu1 %1093  ;;  %v1091_v46 = vpop.xlane.xlu0 %1090  ;;  %v1389_v38 = vsel %vm728_vm0, %v596_v19, 0.0  ;;  %v1392_v55 = vsel %vm728_vm0, %v597_v40, 0.0 }
 0x186   : > { %v5104_v57 = vsel %vm3952_vm12, %v2805_v44, %v4919_v63  ;;  %v2813_v58 = vrot.slane %v1094_v29, %v4558_v52  ;;  %v2809_v45 = vrot.slane %v1091_v46, %v4552_v50  ;;  %v572_v63 = vmax.f32 %v220_v1, 0.0  ;;  %v304_v44 = vld [vmem:[%s4387_s16 + $0x1940] sm:$0xff]  ;;  %v263_v1 = vld [vmem:[%s4387_s16 + $0x1538] sm:$0xff] }
 0x187   : > { %v1443_v46 = vsel %vm728_vm0, %v614_v27, 0.0 }
 0x188   : > { %v2814_v49 = vsel %vm2193_vm1, %v2813_v58, %v2809_v45  ;;  %1309 = vadd.xlane.f32.xlu1 %v1308_v43  ;;  %1306 = vadd.xlane.f32.xlu0 %v1305_v47  ;;  %v1317_v18 = vsel %vm728_vm0, %v572_v63, 0.0  ;;  %v305_v43 = vld [vmem:[%s4387_s16 + $0x1948] sm:$0xff]  ;;  %v656_v45 = vmax.f32 %v304_v44, 0.0 }
 0x189   : > { %v1100_v3 = vpop.xlane.xlu1 %1099  ;;  %v1097_v4 = vpop.xlane.xlu0 %1096  ;;  %v657_v58 = vmax.f32 %v305_v43, 0.0 }
 0x18a   : > { %v2823_v7 = vrot.slane %v1100_v3, %v4555_v51  ;;  %v2818_v10 = vrot.slane %v1097_v4, %v4561_v53  ;;  %v246_v3 = vld [vmem:[%s4387_s16 + $0x14b0] sm:$0xff]  ;;  %v1569_v56 = vsel %vm728_vm0, %v656_v45, 0.0 }
 0x18b   : > { %v598_v11 = vmax.f32 %v246_v3, 0.0  ;;  %v264_v3 = vld [vmem:[%s4387_s16 + $0x1540] sm:$0xff] }
 0x18c   : > { %v2819_v12 = vsel %vm2200_vm2, %v2818_v10, %v2814_v49  ;;  %1315 = vadd.xlane.f32.xlu1 %v1314_v5  ;;  %1312 = vadd.xlane.f32.xlu0 %v1311_v6  ;;  %v615_v5 = vmax.f32 %v263_v1, 0.0  ;;  %v1572_v10 = vsel %vm728_vm0, %v657_v58, 0.0 }
 0x18d   : > { %v1106_v14 = vpop.xlane.xlu1 %1105  ;;  %v2824_v16 = vsel %vm2207_vm3, %v2823_v7, %v2819_v12  ;;  %v1103_v17 = vpop.xlane.xlu0 %1102 }
 0x18e   : > { %v2833_v23 = vrot.slane %v1106_v14, %v4566_v60  ;;  %v2828_v24 = vrot.slane %v1103_v17, %v4569_v61  ;;  %v289_v14 = vld [vmem:[%s4387_s16 + $0x18c8] sm:$0xff] }
 0x190   : > { %v2829_v26 = vsel %vm2214_vm4, %v2828_v24, %v2824_v16  ;;  %1438 = vadd.xlane.f32.xlu1 %v1437_v13  ;;  %1318 = vadd.xlane.f32.xlu0 %v1317_v18  ;;  %v288_v16 = vld [vmem:[%s4387_s16 + $0x18c0] sm:$0xff]  ;;  %v1446_v18 = vsel %vm728_vm0, %v615_v5, 0.0  ;;  %v641_v24 = vmax.f32 %v289_v14, 0.0 }
 0x191   : > { %v1112_v28 = vpop.xlane.xlu1 %1111  ;;  %v2834_v32 = vsel %vm2221_vm5, %v2833_v23, %v2829_v26  ;;  %v1109_v37 = vpop.xlane.xlu0 %1108  ;;  %v1395_v23 = vsel %vm728_vm0, %v598_v11, 0.0  ;;  %v640_v25 = vmax.f32 %v288_v16, 0.0  ;;  %v348_v26 = vld [vmem:[%s4387_s16 + $0x1d60] sm:$0xff] }
 0x192   : > { %v2843_v41 = vrot.slane %v1112_v28, %v4584_v15  ;;  %v2838_v42 = vrot.slane %v1109_v37, %v4593_v22  ;;  %v306_v37 = vld [vmem:[%s4387_s16 + $0x1950] sm:$0xff] }
 0x193   : > { %v1521_v43 = vsel %vm728_vm0, %v640_v25, 0.0 }
 0x194   : > { %v2839_v29 = vsel %vm2228_vm6, %v2838_v42, %v2834_v32  ;;  %1390 = vadd.xlane.f32.xlu1 %v1389_v38  ;;  %1441 = vadd.xlane.f32.xlu0 %v1440_v39  ;;  %v700_v39 = vmax.f32 %v348_v26, 0.0  ;;  %v1524_v42 = vsel %vm728_vm0, %v641_v24, 0.0 }
 0x195   : > { %v1118_v47 = vpop.xlane.xlu1 %1117  ;;  %v2844_v48 = vsel %vm2235_vm7, %v2843_v41, %v2839_v29  ;;  %v1115_v54 = vpop.xlane.xlu0 %1114 }
 0x196   : > { %v2853_v49 = vrot.slane %v1118_v47, %v4602_v33  ;;  %v2848_v2 = vrot.slane %v1115_v54, %v4605_v34  ;;  %v349_v47 = vld [vmem:[%s4387_s16 + $0x1d68] sm:$0xff]  ;;  %v1701_v54 = vsel %vm728_vm0, %v700_v39, 0.0 }
 0x198   : > { %v2849_v4 = vsel %vm2242_vm8, %v2848_v2, %v2844_v48  ;;  %1444 = vadd.xlane.f32.xlu1 %v1443_v46  ;;  %1393 = vadd.xlane.f32.xlu0 %v1392_v55  ;;  %v221_v46 = vld [vmem:[%s4387_s16 + $0x1128] sm:$0xff]  ;;  %v701_v2 = vmax.f32 %v349_v47, 0.0 }
 0x199   : > { %v1124_v6 = vpop.xlane.xlu1 %1123  ;;  %v2854_v63 = vsel %vm2249_vm9, %v2853_v49, %v2849_v4  ;;  %v1121_v7 = vpop.xlane.xlu0 %1120  ;;  %v573_v49 = vmax.f32 %v221_v46, 0.0 }
 0x19a   : > { %v2863_v12 = vrot.slane %v1124_v6, %v4622_v59  ;;  %v2858_v13 = vrot.slane %v1121_v7, %v4625_v62  ;;  %v247_v6 = vld [vmem:[%s4387_s16 + $0x14b8] sm:$0xff]  ;;  %v616_v7 = vmax.f32 %v264_v3, 0.0 }
 0x19b   : > { %v599_v14 = vmax.f32 %v247_v6, 0.0 }
 0x19c   : > { %v2859_v17 = vsel %vm6144_vm10, %v2858_v13, %v2854_v63  ;;  %1573 = vadd.xlane.f32.xlu1 %v1572_v10  ;;  %1570 = vadd.xlane.f32.xlu0 %v1569_v56  ;;  %v1704_v13 = vsel %vm728_vm0, %v701_v2, 0.0 }
 0x19d   : > { %v2864_v19 = vsel %vm2263_vm11, %v2863_v12, %v2859_v17  ;;  %v1130_v20 = vpop.xlane.xlu1 %1129  ;;  %v1127_v21 = vpop.xlane.xlu0 %1126  ;;  %v1320_v12 = vsel %vm728_vm0, %v573_v49, 0.0  ;;  %v1398_v26 = vsel %vm728_vm0, %v599_v14, 0.0 }
 0x19e   : > { %v5155_v27 = vsel %vm3952_vm12, %v2864_v19, %v4970_v36  ;;  %v2872_v28 = vrot.slane %v1130_v20, %v4558_v52  ;;  %v2868_v32 = vrot.slane %v1127_v21, %v4552_v50  ;;  %v658_v36 = vmax.f32 %v306_v37, 0.0  ;;  %v290_v19 = vld [vmem:[%s4387_s16 + $0x18d0] sm:$0xff]  ;;  %v333_v37 = vld [vmem:[%s4387_s16 + $0x1ce8] sm:$0xff]  ;;  %vm6145_vm12 = vmmov %vm6144_vm10 }
 0x19f   : > { %v1449_v21 = vsel %vm728_vm0, %v616_v7, 0.0  ;;  %vm6146_vm10 = vcmask 851712  }
 0x1a0   : > { %v2873_v38 = vsel %vm2193_vm1, %v2872_v28, %v2868_v32  ;;  %1447 = vadd.xlane.f32.xlu1 %v1446_v18  ;;  %1396 = vadd.xlane.f32.xlu0 %v1395_v23  ;;  %v1575_v1 = vsel %vm728_vm0, %v658_v36, 0.0  ;;  %v307_v18 = vld [vmem:[%s4387_s16 + $0x1958] sm:$0xff]  ;;  %v642_v32 = vmax.f32 %v290_v19, 0.0 }
 0x1a1   : > { %v1136_v40 = vpop.xlane.xlu1 %1135  ;;  %v1133_v41 = vpop.xlane.xlu0 %1132  ;;  %v659_v28 = vmax.f32 %v307_v18, 0.0 }
 0x1a2   : > { %v2882_v44 = vrot.slane %v1136_v40, %v4555_v51  ;;  %v2877_v29 = vrot.slane %v1133_v41, %v4561_v53  ;;  %v332_v40 = vld [vmem:[%s4387_s16 + $0x1ce0] sm:$0xff]  ;;  %v1527_v46 = vsel %vm728_vm0, %v642_v32, 0.0 }
 0x1a3   : > { %v684_v47 = vmax.f32 %v332_v40, 0.0 }
 0x1a4   : > { %v2878_v48 = vsel %vm2200_vm2, %v2877_v29, %v2873_v38  ;;  %1525 = vadd.xlane.f32.xlu1 %v1524_v42  ;;  %1522 = vadd.xlane.f32.xlu0 %v1521_v43  ;;  %v685_v42 = vmax.f32 %v333_v37, 0.0  ;;  %v1578_v29 = vsel %vm728_vm0, %v659_v28, 0.0 }
 0x1a5   : > { %v1142_v55 = vpop.xlane.xlu1 %1141  ;;  %v2883_v58 = vsel %vm2207_vm3, %v2882_v44, %v2878_v48  ;;  %v1139_v45 = vpop.xlane.xlu0 %1138 }
 0x1a6   : > { %v2892_v4 = vrot.slane %v1142_v55, %v4566_v60  ;;  %v2887_v5 = vrot.slane %v1139_v45, %v4569_v61  ;;  %v222_v55 = vld [vmem:[%s4387_s16 + $0x1130] sm:$0xff] }
 0x1a8   : > { %v2888_v63 = vsel %vm2214_vm4, %v2887_v5, %v2883_v58  ;;  %1702 = vadd.xlane.f32.xlu1 %v1701_v54  ;;  %1576 = vadd.xlane.f32.xlu0 %v1575_v1  ;;  %v350_v58 = vld [vmem:[%s4387_s16 + $0x1d70] sm:$0xff]  ;;  %v1656_v1 = vsel %vm728_vm0, %v685_v42, 0.0  ;;  %v574_v5 = vmax.f32 %v222_v55, 0.0 }
 0x1a9   : > { %v1148_v10 = vpop.xlane.xlu1 %1147  ;;  %v2893_v56 = vsel %vm2221_vm5, %v2892_v4, %v2888_v63  ;;  %v1145_v11 = vpop.xlane.xlu0 %1144  ;;  %v1653_v4 = vsel %vm728_vm0, %v684_v47, 0.0  ;;  %v702_v6 = vmax.f32 %v350_v58, 0.0  ;;  %v265_v63 = vld [vmem:[%s4387_s16 + $0x1548] sm:$0xff] }
 0x1aa   : > { %v2902_v16 = vrot.slane %v1148_v10, %v4584_v15  ;;  %v2897_v17 = vrot.slane %v1145_v11, %v4593_v22 }
 0x1ab   : > { %v1707_v18 = vsel %vm728_vm0, %v702_v6, 0.0 }
 0x1ac   : > { %v2898_v20 = vsel %vm2228_vm6, %v2897_v17, %v2893_v56  ;;  %1321 = vadd.xlane.f32.xlu1 %v1320_v12  ;;  %1705 = vadd.xlane.f32.xlu0 %v1704_v13  ;;  %v248_v56 = vld [vmem:[%s4387_s16 + $0x14c0] sm:$0xff]  ;;  %v617_v12 = vmax.f32 %v265_v63, 0.0  ;;  %v1323_v17 = vsel %vm728_vm0, %v574_v5, 0.0 }
 0x1ad   : > { %v1154_v23 = vpop.xlane.xlu1 %1153  ;;  %v2903_v24 = vsel %vm2235_vm7, %v2902_v16, %v2898_v20  ;;  %v1151_v25 = vpop.xlane.xlu0 %1150  ;;  %v600_v19 = vmax.f32 %v248_v56, 0.0  ;;  %v292_v56 = vld [vmem:[%s4387_s16 + $0x18e0] sm:$0xff] }
 0x1ae   : > { %v2912_v38 = vrot.slane %v1154_v23, %v4602_v33  ;;  %v2907_v39 = vrot.slane %v1151_v25, %v4605_v34  ;;  %v308_v23 = vld [vmem:[%s4387_s16 + $0x1960] sm:$0xff] }
 0x1b0   : > { %v2908_v41 = vsel %vm2242_vm8, %v2907_v39, %v2903_v24  ;;  %1450 = vadd.xlane.f32.xlu1 %v1449_v21  ;;  %1399 = vadd.xlane.f32.xlu0 %v1398_v26  ;;  %v291_v24 = vld [vmem:[%s4387_s16 + $0x18d8] sm:$0xff]  ;;  %v1452_v26 = vsel %vm728_vm0, %v617_v12, 0.0  ;;  %v660_v39 = vmax.f32 %v308_v23, 0.0 }
 0x1b1   : > { %v1160_v43 = vpop.xlane.xlu1 %1159  ;;  %v2913_v36 = vsel %vm2249_vm9, %v2912_v38, %v2908_v41  ;;  %v1157_v44 = vpop.xlane.xlu0 %1156  ;;  %v1401_v38 = vsel %vm728_vm0, %v600_v19, 0.0  ;;  %v643_v40 = vmax.f32 %v291_v24, 0.0  ;;  %v351_v41 = vld [vmem:[%s4387_s16 + $0x1d78] sm:$0xff] }
 0x1b2   : > { %v2922_v48 = vrot.slane %v1160_v43, %v4622_v59  ;;  %v2917_v54 = vrot.slane %v1157_v44, %v4625_v62 }
 0x1b3   : > { %v1530_v55 = vsel %vm728_vm0, %v643_v40, 0.0 }
 0x1b4   : > { %v2918_v45 = vsel %vm6145_vm12, %v2917_v54, %v2913_v36  ;;  %1579 = vadd.xlane.f32.xlu1 %v1578_v29  ;;  %1528 = vadd.xlane.f32.xlu0 %v1527_v46  ;;  %vm3954_vm12 = vcmask 1043459   ;;  %v334_v36 = vld [vmem:[%s4387_s16 + $0x1cf0] sm:$0xff]  ;;  %v703_v46 = vmax.f32 %v351_v41, 0.0  ;;  %v1581_v54 = vsel %vm728_vm0, %v660_v39, 0.0 }
 0x1b5   : > { %v1166_v49 = vpop.xlane.xlu1 %1165  ;;  %v2923_v2 = vsel %vm2263_vm11, %v2922_v48, %v2918_v45  ;;  %v1163_v3 = vpop.xlane.xlu0 %1162  ;;  %v686_v58 = vmax.f32 %v334_v36, 0.0  ;;  %v224_v36 = vld [vmem:[%s4387_s16 + $0x1140] sm:$0xff] }
 0x1b6   : > { %v2932_v7 = vrot.slane %v1166_v49, %v4633_v8  ;;  %v2927_v10 = vrot.slane %v1163_v3, %v4636_v9  ;;  %v223_v49 = vld [vmem:[%s4387_s16 + $0x1138] sm:$0xff]  ;;  %v1710_v3 = vsel %vm728_vm0, %v703_v46, 0.0 }
 0x1b7   : > { %v1659_v63 = vsel %vm728_vm0, %v686_v58, 0.0 }
 0x1b8   : > { %v2928_v11 = vsel %vm6146_vm10, %v2927_v10, %v2923_v2  ;;  %1657 = vadd.xlane.f32.xlu1 %v1656_v1  ;;  %1654 = vadd.xlane.f32.xlu0 %v1653_v4  ;;  %v575_v10 = vmax.f32 %v223_v49, 0.0  ;;  %vm6147_vm10 = vcmask 720512  }
 0x1b9   : > { %v1172_v13 = vpop.xlane.xlu1 %1171  ;;  %v2933_v14 = vsel %vm2277_vm13, %v2932_v7, %v2928_v11  ;;  %v1169_v16 = vpop.xlane.xlu0 %1168 }
 0x1ba   : > { %v2942_v20 = vrot.slane %v1172_v13, %v4652_v30  ;;  %v2937_v21 = vrot.slane %v1169_v16, %v4655_v31  ;;  %v266_v13 = vld [vmem:[%s4387_s16 + $0x1550] sm:$0xff]  ;;  %v644_v16 = vmax.f32 %v292_v56, 0.0 }
 0x1bb   : > { %v618_v23 = vmax.f32 %v266_v13, 0.0 }
 0x1bc   : > { %v2938_v25 = vsel %vm2284_vm14, %v2937_v21, %v2933_v14  ;;  %1324 = vadd.xlane.f32.xlu1 %v1323_v17  ;;  %1708 = vadd.xlane.f32.xlu0 %v1707_v18  ;;  %v1326_v21 = vsel %vm728_vm0, %v575_v10, 0.0 }
 0x1bd   : > { %v2943_v28 = vsel %vm2291_vm15, %v2942_v20, %v2938_v25  ;;  %v1178_v32 = vpop.xlane.xlu1 %1177  ;;  %v1175_v37 = vpop.xlane.xlu0 %1174  ;;  %v1455_v41 = vsel %vm728_vm0, %v618_v23, 0.0 }
 0x1be   : > { %v2951_v42 = vrot.slane %v1178_v32, %v4558_v52  ;;  %v2947_v43 = vrot.slane %v1175_v37, %v4552_v50  ;;  %v5225_v44 = vsel %vm3954_vm12, %v2943_v28, %v5037_v35  ;;  %v249_v35 = vld [vmem:[%s4387_s16 + $0x14c8] sm:$0xff]  ;;  %v1533_v37 = vsel %vm728_vm0, %v644_v16, 0.0 }
 0x1bf   : > { %v601_v7 = vmax.f32 %v249_v35, 0.0  ;;  %v309_v28 = vld [vmem:[%s4387_s16 + $0x1968] sm:$0xff] }
 0x1c0   : > { %v2952_v29 = vsel %vm2193_vm1, %v2951_v42, %v2947_v43  ;;  %1453 = vadd.xlane.f32.xlu1 %v1452_v26  ;;  %1402 = vadd.xlane.f32.xlu0 %v1401_v38  ;;  %v335_v26 = vld [vmem:[%s4387_s16 + $0x1cf8] sm:$0xff]  ;;  %v661_v43 = vmax.f32 %v309_v28, 0.0 }
 0x1c1   : > { %v1184_v47 = vpop.xlane.xlu1 %1183  ;;  %v1181_v48 = vpop.xlane.xlu0 %1180  ;;  %v1404_v20 = vsel %vm728_vm0, %v601_v7, 0.0  ;;  %v687_v42 = vmax.f32 %v335_v26, 0.0 }
 0x1c2   : > { %v2961_v45 = vrot.slane %v1184_v47, %v4555_v51  ;;  %v2956_v1 = vrot.slane %v1181_v48, %v4561_v53  ;;  %v352_v47 = vld [vmem:[%s4387_s16 + $0x1d80] sm:$0xff]  ;;  %v1584_v35 = vsel %vm728_vm0, %v661_v43, 0.0 }
 0x1c3   : > { %v704_v49 = vmax.f32 %v352_v47, 0.0 }
 0x1c4   : > { %v2957_v2 = vsel %vm2200_vm2, %v2956_v1, %v2952_v29  ;;  %1582 = vadd.xlane.f32.xlu1 %v1581_v54  ;;  %1531 = vadd.xlane.f32.xlu0 %v1530_v55  ;;  %v576_v54 = vmax.f32 %v224_v36, 0.0  ;;  %v1662_v1 = vsel %vm728_vm0, %v687_v42, 0.0 }
 0x1c5   : > { %v1190_v4 = vpop.xlane.xlu1 %1189  ;;  %v2962_v5 = vsel %vm2207_vm3, %v2961_v45, %v2957_v2  ;;  %v1187_v6 = vpop.xlane.xlu0 %1186 }
 0x1c6   : > { %v2971_v11 = vrot.slane %v1190_v4, %v4566_v60  ;;  %v2966_v12 = vrot.slane %v1187_v6, %v4569_v61  ;;  %v267_v4 = vld [vmem:[%s4387_s16 + $0x1558] sm:$0xff] }
 0x1c8   : > { %v2967_v14 = vsel %vm2214_vm4, %v2966_v12, %v2962_v5  ;;  %1711 = vadd.xlane.f32.xlu1 %v1710_v3  ;;  %1660 = vadd.xlane.f32.xlu0 %v1659_v63  ;;  %v250_v5 = vld [vmem:[%s4387_s16 + $0x14d0] sm:$0xff]  ;;  %v1329_v63 = vsel %vm728_vm0, %v576_v54, 0.0  ;;  %v619_v12 = vmax.f32 %v267_v4, 0.0 }
 0x1c9   : > { %v1196_v17 = vpop.xlane.xlu1 %1195  ;;  %v2972_v18 = vsel %vm2221_vm5, %v2971_v11, %v2967_v14  ;;  %v1193_v19 = vpop.xlane.xlu0 %1192  ;;  %v1713_v11 = vsel %vm728_vm0, %v704_v49, 0.0  ;;  %v602_v13 = vmax.f32 %v250_v5, 0.0  ;;  %v310_v14 = vld [vmem:[%s4387_s16 + $0x1970] sm:$0xff] }
 0x1ca   : > { %v2981_v24 = vrot.slane %v1196_v17, %v4584_v15  ;;  %v2976_v25 = vrot.slane %v1193_v19, %v4593_v22 }
 0x1cb   : > { %v1407_v26 = vsel %vm728_vm0, %v602_v13, 0.0 }
 0x1cc   : > { %v2977_v32 = vsel %vm2228_vm6, %v2976_v25, %v2972_v18  ;;  %1405 = vadd.xlane.f32.xlu1 %v1404_v20  ;;  %1327 = vadd.xlane.f32.xlu0 %v1326_v21  ;;  %v293_v18 = vld [vmem:[%s4387_s16 + $0x18e8] sm:$0xff]  ;;  %v662_v20 = vmax.f32 %v310_v14, 0.0  ;;  %v1458_v25 = vsel %vm728_vm0, %v619_v12, 0.0 }
 0x1cd   : > { %v1202_v38 = vpop.xlane.xlu1 %1201  ;;  %v2982_v39 = vsel %vm2235_vm7, %v2981_v24, %v2977_v32  ;;  %v1199_v40 = vpop.xlane.xlu0 %1198  ;;  %v645_v28 = vmax.f32 %v293_v18, 0.0  ;;  %v294_v18 = vld [vmem:[%s4387_s16 + $0x18f0] sm:$0xff] }
 0x1ce   : > { %v2991_v29 = vrot.slane %v1202_v38, %v4602_v33  ;;  %v2986_v46 = vrot.slane %v1199_v40, %v4605_v34  ;;  %v353_v38 = vld [vmem:[%s4387_s16 + $0x1d88] sm:$0xff] }
 0x1d0   : > { %v2987_v48 = vsel %vm2242_vm8, %v2986_v46, %v2982_v39  ;;  %1534 = vadd.xlane.f32.xlu1 %v1533_v37  ;;  %1456 = vadd.xlane.f32.xlu0 %v1455_v41  ;;  %v336_v39 = vld [vmem:[%s4387_s16 + $0x1d00] sm:$0xff]  ;;  %v1587_v41 = vsel %vm728_vm0, %v662_v20, 0.0  ;;  %v705_v46 = vmax.f32 %v353_v38, 0.0 }
 0x1d1   : > { %v1208_v55 = vpop.xlane.xlu1 %1207  ;;  %v2992_v58 = vsel %vm2249_vm9, %v2991_v29, %v2987_v48  ;;  %v1205_v45 = vpop.xlane.xlu0 %1204  ;;  %v1536_v29 = vsel %vm728_vm0, %v645_v28, 0.0  ;;  %v688_v47 = vmax.f32 %v336_v39, 0.0  ;;  %v232_v48 = vld [vmem:[%s4387_s16 + $0x1180] sm:$0xff] }
 0x1d2   : > { %v3001_v2 = vrot.slane %v1208_v55, %v4622_v59  ;;  %v2996_v3 = vrot.slane %v1205_v45, %v4625_v62 }
 0x1d3   : > { %v1665_v4 = vsel %vm728_vm0, %v688_v47, 0.0 }
 0x1d4   : > { %v2997_v6 = vsel %vm6147_vm10, %v2996_v3, %v2992_v58  ;;  %1663 = vadd.xlane.f32.xlu1 %v1662_v1  ;;  %1585 = vadd.xlane.f32.xlu0 %v1584_v35  ;;  %vm6148_vm10 = vcmask 851712   ;;  %v225_v58 = vld [vmem:[%s4387_s16 + $0x1148] sm:$0xff]  ;;  %v584_v35 = vmax.f32 %v232_v48, 0.0  ;;  %v1716_v3 = vsel %vm728_vm0, %v705_v46, 0.0 }
 0x1d5   : > { %v1214_v7 = vpop.xlane.xlu1 %1213  ;;  %v3002_v10 = vsel %vm2263_vm11, %v3001_v2, %v2997_v6  ;;  %v1211_v56 = vpop.xlane.xlu0 %1210  ;;  %v577_v5 = vmax.f32 %v225_v58, 0.0  ;;  %v226_v58 = vld [vmem:[%s4387_s16 + $0x1150] sm:$0xff] }
 0x1d6   : > { %v3011_v16 = vrot.slane %v1214_v7, %v4633_v8  ;;  %v3006_v17 = vrot.slane %v1211_v56, %v4636_v9  ;;  %v233_v7 = vld [vmem:[%s4387_s16 + $0x1188] sm:$0xff]  ;;  %v1353_v56 = vsel %vm728_vm0, %v584_v35, 0.0 }
 0x1d7   : > { %v1332_v14 = vsel %vm728_vm0, %v577_v5, 0.0 }
 0x1d8   : > { %v3007_v19 = vsel %vm6148_vm10, %v3006_v17, %v3002_v10  ;;  %1330 = vadd.xlane.f32.xlu1 %v1329_v63  ;;  %1714 = vadd.xlane.f32.xlu0 %v1713_v11  ;;  %v585_v17 = vmax.f32 %v233_v7, 0.0  ;;  %vm6149_vm10 = vcmask 720512  }
 0x1d9   : > { %v1220_v21 = vpop.xlane.xlu1 %1219  ;;  %v3012_v23 = vsel %vm2277_vm13, %v3011_v16, %v3007_v19  ;;  %v1217_v24 = vpop.xlane.xlu0 %1216 }
 0x1da   : > { %v3021_v32 = vrot.slane %v1220_v21, %v4652_v30  ;;  %v3016_v37 = vrot.slane %v1217_v24, %v4655_v31  ;;  %v268_v21 = vld [vmem:[%s4387_s16 + $0x1560] sm:$0xff]  ;;  %v646_v24 = vmax.f32 %v294_v18, 0.0 }
 0x1db   : > { %v620_v38 = vmax.f32 %v268_v21, 0.0 }
 0x1dc   : > { %v3017_v40 = vsel %vm2284_vm14, %v3016_v37, %v3012_v23  ;;  %1459 = vadd.xlane.f32.xlu1 %v1458_v25  ;;  %1408 = vadd.xlane.f32.xlu0 %v1407_v26  ;;  %v1356_v37 = vsel %vm728_vm0, %v585_v17, 0.0 }
 0x1dd   : > { %v3022_v42 = vsel %vm2291_vm15, %v3021_v32, %v3017_v40  ;;  %v1226_v43 = vpop.xlane.xlu1 %1225  ;;  %v1223_v36 = vpop.xlane.xlu0 %1222  ;;  %v1461_v48 = vsel %vm728_vm0, %v620_v38, 0.0 }
 0x1de   : > { %v3030_v54 = vrot.slane %v1226_v43, %v4558_v52  ;;  %v3026_v55 = vrot.slane %v1223_v36, %v4552_v50  ;;  %v5292_v45 = vsel %vm3954_vm12, %v3022_v42, %v5104_v57  ;;  %v251_v57 = vld [vmem:[%s4387_s16 + $0x14d8] sm:$0xff]  ;;  %v1539_v36 = vsel %vm728_vm0, %v646_v24, 0.0 }
 0x1df   : > { %v603_v16 = vmax.f32 %v251_v57, 0.0  ;;  %v311_v42 = vld [vmem:[%s4387_s16 + $0x1978] sm:$0xff] }
 0x1e0   : > { %v3031_v1 = vsel %vm2193_vm1, %v3030_v54, %v3026_v55  ;;  %1588 = vadd.xlane.f32.xlu1 %v1587_v41  ;;  %1537 = vadd.xlane.f32.xlu0 %v1536_v29  ;;  %v337_v41 = vld [vmem:[%s4387_s16 + $0x1d08] sm:$0xff]  ;;  %v663_v55 = vmax.f32 %v311_v42, 0.0 }
 0x1e1   : > { %v1232_v49 = vpop.xlane.xlu1 %1231  ;;  %v1229_v2 = vpop.xlane.xlu0 %1228  ;;  %v1410_v32 = vsel %vm728_vm0, %v603_v16, 0.0  ;;  %v689_v54 = vmax.f32 %v337_v41, 0.0 }
 0x1e2   : > { %v3040_v6 = vrot.slane %v1232_v49, %v4555_v51  ;;  %v3035_v63 = vrot.slane %v1229_v2, %v4561_v53  ;;  %v354_v49 = vld [vmem:[%s4387_s16 + $0x1d90] sm:$0xff]  ;;  %v1590_v57 = vsel %vm728_vm0, %v663_v55, 0.0 }
 0x1e3   : > { %v706_v7 = vmax.f32 %v354_v49, 0.0  ;;  %v338_v49 = vld [vmem:[%s4387_s16 + $0x1d10] sm:$0xff] }
 0x1e4   : > { %v3036_v10 = vsel %vm2200_vm2, %v3035_v63, %v3031_v1  ;;  %1717 = vadd.xlane.f32.xlu1 %v1716_v3  ;;  %1666 = vadd.xlane.f32.xlu0 %v1665_v4  ;;  %v578_v3 = vmax.f32 %v226_v58, 0.0  ;;  %v1668_v63 = vsel %vm728_vm0, %v689_v54, 0.0 }
 0x1e5   : > { %v1238_v11 = vpop.xlane.xlu1 %1237  ;;  %v3041_v12 = vsel %vm2207_vm3, %v3040_v6, %v3036_v10  ;;  %v1235_v13 = vpop.xlane.xlu0 %1234 }
 0x1e6   : > { %v3050_v19 = vrot.slane %v1238_v11, %v4566_v60  ;;  %v3045_v20 = vrot.slane %v1235_v13, %v4569_v61  ;;  %v252_v11 = vld [vmem:[%s4387_s16 + $0x14e0] sm:$0xff] }
 0x1e8   : > { %v3046_v23 = vsel %vm2214_vm4, %v3045_v20, %v3041_v12  ;;  %1354 = vadd.xlane.f32.xlu1 %v1353_v56  ;;  %1333 = vadd.xlane.f32.xlu0 %v1332_v14  ;;  %v234_v12 = vld [vmem:[%s4387_s16 + $0x1190] sm:$0xff]  ;;  %v1335_v14 = vsel %vm728_vm0, %v578_v3, 0.0  ;;  %v604_v20 = vmax.f32 %v252_v11, 0.0 }
 0x1e9   : > { %v1244_v25 = vpop.xlane.xlu1 %1243  ;;  %v3051_v26 = vsel %vm2221_vm5, %v3050_v19, %v3046_v23  ;;  %v1241_v28 = vpop.xlane.xlu0 %1240  ;;  %v1719_v19 = vsel %vm728_vm0, %v706_v7, 0.0  ;;  %v586_v21 = vmax.f32 %v234_v12, 0.0  ;;  %v276_v23 = vld [vmem:[%s4387_s16 + $0x15a0] sm:$0xff] }
 0x1ea   : > { %v3060_v39 = vrot.slane %v1244_v25, %v4584_v15  ;;  %v3055_v40 = vrot.slane %v1241_v28, %v4593_v22 }
 0x1eb   : > { %v1359_v41 = vsel %vm728_vm0, %v586_v21, 0.0 }
 0x1ec   : > { %v3056_v43 = vsel %vm2228_vm6, %v3055_v40, %v3051_v26  ;;  %1411 = vadd.xlane.f32.xlu1 %v1410_v32  ;;  %1357 = vadd.xlane.f32.xlu0 %v1356_v37  ;;  %v269_v26 = vld [vmem:[%s4387_s16 + $0x1568] sm:$0xff]  ;;  %v628_v37 = vmax.f32 %v276_v23, 0.0  ;;  %v1413_v40 = vsel %vm728_vm0, %v604_v20, 0.0 }
 0x1ed   : > { %v1250_v29 = vpop.xlane.xlu1 %1249  ;;  %v3061_v46 = vsel %vm2235_vm7, %v3060_v39, %v3056_v43  ;;  %v1247_v47 = vpop.xlane.xlu0 %1246  ;;  %v621_v42 = vmax.f32 %v269_v26, 0.0  ;;  %v253_v26 = vld [vmem:[%s4387_s16 + $0x14e8] sm:$0xff] }
 0x1ee   : > { %v3070_v1 = vrot.slane %v1250_v29, %v4602_v33  ;;  %v3065_v35 = vrot.slane %v1247_v47, %v4605_v34  ;;  %v277_v29 = vld [vmem:[%s4387_s16 + $0x15a8] sm:$0xff]  ;;  %v1485_v47 = vsel %vm728_vm0, %v628_v37, 0.0 }
 0x1ef   : > { %v1464_v58 = vsel %vm728_vm0, %v621_v42, 0.0 }
 0x1f0   : > { %v3066_v2 = vsel %vm2242_vm8, %v3065_v35, %v3061_v46  ;;  %1540 = vadd.xlane.f32.xlu1 %v1539_v36  ;;  %1462 = vadd.xlane.f32.xlu0 %v1461_v48  ;;  %v629_v35 = vmax.f32 %v277_v29, 0.0 }
 0x1f1   : > { %v1256_v4 = vpop.xlane.xlu1 %1255  ;;  %v3071_v5 = vsel %vm2249_vm9, %v3070_v1, %v3066_v2  ;;  %v1253_v6 = vpop.xlane.xlu0 %1252 }
 0x1f2   : > { %v3080_v10 = vrot.slane %v1256_v4, %v4622_v59  ;;  %v3075_v56 = vrot.slane %v1253_v6, %v4625_v62  ;;  %v312_v4 = vld [vmem:[%s4387_s16 + $0x1980] sm:$0xff]  ;;  %v690_v6 = vmax.f32 %v338_v49, 0.0 }
 0x1f3   : > { %v664_v11 = vmax.f32 %v312_v4, 0.0 }
 0x1f4   : > { %v3076_v13 = vsel %vm6149_vm10, %v3075_v56, %v3071_v5  ;;  %1669 = vadd.xlane.f32.xlu1 %v1668_v63  ;;  %1591 = vadd.xlane.f32.xlu0 %v1590_v57  ;;  %v1488_v56 = vsel %vm728_vm0, %v629_v35, 0.0 }
 0x1f5   : > { %v3081_v16 = vsel %vm2263_vm11, %v3080_v10, %v3076_v13  ;;  %v1262_v17 = vpop.xlane.xlu1 %1261  ;;  %v1259_v18 = vpop.xlane.xlu0 %1258  ;;  %v1593_v23 = vsel %vm728_vm0, %v664_v11, 0.0 }
 0x1f6   : > { %v3089_v24 = vrot.slane %v1262_v17, %v4558_v52  ;;  %v3085_v25 = vrot.slane %v1259_v18, %v4552_v50  ;;  %v5343_v28 = vsel %vm3954_vm12, %v3081_v16, %v5155_v27  ;;  %v295_v27 = vld [vmem:[%s4387_s16 + $0x18f8] sm:$0xff]  ;;  %v1671_v18 = vsel %vm728_vm0, %v690_v6, 0.0  ;;  %vm6150_vm12 = vmmov %vm6149_vm10 }
 0x1f7   : > { %v647_v1 = vmax.f32 %v295_v27, 0.0  ;;  %v355_v16 = vld [vmem:[%s4387_s16 + $0x1d98] sm:$0xff]  ;;  %vm6151_vm10 = vcmask 851712  }
 0x1f8   : > { %v3090_v32 = vsel %vm2193_vm1, %v3089_v24, %v3085_v25  ;;  %1336 = vadd.xlane.f32.xlu1 %v1335_v14  ;;  %1720 = vadd.xlane.f32.xlu0 %v1719_v19  ;;  %v227_v14 = vld [vmem:[%s4387_s16 + $0x1158] sm:$0xff]  ;;  %v707_v25 = vmax.f32 %v355_v16, 0.0 }
 0x1f9   : > { %v1268_v38 = vpop.xlane.xlu1 %1267  ;;  %v1265_v39 = vpop.xlane.xlu0 %1264  ;;  %v1542_v10 = vsel %vm728_vm0, %v647_v1, 0.0  ;;  %v579_v24 = vmax.f32 %v227_v14, 0.0 }
 0x1fa   : > { %v3099_v43 = vrot.slane %v1268_v38, %v4555_v51  ;;  %v3094_v36 = vrot.slane %v1265_v39, %v4561_v53  ;;  %v235_v38 = vld [vmem:[%s4387_s16 + $0x1198] sm:$0xff]  ;;  %v1722_v27 = vsel %vm728_vm0, %v707_v25, 0.0 }
 0x1fb   : > { %v587_v29 = vmax.f32 %v235_v38, 0.0 }
 0x1fc   : > { %v3095_v46 = vsel %vm2200_vm2, %v3094_v36, %v3090_v32  ;;  %1414 = vadd.xlane.f32.xlu1 %v1413_v40  ;;  %1360 = vadd.xlane.f32.xlu0 %v1359_v41  ;;  %v605_v40 = vmax.f32 %v253_v26, 0.0  ;;  %v1338_v36 = vsel %vm728_vm0, %v579_v24, 0.0 }
 0x1fd   : > { %v1274_v48 = vpop.xlane.xlu1 %1273  ;;  %v3100_v54 = vsel %vm2207_vm3, %v3099_v43, %v3095_v46  ;;  %v1271_v55 = vpop.xlane.xlu0 %1270 }
 0x1fe   : > { %v3109_v2 = vrot.slane %v1274_v48, %v4566_v60  ;;  %v3104_v3 = vrot.slane %v1271_v55, %v4569_v61  ;;  %v278_v48 = vld [vmem:[%s4387_s16 + $0x15b0] sm:$0xff] }
 0x200   : > { %v3105_v5 = vsel %vm2214_vm4, %v3104_v3, %v3100_v54  ;;  %1486 = vadd.xlane.f32.xlu1 %v1485_v47  ;;  %1465 = vadd.xlane.f32.xlu0 %v1464_v58  ;;  %v270_v54 = vld [vmem:[%s4387_s16 + $0x1570] sm:$0xff]  ;;  %v1416_v58 = vsel %vm728_vm0, %v605_v40, 0.0  ;;  %v630_v3 = vmax.f32 %v278_v48, 0.0 }
 0x201   : > { %v1280_v63 = vpop.xlane.xlu1 %1279  ;;  %v3110_v57 = vsel %vm2221_vm5, %v3109_v2, %v3105_v5  ;;  %v1277_v7 = vpop.xlane.xlu0 %1276  ;;  %v1362_v2 = vsel %vm728_vm0, %v587_v29, 0.0  ;;  %v622_v4 = vmax.f32 %v270_v54, 0.0  ;;  %v313_v5 = vld [vmem:[%s4387_s16 + $0x1988] sm:$0xff] }
 0x202   : > { %v3119_v12 = vrot.slane %v1280_v63, %v4584_v15  ;;  %v3114_v13 = vrot.slane %v1277_v7, %v4593_v22 }
 0x203   : > { %v1467_v14 = vsel %vm728_vm0, %v622_v4, 0.0 }
 0x204   : > { %v3115_v17 = vsel %vm2228_vm6, %v3114_v13, %v3110_v57  ;;  %1543 = vadd.xlane.f32.xlu1 %v1542_v10  ;;  %1489 = vadd.xlane.f32.xlu0 %v1488_v56  ;;  %v296_v57 = vld [vmem:[%s4387_s16 + $0x1900] sm:$0xff]  ;;  %v665_v10 = vmax.f32 %v313_v5, 0.0  ;;  %v1491_v13 = vsel %vm728_vm0, %v630_v3, 0.0 }
 0x205   : > { %v1286_v19 = vpop.xlane.xlu1 %1285  ;;  %v3120_v20 = vsel %vm2235_vm7, %v3119_v12, %v3115_v17  ;;  %v1283_v21 = vpop.xlane.xlu0 %1282  ;;  %v648_v16 = vmax.f32 %v296_v57, 0.0 }
 0x206   : > { %v3129_v32 = vrot.slane %v1286_v19, %v4602_v33  ;;  %v3124_v37 = vrot.slane %v1283_v21, %v4605_v34  ;;  %v321_v19 = vld [vmem:[%s4387_s16 + $0x19c8] sm:$0xff] }
 0x208   : > { %v3125_v39 = vsel %vm2242_vm8, %v3124_v37, %v3120_v20  ;;  %1672 = vadd.xlane.f32.xlu1 %v1671_v18  ;;  %1594 = vadd.xlane.f32.xlu0 %v1593_v23  ;;  %v320_v20 = vld [vmem:[%s4387_s16 + $0x19c0] sm:$0xff]  ;;  %v1596_v23 = vsel %vm728_vm0, %v665_v10, 0.0  ;;  %v673_v37 = vmax.f32 %v321_v19, 0.0  ;;  %v254_v10 = vld [vmem:[%s4387_s16 + $0x14f0] sm:$0xff] }
 0x209   : > { %v1292_v41 = vpop.xlane.xlu1 %1291  ;;  %v3130_v42 = vsel %vm2249_vm9, %v3129_v32, %v3125_v39  ;;  %v1289_v43 = vpop.xlane.xlu0 %1288  ;;  %v1545_v32 = vsel %vm728_vm0, %v648_v16, 0.0  ;;  %v672_v38 = vmax.f32 %v320_v20, 0.0  ;;  %v356_v39 = vld [vmem:[%s4387_s16 + $0x1da0] sm:$0xff]  ;;  %v297_v20 = vld [vmem:[%s4387_s16 + $0x1908] sm:$0xff] }
 0x20a   : > { %v3139_v46 = vrot.slane %v1292_v41, %v4622_v59  ;;  %v3134_v47 = vrot.slane %v1289_v43, %v4625_v62 }
 0x20b   : > { %v1617_v48 = vsel %vm728_vm0, %v672_v38, 0.0 }
 0x20c   : > { %v3135_v55 = vsel %vm6150_vm12, %v3134_v47, %v3130_v42  ;;  %1339 = vadd.xlane.f32.xlu1 %v1338_v36  ;;  %1723 = vadd.xlane.f32.xlu0 %v1722_v27  ;;  %vm3956_vm12 = vcmask 1044484   ;;  %v339_v42 = vld [vmem:[%s4387_s16 + $0x1d18] sm:$0xff]  ;;  %v708_v27 = vmax.f32 %v356_v39, 0.0  ;;  %v1620_v47 = vsel %vm728_vm0, %v673_v37, 0.0 }
 0x20d   : > { %v1298_v1 = vpop.xlane.xlu1 %1297  ;;  %v3140_v35 = vsel %vm2263_vm11, %v3139_v46, %v3135_v55  ;;  %v1295_v49 = vpop.xlane.xlu0 %1294  ;;  %v691_v54 = vmax.f32 %v339_v42, 0.0  ;;  %v649_v37 = vmax.f32 %v297_v20, 0.0  ;;  %v322_v42 = vld [vmem:[%s4387_s16 + $0x19d0] sm:$0xff] }
 0x20e   : > { %v3149_v6 = vrot.slane %v1298_v1, %v4633_v8  ;;  %v3144_v63 = vrot.slane %v1295_v49, %v4636_v9  ;;  %v228_v1 = vld [vmem:[%s4387_s16 + $0x1160] sm:$0xff]  ;;  %v1725_v49 = vsel %vm728_vm0, %v708_v27, 0.0 }
 0x20f   : > { %v1674_v5 = vsel %vm728_vm0, %v691_v54, 0.0 }
 0x210   : > { %v3145_v7 = vsel %vm6151_vm10, %v3144_v63, %v3140_v35  ;;  %1417 = vadd.xlane.f32.xlu1 %v1416_v58  ;;  %1363 = vadd.xlane.f32.xlu0 %v1362_v2  ;;  %v580_v63 = vmax.f32 %v228_v1, 0.0  ;;  %vm6152_vm10 = vcmask 720512  }
 0x211   : > { %v1304_v56 = vpop.xlane.xlu1 %1303  ;;  %v3150_v11 = vsel %vm2277_vm13, %v3149_v6, %v3145_v7  ;;  %v1301_v12 = vpop.xlane.xlu0 %1300  ;;  %v271_v7 = vld [vmem:[%s4387_s16 + $0x1578] sm:$0xff] }
 0x212   : > { %v3159_v17 = vrot.slane %v1304_v56, %v4652_v30  ;;  %v3154_v18 = vrot.slane %v1301_v12, %v4655_v31  ;;  %v623_v16 = vmax.f32 %v271_v7, 0.0 }
 0x214   : > { %v3155_v21 = vsel %vm2284_vm14, %v3154_v18, %v3150_v11  ;;  %1492 = vadd.xlane.f32.xlu1 %v1491_v13  ;;  %1468 = vadd.xlane.f32.xlu0 %v1467_v14  ;;  %v1341_v14 = vsel %vm728_vm0, %v580_v63, 0.0 }
 0x215   : > { %v3160_v24 = vsel %vm2291_vm15, %v3159_v17, %v3155_v21  ;;  %v1310_v25 = vpop.xlane.xlu1 %1309  ;;  %v1307_v26 = vpop.xlane.xlu0 %1306  ;;  %v606_v17 = vmax.f32 %v254_v10, 0.0  ;;  %v279_v21 = vld [vmem:[%s4387_s16 + $0x15b8] sm:$0xff] }
 0x216   : > { %v3168_v40 = vrot.slane %v1310_v25, %v4558_v52  ;;  %v3164_v41 = vrot.slane %v1307_v26, %v4552_v50  ;;  %v5410_v43 = vsel %vm3956_vm12, %v3160_v24, %v5225_v44  ;;  %v236_v44 = vld [vmem:[%s4387_s16 + $0x11a0] sm:$0xff]  ;;  %v1470_v26 = vsel %vm728_vm0, %v623_v16, 0.0 }
 0x217   : > { %v588_v6 = vmax.f32 %v236_v44, 0.0  ;;  %v631_v38 = vmax.f32 %v279_v21, 0.0 }
 0x218   : > { %v3169_v36 = vsel %vm2193_vm1, %v3168_v40, %v3164_v41  ;;  %1597 = vadd.xlane.f32.xlu1 %v1596_v23  ;;  %1546 = vadd.xlane.f32.xlu0 %v1545_v32  ;;  %v1419_v32 = vsel %vm728_vm0, %v606_v17, 0.0 }
 0x219   : > { %v1316_v29 = vpop.xlane.xlu1 %1315  ;;  %v1313_v46 = vpop.xlane.xlu0 %1312  ;;  %v1365_v13 = vsel %vm728_vm0, %v588_v6, 0.0  ;;  %v1494_v54 = vsel %vm728_vm0, %v631_v38, 0.0 }
 0x21a   : > { %v3178_v55 = vrot.slane %v1316_v29, %v4555_v51  ;;  %v3173_v58 = vrot.slane %v1313_v46, %v4561_v53 }
 0x21c   : > { %v3174_v35 = vsel %vm2200_vm2, %v3173_v58, %v3169_v36  ;;  %1621 = vadd.xlane.f32.xlu1 %v1620_v47  ;;  %1618 = vadd.xlane.f32.xlu0 %v1617_v48  ;;  %v314_v36 = vld [vmem:[%s4387_s16 + $0x1990] sm:$0xff]  ;;  %v1548_v48 = vsel %vm728_vm0, %v649_v37, 0.0 }
 0x21d   : > { %v1439_v2 = vpop.xlane.xlu1 %1438  ;;  %v3179_v3 = vsel %vm2207_vm3, %v3178_v55, %v3174_v35  ;;  %v1319_v4 = vpop.xlane.xlu0 %1318  ;;  %v674_v55 = vmax.f32 %v322_v42, 0.0  ;;  %v666_v58 = vmax.f32 %v314_v36, 0.0  ;;  %v357_v35 = vld [vmem:[%s4387_s16 + $0x1da8] sm:$0xff] }
 0x21e   : > { %v3183_v57 = vrot.slane %v1319_v4, %v4569_v61  ;;  %v3381_v18 = vrot.slane %v1439_v2, %v4552_v50  ;;  %v709_v63 = vmax.f32 %v357_v35, 0.0 }
 0x21f   : > { %v1599_v6 = vsel %vm728_vm0, %v666_v58, 0.0 }
 0x220   : > { %v5427_v56 = vsel %vm2214_vm4, %v3183_v57, %v3179_v3  ;;  %1726 = vadd.xlane.f32.xlu1 %v1725_v49  ;;  %1675 = vadd.xlane.f32.xlu0 %v1674_v5  ;;  %v340_v49 = vld [vmem:[%s4387_s16 + $0x1d20] sm:$0xff]  ;;  %v1623_v5 = vsel %vm728_vm0, %v674_v55, 0.0 }
 0x221   : > { %v1391_v11 = vpop.xlane.xlu1 %1390  ;;  %v1442_v12 = vpop.xlane.xlu0 %1441  ;;  %v692_v57 = vmax.f32 %v340_v49, 0.0 }
 0x222   : > { %v3385_v19 = vrot.slane %v1442_v12, %v4558_v52  ;;  %v3302_v39 = vrot.slane %v1391_v11, %v4552_v50  ;;  %v365_v11 = vld [vmem:[%s4387_s16 + $0x1de8] sm:$0xff]  ;;  %v364_v12 = vld [vmem:[%s4387_s16 + $0x1de0] sm:$0xff] }
 0x223   : > { %v717_v20 = vmax.f32 %v365_v11, 0.0  ;;  %v716_v21 = vmax.f32 %v364_v12, 0.0 }
 0x224   : > { %v3386_v23 = vsel %vm2193_vm1, %v3385_v19, %v3381_v18  ;;  %1366 = vadd.xlane.f32.xlu1 %v1365_v13  ;;  %1342 = vadd.xlane.f32.xlu0 %v1341_v14  ;;  %v1728_v18 = vsel %vm728_vm0, %v709_v63, 0.0  ;;  %v1677_v19 = vsel %vm728_vm0, %v692_v57, 0.0 }
 0x225   : > { %v1445_v24 = vpop.xlane.xlu1 %1444  ;;  %v1394_v25 = vpop.xlane.xlu0 %1393 }
 0x226   : > { %v3390_v40 = vrot.slane %v1445_v24, %v4561_v53  ;;  %v3306_v41 = vrot.slane %v1394_v25, %v4558_v52  ;;  %v237_v25 = vld [vmem:[%s4387_s16 + $0x11a8] sm:$0xff] }
 0x228   : > { %v3391_v27 = vsel %vm2200_vm2, %v3390_v40, %v3386_v23  ;;  %v3307_v29 = vsel %vm2193_vm1, %v3306_v41, %v3302_v39  ;;  %1471 = vadd.xlane.f32.xlu1 %v1470_v26  ;;  %1420 = vadd.xlane.f32.xlu0 %v1419_v32  ;;  %v229_v26 = vld [vmem:[%s4387_s16 + $0x1168] sm:$0xff]  ;;  %v1752_v39 = vsel %vm728_vm0, %v717_v20, 0.0  ;;  %v1749_v40 = vsel %vm728_vm0, %v716_v21, 0.0 }
 0x229   : > { %v1574_v46 = vpop.xlane.xlu1 %1573  ;;  %v1571_v47 = vpop.xlane.xlu0 %1570  ;;  %v589_v41 = vmax.f32 %v237_v25, 0.0  ;;  %v581_v42 = vmax.f32 %v229_v26, 0.0 }
 0x22a   : > { %v3602_v44 = vrot.slane %v1574_v46, %v4558_v52  ;;  %v3598_v1 = vrot.slane %v1571_v47, %v4552_v50 }
 0x22b   : > { %v1344_v55 = vsel %vm728_vm0, %v581_v42, 0.0 }
 0x22c   : > { %v3603_v2 = vsel %vm2193_vm1, %v3602_v44, %v3598_v1  ;;  %1549 = vadd.xlane.f32.xlu1 %v1548_v48  ;;  %1495 = vadd.xlane.f32.xlu0 %v1494_v54  ;;  %v1368_v54 = vsel %vm728_vm0, %v589_v41, 0.0 }
 0x22d   : > { %v1448_v3 = vpop.xlane.xlu1 %1447  ;;  %v1397_v4 = vpop.xlane.xlu0 %1396 }
 0x22e   : > { %v3395_v7 = vrot.slane %v1448_v3, %v4555_v51  ;;  %v3311_v10 = vrot.slane %v1397_v4, %v4561_v53  ;;  %v298_v3 = vld [vmem:[%s4387_s16 + $0x1910] sm:$0xff] }
 0x230   : > { %v3396_v13 = vsel %vm2207_vm3, %v3395_v7, %v3391_v27  ;;  %v3312_v14 = vsel %vm2200_vm2, %v3311_v10, %v3307_v29  ;;  %1624 = vadd.xlane.f32.xlu1 %v1623_v5  ;;  %1600 = vadd.xlane.f32.xlu0 %v1599_v6  ;;  %v272_v27 = vld [vmem:[%s4387_s16 + $0x1580] sm:$0xff]  ;;  %v255_v29 = vld [vmem:[%s4387_s16 + $0x14f8] sm:$0xff]  ;;  %v650_v10 = vmax.f32 %v298_v3, 0.0 }
 0x231   : > { %v1526_v16 = vpop.xlane.xlu1 %1525  ;;  %v1523_v17 = vpop.xlane.xlu0 %1522  ;;  %v624_v58 = vmax.f32 %v272_v27, 0.0  ;;  %v607_v44 = vmax.f32 %v255_v29, 0.0 }
 0x232   : > { %v3523_v23 = vrot.slane %v1526_v16, %v4558_v52  ;;  %v3519_v24 = vrot.slane %v1523_v17, %v4552_v50  ;;  %v323_v17 = vld [vmem:[%s4387_s16 + $0x19d8] sm:$0xff] }
 0x233   : > { %v1473_v57 = vsel %vm728_vm0, %v624_v58, 0.0  ;;  %v1422_v7 = vsel %vm728_vm0, %v607_v44, 0.0  ;;  %v675_v25 = vmax.f32 %v323_v17, 0.0 }
 0x234   : > { %v3524_v32 = vsel %vm2193_vm1, %v3523_v23, %v3519_v24  ;;  %1729 = vadd.xlane.f32.xlu1 %v1728_v18  ;;  %1678 = vadd.xlane.f32.xlu0 %v1677_v19  ;;  %v1551_v23 = vsel %vm728_vm0, %v650_v10, 0.0 }
 0x235   : > { %v1703_v37 = vpop.xlane.xlu1 %1702  ;;  %v1577_v38 = vpop.xlane.xlu0 %1576 }
 0x236   : > { %v3607_v36 = vrot.slane %v1577_v38, %v4561_v53  ;;  %v3815_v1 = vrot.slane %v1703_v37, %v4552_v50 }
 0x238   : > { %v3608_v46 = vsel %vm2200_vm2, %v3607_v36, %v3603_v2  ;;  %1753 = vadd.xlane.f32.xlu1 %v1752_v39  ;;  %1750 = vadd.xlane.f32.xlu0 %v1749_v40  ;;  %v280_v2 = vld [vmem:[%s4387_s16 + $0x15c0] sm:$0xff]  ;;  %v358_v39 = vld [vmem:[%s4387_s16 + $0x1db0] sm:$0xff]  ;;  %v1626_v36 = vsel %vm728_vm0, %v675_v25, 0.0 }
 0x239   : > { %v1322_v47 = vpop.xlane.xlu1 %1321  ;;  %v1706_v48 = vpop.xlane.xlu0 %1705  ;;  %v632_v11 = vmax.f32 %v280_v2, 0.0  ;;  %v710_v29 = vmax.f32 %v358_v39, 0.0 }
 0x23a   : > { %v3188_v35 = vrot.slane %v1322_v47, %v4566_v60  ;;  %v3819_v49 = vrot.slane %v1706_v48, %v4558_v52 }
 0x23b   : > { %v1497_v24 = vsel %vm728_vm0, %v632_v11, 0.0 }
 0x23c   : > { %v3189_v4 = vsel %vm2221_vm5, %v3188_v35, %v5427_v56  ;;  %v3820_v5 = vsel %vm2193_vm1, %v3819_v49, %v3815_v1  ;;  %1369 = vadd.xlane.f32.xlu1 %v1368_v54  ;;  %1345 = vadd.xlane.f32.xlu0 %v1344_v55  ;;  %v315_v56 = vld [vmem:[%s4387_s16 + $0x1998] sm:$0xff]  ;;  %v230_v55 = vld [vmem:[%s4387_s16 + $0x1170] sm:$0xff]  ;;  %v1731_v1 = vsel %vm728_vm0, %v710_v29, 0.0 }
 0x23d   : > { %v1451_v6 = vpop.xlane.xlu1 %1450  ;;  %v1400_v63 = vpop.xlane.xlu0 %1399  ;;  %v667_v26 = vmax.f32 %v315_v56, 0.0  ;;  %v582_v49 = vmax.f32 %v230_v55, 0.0 }
 0x23e   : > { %v3400_v12 = vrot.slane %v1451_v6, %v4569_v61  ;;  %v3316_v16 = vrot.slane %v1400_v63, %v4555_v51  ;;  %v256_v63 = vld [vmem:[%s4387_s16 + $0x1500] sm:$0xff] }
 0x23f   : > { %v1602_v27 = vsel %vm728_vm0, %v667_v26, 0.0  ;;  %v608_v56 = vmax.f32 %v256_v63, 0.0 }
 0x240   : > { %v3401_v18 = vsel %vm2214_vm4, %v3400_v12, %v3396_v13  ;;  %v3317_v19 = vsel %vm2207_vm3, %v3316_v16, %v3312_v14  ;;  %1474 = vadd.xlane.f32.xlu1 %v1473_v57  ;;  %1423 = vadd.xlane.f32.xlu0 %v1422_v7  ;;  %v341_v13 = vld [vmem:[%s4387_s16 + $0x1d28] sm:$0xff]  ;;  %v238_v57 = vld [vmem:[%s4387_s16 + $0x11b0] sm:$0xff]  ;;  %v1347_v16 = vsel %vm728_vm0, %v582_v49, 0.0 }
 0x241   : > { %v1580_v20 = vpop.xlane.xlu1 %1579  ;;  %v1529_v21 = vpop.xlane.xlu0 %1528  ;;  %v693_v47 = vmax.f32 %v341_v13, 0.0 }
 0x242   : > { %v3612_v37 = vrot.slane %v1580_v20, %v4555_v51  ;;  %v3528_v38 = vrot.slane %v1529_v21, %v4561_v53  ;;  %v590_v20 = vmax.f32 %v238_v57, 0.0 }
 0x243   : > { %v1680_v35 = vsel %vm728_vm0, %v693_v47, 0.0 }
 0x244   : > { %v3613_v14 = vsel %vm2207_vm3, %v3612_v37, %v3608_v46  ;;  %v3529_v40 = vsel %vm2200_vm2, %v3528_v38, %v3524_v32  ;;  %1552 = vadd.xlane.f32.xlu1 %v1551_v23  ;;  %1498 = vadd.xlane.f32.xlu0 %v1497_v24  ;;  %v366_v46 = vld [vmem:[%s4387_s16 + $0x1df0] sm:$0xff]  ;;  %v281_v24 = vld [vmem:[%s4387_s16 + $0x15c8] sm:$0xff]  ;;  %v1425_v38 = vsel %vm728_vm0, %v608_v56, 0.0  ;;  %v1371_v39 = vsel %vm728_vm0, %v590_v20, 0.0 }
 0x245   : > { %v1658_v41 = vpop.xlane.xlu1 %1657  ;;  %v1655_v42 = vpop.xlane.xlu0 %1654  ;;  %v718_v3 = vmax.f32 %v366_v46, 0.0  ;;  %v633_v13 = vmax.f32 %v281_v24, 0.0 }
 0x246   : > { %v3740_v48 = vrot.slane %v1658_v41, %v4558_v52  ;;  %v3736_v54 = vrot.slane %v1655_v42, %v4552_v50 }
 0x247   : > { %v1755_v17 = vsel %vm728_vm0, %v718_v3, 0.0 }
 0x248   : > { %v3741_v32 = vsel %vm2193_vm1, %v3740_v48, %v3736_v54  ;;  %1627 = vadd.xlane.f32.xlu1 %v1626_v36  ;;  %1603 = vadd.xlane.f32.xlu0 %v1602_v27  ;;  %v316_v27 = vld [vmem:[%s4387_s16 + $0x19a0] sm:$0xff]  ;;  %v1500_v54 = vsel %vm728_vm0, %v633_v13, 0.0 }
 0x249   : > { %v1325_v58 = vpop.xlane.xlu1 %1324  ;;  %v1709_v44 = vpop.xlane.xlu0 %1708  ;;  %v668_v46 = vmax.f32 %v316_v27, 0.0 }
 0x24a   : > { %v3193_v2 = vrot.slane %v1325_v58, %v4593_v22  ;;  %v3824_v6 = vrot.slane %v1709_v44, %v4561_v53 }
 0x24c   : > { %v3194_v7 = vsel %vm2228_vm6, %v3193_v2, %v3189_v4  ;;  %v3825_v10 = vsel %vm2200_vm2, %v3824_v6, %v3820_v5  ;;  %1732 = vadd.xlane.f32.xlu1 %v1731_v1  ;;  %1681 = vadd.xlane.f32.xlu0 %v1680_v35  ;;  %v273_v4 = vld [vmem:[%s4387_s16 + $0x1588] sm:$0xff]  ;;  %v342_v35 = vld [vmem:[%s4387_s16 + $0x1d30] sm:$0xff]  ;;  %v1605_v6 = vsel %vm728_vm0, %v668_v46, 0.0 }
 0x24d   : > { %v1454_v11 = vpop.xlane.xlu1 %1453  ;;  %v1403_v12 = vpop.xlane.xlu0 %1402  ;;  %v625_v41 = vmax.f32 %v273_v4, 0.0  ;;  %v694_v57 = vmax.f32 %v342_v35, 0.0 }
 0x24e   : > { %v3405_v21 = vrot.slane %v1454_v11, %v4566_v60  ;;  %v3321_v23 = vrot.slane %v1403_v12, %v4569_v61 }
 0x24f   : > { %v1476_v55 = vsel %vm728_vm0, %v625_v41, 0.0 }
 0x250   : > { %v3406_v5 = vsel %vm2221_vm5, %v3405_v21, %v3401_v18  ;;  %v3322_v25 = vsel %vm2214_vm4, %v3321_v23, %v3317_v19  ;;  %1348 = vadd.xlane.f32.xlu1 %v1347_v16  ;;  %1756 = vadd.xlane.f32.xlu0 %v1755_v17  ;;  %v299_v18 = vld [vmem:[%s4387_s16 + $0x1918] sm:$0xff]  ;;  %v1683_v23 = vsel %vm728_vm0, %v694_v57, 0.0 }
 0x251   : > { %v1583_v26 = vpop.xlane.xlu1 %1582  ;;  %v1532_v37 = vpop.xlane.xlu0 %1531  ;;  %v651_v58 = vmax.f32 %v299_v18, 0.0  ;;  %v367_v17 = vld [vmem:[%s4387_s16 + $0x1df8] sm:$0xff] }
 0x252   : > { %v3617_v42 = vrot.slane %v1583_v26, %v4569_v61  ;;  %v3533_v36 = vrot.slane %v1532_v37, %v4555_v51  ;;  %v719_v4 = vmax.f32 %v367_v17, 0.0 }
 0x253   : > { %v1554_v63 = vsel %vm728_vm0, %v651_v58, 0.0 }
 0x254   : > { %v3618_v19 = vsel %vm2214_vm4, %v3617_v42, %v3613_v14  ;;  %v3534_v29 = vsel %vm2207_vm3, %v3533_v36, %v3529_v40  ;;  %1426 = vadd.xlane.f32.xlu1 %v1425_v38  ;;  %1372 = vadd.xlane.f32.xlu0 %v1371_v39  ;;  %v324_v14 = vld [vmem:[%s4387_s16 + $0x19e0] sm:$0xff]  ;;  %v239_v39 = vld [vmem:[%s4387_s16 + $0x11b8] sm:$0xff]  ;;  %v1758_v36 = vsel %vm728_vm0, %v719_v4, 0.0 }
 0x255   : > { %v1712_v47 = vpop.xlane.xlu1 %1711  ;;  %v1661_v48 = vpop.xlane.xlu0 %1660  ;;  %v676_v11 = vmax.f32 %v324_v14, 0.0  ;;  %v591_v18 = vmax.f32 %v239_v39, 0.0 }
 0x256   : > { %v3829_v44 = vrot.slane %v1712_v47, %v4555_v51  ;;  %v3745_v1 = vrot.slane %v1661_v48, %v4561_v53 }
 0x257   : > { %v1629_v24 = vsel %vm728_vm0, %v676_v11, 0.0 }
 0x258   : > { %v3830_v40 = vsel %vm2207_vm3, %v3829_v44, %v3825_v10  ;;  %v3746_v49 = vsel %vm2200_vm2, %v3745_v1, %v3741_v32  ;;  %1501 = vadd.xlane.f32.xlu1 %v1500_v54  ;;  %1477 = vadd.xlane.f32.xlu0 %v1476_v55  ;;  %v359_v10 = vld [vmem:[%s4387_s16 + $0x1db8] sm:$0xff]  ;;  %v274_v55 = vld [vmem:[%s4387_s16 + $0x1590] sm:$0xff]  ;;  %v1374_v1 = vsel %vm728_vm0, %v591_v18, 0.0 }
 0x259   : > { %v1406_v3 = vpop.xlane.xlu1 %1405  ;;  %v1328_v2 = vpop.xlane.xlu0 %1327  ;;  %v711_v26 = vmax.f32 %v359_v10, 0.0  ;;  %v626_v14 = vmax.f32 %v274_v55, 0.0 }
 0x25a   : > { %v3326_v12 = vrot.slane %v1406_v3, %v4566_v60  ;;  %v3198_v16 = vrot.slane %v1328_v2, %v4584_v15 }
 0x25b   : > { %v1734_v27 = vsel %vm728_vm0, %v711_v26, 0.0 }
 0x25c   : > { %v3327_v32 = vsel %vm2221_vm5, %v3326_v12, %v3322_v25  ;;  %v3199_v56 = vsel %vm2235_vm7, %v3198_v16, %v3194_v7  ;;  %1606 = vadd.xlane.f32.xlu1 %v1605_v6  ;;  %1555 = vadd.xlane.f32.xlu0 %v1554_v63  ;;  %v231_v25 = vld [vmem:[%s4387_s16 + $0x1178] sm:$0xff]  ;;  %v300_v63 = vld [vmem:[%s4387_s16 + $0x1920] sm:$0xff]  ;;  %v1479_v16 = vsel %vm728_vm0, %v626_v14, 0.0 }
 0x25d   : > { %v1535_v20 = vpop.xlane.xlu1 %1534  ;;  %v1457_v21 = vpop.xlane.xlu0 %1456  ;;  %v583_v47 = vmax.f32 %v231_v25, 0.0  ;;  %v652_v10 = vmax.f32 %v300_v63, 0.0 }
 0x25e   : > { %v3538_v37 = vrot.slane %v1535_v20, %v4569_v61  ;;  %v3410_v38 = vrot.slane %v1457_v21, %v4593_v22 }
 0x25f   : > { %v1350_v35 = vsel %vm728_vm0, %v583_v47, 0.0 }
 0x260   : > { %v3539_v7 = vsel %vm2214_vm4, %v3538_v37, %v3534_v29  ;;  %v3411_v13 = vsel %vm2228_vm6, %v3410_v38, %v3406_v5  ;;  %1684 = vadd.xlane.f32.xlu1 %v1683_v23  ;;  %1630 = vadd.xlane.f32.xlu0 %v1629_v24  ;;  %v257_v29 = vld [vmem:[%s4387_s16 + $0x1508] sm:$0xff]  ;;  %v1557_v38 = vsel %vm728_vm0, %v652_v10, 0.0 }
 0x261   : > { %v1664_v41 = vpop.xlane.xlu1 %1663  ;;  %v1586_v42 = vpop.xlane.xlu0 %1585  ;;  %v609_v3 = vmax.f32 %v257_v29, 0.0  ;;  %v325_v24 = vld [vmem:[%s4387_s16 + $0x19e8] sm:$0xff] }
 0x262   : > { %v3750_v48 = vrot.slane %v1664_v41, %v4555_v51  ;;  %v3622_v54 = vrot.slane %v1586_v42, %v4566_v60  ;;  %v677_v25 = vmax.f32 %v325_v24, 0.0 }
 0x263   : > { %v1428_v17 = vsel %vm728_vm0, %v609_v3, 0.0 }
 0x264   : > { %v3751_v5 = vsel %vm2207_vm3, %v3750_v48, %v3746_v49  ;;  %v3623_v46 = vsel %vm2221_vm5, %v3622_v54, %v3618_v19  ;;  %1759 = vadd.xlane.f32.xlu1 %v1758_v36  ;;  %1735 = vadd.xlane.f32.xlu0 %v1734_v27  ;;  %v282_v49 = vld [vmem:[%s4387_s16 + $0x15d0] sm:$0xff]  ;;  %v343_v27 = vld [vmem:[%s4387_s16 + $0x1d38] sm:$0xff]  ;;  %v1632_v54 = vsel %vm728_vm0, %v677_v25, 0.0 }
 0x265   : > { %v1331_v58 = vpop.xlane.xlu1 %1330  ;;  %v1715_v44 = vpop.xlane.xlu0 %1714  ;;  %v634_v20 = vmax.f32 %v282_v49, 0.0 }
 0x266   : > { %v3203_v2 = vrot.slane %v1331_v58, %v4605_v34  ;;  %v3834_v6 = vrot.slane %v1715_v44, %v4569_v61  ;;  %v695_v58 = vmax.f32 %v343_v27, 0.0 }
 0x267   : > { %v1503_v39 = vsel %vm728_vm0, %v634_v20, 0.0 }
 0x268   : > { %v3204_v19 = vsel %vm2242_vm8, %v3203_v2, %v3199_v56  ;;  %v3835_v57 = vsel %vm2214_vm4, %v3834_v6, %v3830_v40  ;;  %1375 = vadd.xlane.f32.xlu1 %v1374_v1  ;;  %1351 = vadd.xlane.f32.xlu0 %v1350_v35  ;;  %v317_v56 = vld [vmem:[%s4387_s16 + $0x19a8] sm:$0xff]  ;;  %v368_v35 = vld [vmem:[%s4387_s16 + $0x1e00] sm:$0xff]  ;;  %v1686_v63 = vsel %vm728_vm0, %v695_v58, 0.0 }
 0x269   : > { %v1460_v11 = vpop.xlane.xlu1 %1459  ;;  %v1409_v12 = vpop.xlane.xlu0 %1408  ;;  %v669_v41 = vmax.f32 %v317_v56, 0.0 }
 0x26a   : > { %v3415_v21 = vrot.slane %v1460_v11, %v4584_v15  ;;  %v3331_v23 = vrot.slane %v1409_v12, %v4593_v22  ;;  %v720_v11 = vmax.f32 %v368_v35, 0.0 }
 0x26b   : > { %v1608_v55 = vsel %vm728_vm0, %v669_v41, 0.0 }
 0x26c   : > { %v5577_v40 = vsel %vm2235_vm7, %v3415_v21, %v3411_v13  ;;  %v3332_v4 = vsel %vm2228_vm6, %v3331_v23, %v3327_v32  ;;  %1480 = vadd.xlane.f32.xlu1 %v1479_v16  ;;  %1429 = vadd.xlane.f32.xlu0 %v1428_v17  ;;  %v360_v13 = vld [vmem:[%s4387_s16 + $0x1dc0] sm:$0xff]  ;;  %v275_v16 = vld [vmem:[%s4387_s16 + $0x1598] sm:$0xff]  ;;  %v258_v17 = vld [vmem:[%s4387_s16 + $0x1510] sm:$0xff]  ;;  %v1761_v21 = vsel %vm728_vm0, %v720_v11, 0.0 }
 0x26d   : > { %v1589_v26 = vpop.xlane.xlu1 %1588  ;;  %v1538_v37 = vpop.xlane.xlu0 %1537  ;;  %v712_v29 = vmax.f32 %v360_v13, 0.0  ;;  %v627_v23 = vmax.f32 %v275_v16, 0.0  ;;  %v610_v24 = vmax.f32 %v258_v17, 0.0 }
 0x26e   : > { %v3627_v42 = vrot.slane %v1589_v26, %v4593_v22  ;;  %v3543_v36 = vrot.slane %v1538_v37, %v4566_v60 }
 0x26f   : > { %v1737_v6 = vsel %vm728_vm0, %v712_v29, 0.0  ;;  %v1431_v13 = vsel %vm728_vm0, %v610_v24, 0.0  ;;  %v369_v24 = vld [vmem:[%s4387_s16 + $0x1e08] sm:$0xff] }
 0x270   : > { %v5587_v32 = vsel %vm2228_vm6, %v3627_v42, %v3623_v46  ;;  %v3544_v18 = vsel %vm2221_vm5, %v3543_v36, %v3539_v7  ;;  %1558 = vadd.xlane.f32.xlu1 %v1557_v38  ;;  %1504 = vadd.xlane.f32.xlu0 %v1503_v39  ;;  %v240_v46 = vld [vmem:[%s4387_s16 + $0x11c0] sm:$0xff]  ;;  %v301_v38 = vld [vmem:[%s4387_s16 + $0x1928] sm:$0xff]  ;;  %v1482_v36 = vsel %vm728_vm0, %v627_v23, 0.0 }
 0x271   : > { %v1718_v47 = vpop.xlane.xlu1 %1717  ;;  %v1667_v48 = vpop.xlane.xlu0 %1666  ;;  %v592_v49 = vmax.f32 %v240_v46, 0.0  ;;  %v653_v27 = vmax.f32 %v301_v38, 0.0  ;;  %v241_v23 = vld [vmem:[%s4387_s16 + $0x11c8] sm:$0xff] }
 0x272   : > { %v3839_v44 = vrot.slane %v1718_v47, %v4566_v60  ;;  %v3755_v1 = vrot.slane %v1667_v48, %v4569_v61 }
 0x273   : > { %v1377_v20 = vsel %vm728_vm0, %v592_v49, 0.0  ;;  %v1560_v46 = vsel %vm728_vm0, %v653_v27, 0.0  ;;  %v344_v49 = vld [vmem:[%s4387_s16 + $0x1d40] sm:$0xff]  ;;  %v259_v27 = vld [vmem:[%s4387_s16 + $0x1518] sm:$0xff] }
 0x274   : > { %v5597_v7 = vsel %vm2221_vm5, %v3839_v44, %v3835_v57  ;;  %v3756_v14 = vsel %vm2214_vm4, %v3755_v1, %v3751_v5  ;;  %1633 = vadd.xlane.f32.xlu1 %v1632_v54  ;;  %1609 = vadd.xlane.f32.xlu0 %v1608_v55  ;;  %v326_v55 = vld [vmem:[%s4387_s16 + $0x19f0] sm:$0xff] }
 0x275   : > { %v1355_v3 = vpop.xlane.xlu1 %1354  ;;  %v1334_v2 = vpop.xlane.xlu0 %1333 }
 0x276   : > { %v3208_v12 = vrot.slane %v1334_v2, %v4602_v33  ;;  %v3243_v56 = vrot.slane %v1355_v3, %v4552_v50  ;;  %v678_v3 = vmax.f32 %v326_v55, 0.0 }
 0x278   : > { %v3209_v57 = vsel %vm2249_vm9, %v3208_v12, %v3204_v19  ;;  %1738 = vadd.xlane.f32.xlu1 %v1737_v6  ;;  %1687 = vadd.xlane.f32.xlu0 %v1686_v63  ;;  %v283_v19 = vld [vmem:[%s4387_s16 + $0x15d8] sm:$0xff]  ;;  %v1635_v17 = vsel %vm728_vm0, %v678_v3, 0.0 }
 0x279   : > { %v1412_v5 = vpop.xlane.xlu1 %1411  ;;  %v1358_v10 = vpop.xlane.xlu0 %1357  ;;  %v635_v47 = vmax.f32 %v283_v19, 0.0 }
 0x27a   : > { %v3336_v26 = vrot.slane %v1412_v5, %v4584_v15  ;;  %v3247_v37 = vrot.slane %v1358_v10, %v4558_v52 }
 0x27b   : > { %v1506_v35 = vsel %vm728_vm0, %v635_v47, 0.0 }
 0x27c   : > { %v3337_v39 = vsel %vm2235_vm7, %v3336_v26, %v3332_v4  ;;  %v3248_v25 = vsel %vm2193_vm1, %v3247_v37, %v3243_v56  ;;  %1378 = vadd.xlane.f32.xlu1 %v1377_v20  ;;  %1762 = vadd.xlane.f32.xlu0 %v1761_v21  ;;  %v318_v4 = vld [vmem:[%s4387_s16 + $0x19b0] sm:$0xff]  ;;  %v696_v20 = vmax.f32 %v344_v49, 0.0 }
 0x27d   : > { %v1541_v41 = vpop.xlane.xlu1 %1540  ;;  %v1463_v42 = vpop.xlane.xlu0 %1462  ;;  %v670_v2 = vmax.f32 %v318_v4, 0.0 }
 0x27e   : > { %v3548_v48 = vrot.slane %v1541_v41, %v4593_v22  ;;  %v3420_v54 = vrot.slane %v1463_v42, %v4605_v34  ;;  %v1689_v19 = vsel %vm728_vm0, %v696_v20, 0.0  ;;  %v593_v41 = vmax.f32 %v241_v23, 0.0 }
 0x27f   : > { %v1611_v5 = vsel %vm728_vm0, %v670_v2, 0.0  ;;  %v721_v42 = vmax.f32 %v369_v24, 0.0 }
 0x280   : > { %v5622_v29 = vsel %vm2228_vm6, %v3548_v48, %v3544_v18  ;;  %v3421_v58 = vsel %vm2242_vm8, %v3420_v54, %v5577_v40  ;;  %1483 = vadd.xlane.f32.xlu1 %v1482_v36  ;;  %1432 = vadd.xlane.f32.xlu0 %v1431_v13  ;;  %v361_v18 = vld [vmem:[%s4387_s16 + $0x1dc8] sm:$0xff]  ;;  %v284_v13 = vld [vmem:[%s4387_s16 + $0x15e0] sm:$0xff]  ;;  %v1380_v55 = vsel %vm728_vm0, %v593_v41, 0.0  ;;  %v362_v41 = vld [vmem:[%s4387_s16 + $0x1dd0] sm:$0xff] }
 0x281   : > { %v1670_v44 = vpop.xlane.xlu1 %1669  ;;  %v1592_v1 = vpop.xlane.xlu0 %1591  ;;  %v713_v10 = vmax.f32 %v361_v18, 0.0  ;;  %v1764_v4 = vsel %vm728_vm0, %v721_v42, 0.0 }
 0x282   : > { %v3760_v6 = vrot.slane %v1670_v44, %v4566_v60  ;;  %v3632_v63 = vrot.slane %v1592_v1, %v4584_v15  ;;  %v636_v44 = vmax.f32 %v284_v13, 0.0  ;;  %v611_v1 = vmax.f32 %v259_v27, 0.0 }
 0x283   : > { %v1740_v38 = vsel %vm728_vm0, %v713_v10, 0.0 }
 0x284   : > { %v5633_v40 = vsel %vm2221_vm5, %v3760_v6, %v3756_v14  ;;  %v5637_v11 = vsel %vm2235_vm7, %v3632_v63, %v5587_v32  ;;  %1561 = vadd.xlane.f32.xlu1 %v1560_v46  ;;  %1507 = vadd.xlane.f32.xlu0 %v1506_v35  ;;  %v319_v35 = vld [vmem:[%s4387_s16 + $0x19b8] sm:$0xff]  ;;  %v1509_v6 = vsel %vm728_vm0, %v636_v44, 0.0  ;;  %v1434_v63 = vsel %vm728_vm0, %v611_v1, 0.0  ;;  %v242_v1 = vld [vmem:[%s4387_s16 + $0x11d0] sm:$0xff] }
 0x285   : > { %v1337_v12 = vpop.xlane.xlu1 %1336  ;;  %v1721_v16 = vpop.xlane.xlu0 %1720  ;;  %v671_v18 = vmax.f32 %v319_v35, 0.0 }
 0x286   : > { %v3213_v21 = vrot.slane %v1337_v12, %v4625_v62  ;;  %v3844_v14 = vrot.slane %v1721_v16, %v4593_v22 }
 0x287   : > { %v1614_v23 = vsel %vm728_vm0, %v671_v18, 0.0 }
 0x288   : > { %v5646_v32 = vsel %vm6152_vm10, %v3213_v21, %v3209_v57  ;;  %v5650_v56 = vsel %vm2228_vm6, %v3844_v14, %v5597_v7  ;;  %1636 = vadd.xlane.f32.xlu1 %v1635_v17  ;;  %1612 = vadd.xlane.f32.xlu0 %v1611_v5  ;;  %v327_v5 = vld [vmem:[%s4387_s16 + $0x19f8] sm:$0xff] }
 0x289   : > { %v1415_v26 = vpop.xlane.xlu1 %1414  ;;  %v1361_v37 = vpop.xlane.xlu0 %1360 }
 0x28a   : > { %v3341_v36 = vrot.slane %v1415_v26, %v4605_v34  ;;  %v3252_v57 = vrot.slane %v1361_v37, %v4561_v53  ;;  %v679_v37 = vmax.f32 %v327_v5, 0.0 }
 0x28c   : > { %v5659_v7 = vsel %vm2242_vm8, %v3341_v36, %v3337_v39  ;;  %v5662_v47 = vsel %vm2200_vm2, %v3252_v57, %v3248_v25  ;;  %1741 = vadd.xlane.f32.xlu1 %v1740_v38  ;;  %1690 = vadd.xlane.f32.xlu0 %v1689_v19  ;;  %v302_v39 = vld [vmem:[%s4387_s16 + $0x1930] sm:$0xff] }
 0x28d   : > { %v1487_v48 = vpop.xlane.xlu1 %1486  ;;  %v1466_v54 = vpop.xlane.xlu0 %1465  ;;  %v654_v49 = vmax.f32 %v302_v39, 0.0 }
 0x28e   : > { %v3425_v46 = vrot.slane %v1466_v54, %v4602_v33  ;;  %v3460_v12 = vrot.slane %v1487_v48, %v4552_v50  ;;  %v1638_v48 = vsel %vm728_vm0, %v679_v37, 0.0 }
 0x28f   : > { %v1563_v24 = vsel %vm728_vm0, %v654_v49, 0.0  ;;  %v328_v49 = vld [vmem:[%s4387_s16 + $0x1a00] sm:$0xff] }
 0x290   : > { %v5670_v3 = vsel %vm2249_vm9, %v3425_v46, %v3421_v58  ;;  %1381 = vadd.xlane.f32.xlu1 %v1380_v55  ;;  %1765 = vadd.xlane.f32.xlu0 %v1764_v4  ;;  %v345_v58 = vld [vmem:[%s4387_s16 + $0x1d48] sm:$0xff]  ;;  %v714_v55 = vmax.f32 %v362_v41, 0.0 }
 0x291   : > { %v1544_v25 = vpop.xlane.xlu1 %1543  ;;  %v1490_v2 = vpop.xlane.xlu0 %1489  ;;  %v697_v26 = vmax.f32 %v345_v58, 0.0 }
 0x292   : > { %v3553_v16 = vrot.slane %v1544_v25, %v4584_v15  ;;  %v3464_v17 = vrot.slane %v1490_v2, %v4558_v52  ;;  %v1743_v2 = vsel %vm728_vm0, %v714_v55, 0.0  ;;  %v371_v55 = vld [vmem:[%s4387_s16 + $0x1e18] sm:$0xff] }
 0x293   : > { %v1692_v27 = vsel %vm728_vm0, %v697_v26, 0.0  ;;  %v363_v26 = vld [vmem:[%s4387_s16 + $0x1dd8] sm:$0xff] }
 0x294   : > { %v5681_v10 = vsel %vm2235_vm7, %v3553_v16, %v5622_v29  ;;  %v3465_v20 = vsel %vm2193_vm1, %v3464_v17, %v3460_v12  ;;  %1510 = vadd.xlane.f32.xlu1 %v1509_v6  ;;  %1435 = vadd.xlane.f32.xlu0 %v1434_v63  ;;  %v370_v29 = vld [vmem:[%s4387_s16 + $0x1e10] sm:$0xff]  ;;  %v594_v63 = vmax.f32 %v242_v1, 0.0  ;;  %v303_v12 = vld [vmem:[%s4387_s16 + $0x1938] sm:$0xff] }
 0x295   : > { %v1673_v21 = vpop.xlane.xlu1 %1672  ;;  %v1595_v14 = vpop.xlane.xlu0 %1594  ;;  %v722_v54 = vmax.f32 %v370_v29, 0.0 }
 0x296   : > { %v3765_v38 = vrot.slane %v1673_v21, %v4593_v22  ;;  %v3637_v19 = vrot.slane %v1595_v14, %v4605_v34  ;;  %v1383_v21 = vsel %vm728_vm0, %v594_v63, 0.0  ;;  %v680_v14 = vmax.f32 %v328_v49, 0.0 }
 0x297   : > { %v1767_v25 = vsel %vm728_vm0, %v722_v54, 0.0 }
 0x298   : > { %v5692_v42 = vsel %vm2228_vm6, %v3765_v38, %v5633_v40  ;;  %v3638_v36 = vsel %vm2242_vm8, %v3637_v19, %v5637_v11  ;;  %1615 = vadd.xlane.f32.xlu1 %v1614_v23  ;;  %1564 = vadd.xlane.f32.xlu0 %v1563_v24  ;;  %v285_v40 = vld [vmem:[%s4387_s16 + $0x15e8] sm:$0xff]  ;;  %v655_v23 = vmax.f32 %v303_v12, 0.0  ;;  %v1641_v41 = vsel %vm728_vm0, %v680_v14, 0.0 }
 0x299   : > { %v1340_v57 = vpop.xlane.xlu1 %1339  ;;  %v1724_v13 = vpop.xlane.xlu0 %1723  ;;  %v637_v6 = vmax.f32 %v285_v40, 0.0  ;;  %v329_v12 = vld [vmem:[%s4387_s16 + $0x1a08] sm:$0xff] }
 0x29a   : > { %v3218_v4 = vrot.slane %v1340_v57, %v4622_v59  ;;  %v3849_v44 = vrot.slane %v1724_v13, %v4584_v15  ;;  %v1566_v57 = vsel %vm728_vm0, %v655_v23, 0.0  ;;  %v715_v13 = vmax.f32 %v363_v26, 0.0 }
 0x29b   : > { %v1512_v5 = vsel %vm728_vm0, %v637_v6, 0.0 }
 0x29c   : > { %v5704_v11 = vsel %vm2263_vm11, %v3218_v4, %v5646_v32  ;;  %v5708_v46 = vsel %vm2235_vm7, %v3849_v44, %v5650_v56  ;;  %1693 = vadd.xlane.f32.xlu1 %v1692_v27  ;;  %1639 = vadd.xlane.f32.xlu0 %v1638_v48  ;;  %v243_v48 = vld [vmem:[%s4387_s16 + $0x11d8] sm:$0xff]  ;;  %v1803_v4 = vld [vmem:[%s5748_s19 + $0x88] sm:$0xff]  ;;  %v1746_v63 = vsel %vm728_vm0, %v715_v13, 0.0 }
 0x29d   : > { %v1418_v35 = vpop.xlane.xlu1 %1417  ;;  %v1364_v39 = vpop.xlane.xlu0 %1363  ;;  %v595_v1 = vmax.f32 %v243_v48, 0.0 }
 0x29e   : > { %v3346_v18 = vrot.slane %v1418_v35, %v4602_v33  ;;  %v3257_v32 = vrot.slane %v1364_v39, %v4555_v51  ;;  %v1786_v39 = vld [vmem:[%s5748_s19] sm:$0xff] }
 0x29f   : > { %v1386_v14 = vsel %vm728_vm0, %v595_v1, 0.0 }
 0x2a0   : > { %v5718_v56 = vsel %vm2249_vm9, %v3346_v18, %v5659_v7  ;;  %v5722_v16 = vsel %vm2207_vm3, %v3257_v32, %v5662_v47  ;;  %1768 = vadd.xlane.f32.xlu1 %v1767_v25  ;;  %1744 = vadd.xlane.f32.xlu0 %v1743_v2  ;;  %v346_v47 = vld [vmem:[%s4387_s16 + $0x1d50] sm:$0xff]  ;;  %v1787_v25 = vld [vmem:[%s5748_s19 + $0x8] sm:$0xff]  ;;  %v723_v18 = vmax.f32 %v371_v55, 0.0 }
 0x2a1   : > { %v1493_v17 = vpop.xlane.xlu1 %1492  ;;  %v1469_v58 = vpop.xlane.xlu0 %1468  ;;  %v698_v27 = vmax.f32 %v346_v47, 0.0  ;;  %v1807_v55 = vld [vmem:[%s5748_s19 + $0xa8] sm:$0xff] }
 0x2a2   : > { %v3469_v24 = vrot.slane %v1493_v17, %v4561_v53  ;;  %v3430_v7 = vrot.slane %v1469_v58, %v4625_v62  ;;  %v286_v17 = vld [vmem:[%s4387_s16 + $0x15f0] sm:$0xff] }
 0x2a3   : > { %v1804_v58 = vld [vmem:[%s5748_s19 + $0x90] sm:$0xff] }
 0x2a4   : > { %v5731_v37 = vsel %vm2200_vm2, %v3469_v24, %v3465_v20  ;;  %v5735_v38 = vsel %vm6152_vm10, %v3430_v7, %v5670_v3  ;;  %1513 = vadd.xlane.f32.xlu1 %v1512_v5  ;;  %1384 = vadd.xlane.f32.xlu0 %v1383_v21  ;;  %v1802_v3 = vld [vmem:[%s5748_s19 + $0x80] sm:$0xff]  ;;  %v1805_v5 = vld [vmem:[%s5748_s19 + $0x98] sm:$0xff]  ;;  %v1788_v24 = vld [vmem:[%s5748_s19 + $0x10] sm:$0xff]  ;;  %vm6153_vm10 = vcmask 851712  }
 0x2a5   : > { %v1598_v19 = vpop.xlane.xlu1 %1597  ;;  %v1547_v29 = vpop.xlane.xlu0 %1546  ;;  %v4237_v35 = vpack.c.bf16 %v1803_v4, %v1802_v3  ;;  %v4241_v23 = vpack.c.bf16 %v1805_v5, %v1804_v58  ;;  %v1789_v7 = vld [vmem:[%s5748_s19 + $0x18] sm:$0xff] }
 0x2a6   : > { %v3642_v54 = vrot.slane %v1598_v19, %v4602_v33  ;;  %v3558_v20 = vrot.slane %v1547_v29, %v4605_v34  ;;  %v1770_v19 = vsel %vm728_vm0, %v723_v18, 0.0  ;;  %v681_v29 = vmax.f32 %v329_v12, 0.0  ;;  %v1808_v12 = vld [vmem:[%s5748_s19 + $0xb0] sm:$0xff] }
 0x2a7   : > { %4238 = vmatprep.subr.bf16.mxu0 %v4237_v35  ;;  %v4243_v13 = vpack.c.bf16 %v1789_v7, %v1788_v24  ;;  %v1792_v24 = vld [vmem:[%s5748_s19 + $0x30] sm:$0xff]  ;;  %v1793_v7 = vld [vmem:[%s5748_s19 + $0x38] sm:$0xff] }
 0x2a8   : > { %v5753_v44 = vsel %vm2249_vm9, %v3642_v54, %v3638_v36  ;;  %v5757_v40 = vsel %vm2242_vm8, %v3558_v20, %v5681_v10  ;;  %1642 = vadd.xlane.f32.xlu1 %v1641_v41  ;;  %1567 = vadd.xlane.f32.xlu0 %v1566_v57  ;;  %v1695_v36 = vsel %vm728_vm0, %v698_v27, 0.0  ;;  %v4239_v10 = vpack.c.bf16 %v1787_v25, %v1786_v39  ;;  %v372_v57 = vld [vmem:[%s4387_s16 + $0x1e20] sm:$0xff]  ;;  %v347_v54 = vld [vmem:[%s4387_s16 + $0x1d58] sm:$0xff]  ;;  %v1791_v25 = vld [vmem:[%s5748_s19 + $0x28] sm:$0xff] }
 0x2a9   : > { %v1622_v2 = vpop.xlane.xlu1 %1621  ;;  %v1619_v6 = vpop.xlane.xlu0 %1618  ;;  %v638_v41 = vmax.f32 %v286_v17, 0.0  ;;  %v1806_v20 = vld [vmem:[%s5748_s19 + $0xa0] sm:$0xff]  ;;  %v724_v1 = vmax.f32 %v372_v57, 0.0  ;;  %v1809_v17 = vld [vmem:[%s5748_s19 + $0xb8] sm:$0xff] }
 0x2aa   : > { %v3681_v32 = vrot.slane %v1622_v2, %v4558_v52  ;;  %v3677_v49 = vrot.slane %v1619_v6, %v4552_v50  ;;  %4240 = vmatpush3.bf16.msra.mxu0 %v4239_v10  ;;  %v4245_v35 = vpack.c.bf16 %v1807_v55, %v1806_v20  ;;  %v1790_v39 = vld [vmem:[%s5748_s19 + $0x20] sm:$0xff] }
 0x2ab   : > { %4242 = vmatprep.subr.bf16.mxu0 %v4241_v23  ;;  %v4247_v18 = vpack.c.bf16 %v1791_v25, %v1790_v39  ;;  %v4249_v23 = vpack.c.bf16 %v1809_v17, %v1808_v12  ;;  %v1794_v39 = vld [vmem:[%s5748_s19 + $0x40] sm:$0xff]  ;;  %v1795_v25 = vld [vmem:[%s5748_s19 + $0x48] sm:$0xff] }
 0x2ac   : > { %v5770_v21 = vsel %vm2193_vm1, %v3681_v32, %v3677_v49  ;;  %1747 = vadd.xlane.f32.xlu1 %v1746_v63  ;;  %1696 = vadd.xlane.f32.xlu0 %v1695_v36  ;;  %v1644_v63 = vsel %vm728_vm0, %v681_v29, 0.0  ;;  %v699_v36 = vmax.f32 %v347_v54, 0.0  ;;  %v330_v32 = vld [vmem:[%s4387_s16 + $0x1a10] sm:$0xff]  ;;  %v287_v49 = vld [vmem:[%s4387_s16 + $0x15f8] sm:$0xff]  ;;  %v1811_v54 = vld [vmem:[%s5748_s19 + $0xc8] sm:$0xff] }
 0x2ad   : > { %v1727_v26 = vpop.xlane.xlu1 %1726  ;;  %v1676_v47 = vpop.xlane.xlu0 %1675  ;;  %v639_v29 = vmax.f32 %v287_v49, 0.0  ;;  %v1813_v49 = vld [vmem:[%s5748_s19 + $0xd8] sm:$0xff] }
 0x2ae   : > { %v3854_v27 = vrot.slane %v1727_v26, %v4605_v34  ;;  %v3770_v48 = vrot.slane %v1676_v47, %v4584_v15  ;;  %4244 = vmatpush3.bf16.msra.mxu0 %v4243_v13 }
 0x2af   : > { %4246 = vmatprep.subr.bf16.mxu0 %v4245_v35 }
 0x2b0   : > { %v5784_v3 = vsel %vm2242_vm8, %v3854_v27, %v5708_v46  ;;  %v5788_v4 = vsel %vm2235_vm7, %v3770_v48, %v5692_v42  ;;  %1387 = vadd.xlane.f32.xlu1 %v1386_v14  ;;  %1771 = vadd.xlane.f32.xlu0 %v1770_v19  ;;  %v1515_v46 = vsel %vm728_vm0, %v638_v41, 0.0  ;;  %v1773_v14 = vsel %vm728_vm0, %v724_v1, 0.0  ;;  %v331_v41 = vld [vmem:[%s4387_s16 + $0x1a18] sm:$0xff]  ;;  %v373_v27 = vld [vmem:[%s4387_s16 + $0x1e28] sm:$0xff]  ;;  %v1810_v48 = vld [vmem:[%s5748_s19 + $0xc0] sm:$0xff] }
 0x2b1   : > { %v1367_v2 = vpop.xlane.xlu1 %1366  ;;  %v1343_v6 = vpop.xlane.xlu0 %1342  ;;  %v1698_v19 = vsel %vm728_vm0, %v699_v36, 0.0  ;;  %v683_v1 = vmax.f32 %v331_v41, 0.0  ;;  %v4253_v35 = vpack.c.bf16 %v1811_v54, %v1810_v48  ;;  %v4255_v36 = vpack.c.bf16 %v1795_v25, %v1794_v39  ;;  %v1818_v41 = vld [vmem:[%s5748_s19 + $0x100] sm:$0xff]  ;;  %v1815_v54 = vld [vmem:[%s5748_s19 + $0xe8] sm:$0xff] }
 0x2b2   : > { %v3262_v42 = vrot.slane %v1367_v2, %v4569_v61  ;;  %v3223_v10 = vrot.slane %v1343_v6, %v4636_v9  ;;  %4248 = vmatpush3.bf16.msra.mxu0 %v4247_v18  ;;  %v1814_v48 = vld [vmem:[%s5748_s19 + $0xe0] sm:$0xff] }
 0x2b3   : > { %4250 = vmatprep.subr.bf16.mxu0 %v4249_v23  ;;  %v4261_v39 = vpack.c.bf16 %v1815_v54, %v1814_v48  ;;  %v1798_v25 = vld [vmem:[%s5748_s19 + $0x60] sm:$0xff] }
 0x2b4   : > { %v5802_v58 = vsel %vm2214_vm4, %v3262_v42, %v5722_v16  ;;  %v5806_v5 = vsel %vm6153_vm10, %v3223_v10, %v5704_v11  ;;  %1645 = vadd.xlane.f32.xlu1 %v1644_v63  ;;  %1516 = vadd.xlane.f32.xlu0 %v1515_v46  ;;  %v682_v16 = vmax.f32 %v330_v32, 0.0  ;;  %v4251_v11 = vpack.c.bf16 %v1793_v7, %v1792_v24  ;;  %v374_v42 = vld [vmem:[%s4387_s16 + $0x1e30] sm:$0xff]  ;;  %v375_v10 = vld [vmem:[%s4387_s16 + $0x1e38] sm:$0xff] }
 0x2b5   : > { %v1472_v26 = vpop.xlane.xlu1 %1471  ;;  %v1421_v47 = vpop.xlane.xlu0 %1420  ;;  %vm6154_vm10 = vcmask 720512   ;;  %v725_v46 = vmax.f32 %v373_v27, 0.0  ;;  %v1812_v32 = vld [vmem:[%s5748_s19 + $0xd0] sm:$0xff]  ;;  %v1797_v7 = vld [vmem:[%s5748_s19 + $0x58] sm:$0xff]  ;;  %v4347_v27 = vmov 0.0|0.0  }
 0x2b6   : > { %v3435_v57 = vrot.slane %v1472_v26, %v4622_v59  ;;  %v3351_v13 = vrot.slane %v1421_v47, %v4625_v62  ;;  %4252 = vmatpush3.bf16.msra.mxu0 %v4251_v11  ;;  %v1647_v63 = vsel %vm728_vm0, %v682_v16, 0.0  ;;  %v4257_v23 = vpack.c.bf16 %v1813_v49, %v1812_v32  ;;  %v1796_v24 = vld [vmem:[%s5748_s19 + $0x50] sm:$0xff]  ;;  %4269 = vmatprep.subr.bf16.mxu1 %v4347_v27  ;;  %v1817_v32 = vld [vmem:[%s5748_s19 + $0xf8] sm:$0xff] }
 0x2b7   : > { %4254 = vmatprep.subr.bf16.mxu0 %v4253_v35  ;;  %v726_v16 = vmax.f32 %v374_v42, 0.0 }
 0x2b8   : > { %v5820_v20 = vsel %vm2263_vm11, %v3435_v57, %v5735_v38  ;;  %v5824_v55 = vsel %vm6154_vm10, %v3351_v13, %v5718_v56  ;;  %1774 = vadd.xlane.f32.xlu1 %v1773_v14  ;;  %1699 = vadd.xlane.f32.xlu0 %v1698_v19  ;;  %v1518_v38 = vsel %vm728_vm0, %v639_v29, 0.0  ;;  %v1650_v14 = vsel %vm728_vm0, %v683_v1, 0.0 }
 0x2b9   : > { %v1550_v2 = vpop.xlane.xlu1 %1549  ;;  %v1496_v6 = vpop.xlane.xlu0 %1495  ;;  %v1776_v19 = vsel %vm728_vm0, %v725_v46, 0.0  ;;  %v4259_v29 = vpack.c.bf16 %v1797_v7, %v1796_v24  ;;  %v1800_v24 = vld [vmem:[%s5748_s19 + $0x70] sm:$0xff]  ;;  %v1801_v7 = vld [vmem:[%s5748_s19 + $0x78] sm:$0xff] }
 0x2ba   : > { %v3563_v56 = vrot.slane %v1550_v2, %v4602_v33  ;;  %v3474_v18 = vrot.slane %v1496_v6, %v4555_v51  ;;  %4256 = vmatpush3.bf16.msra.mxu0 %v4255_v36  ;;  %v1799_v2 = vld [vmem:[%s5748_s19 + $0x68] sm:$0xff]  ;;  %v1820_v36 = vld [vmem:[%s5748_s19 + $0x110] sm:$0xff] }
 0x2bb   : > { %4258 = vmatprep.subr.bf16.mxu0 %v4257_v23 }
 0x2bc   : > { %v5838_v12 = vsel %vm2249_vm9, %v3563_v56, %v5757_v40  ;;  %v5842_v17 = vsel %vm2207_vm3, %v3474_v18, %v5731_v37  ;;  %1648 = vadd.xlane.f32.xlu1 %v1647_v63  ;;  %1519 = vadd.xlane.f32.xlu0 %v1518_v38  ;;  %v727_v40 = vmax.f32 %v375_v10, 0.0  ;;  %v1819_v37 = vld [vmem:[%s5748_s19 + $0x108] sm:$0xff]  ;;  %v1779_v38 = vsel %vm728_vm0, %v726_v16, 0.0  ;;  %v1816_v10 = vld [vmem:[%s5748_s19 + $0xf0] sm:$0xff]  ;;  %v1822_v16 = vld [vmem:[%s5748_s19 + $0x120] sm:$0xff] }
 0x2bd   : > { %v1625_v26 = vpop.xlane.xlu1 %1624  ;;  %v1601_v47 = vpop.xlane.xlu0 %1600  ;;  %v4270_v13 = vpack.c.bf16 %v1819_v37, %v1818_v41  ;;  %v4265_v23 = vpack.c.bf16 %v1817_v32, %v1816_v10 }
 0x2be   : > { %v3686_v11 = vrot.slane %v1625_v26, %v4561_v53  ;;  %v3647_v57 = vrot.slane %v1601_v47, %v4625_v62  ;;  %4260 = vmatpush3.bf16.msra.mxu0 %v4259_v29  ;;  %v1782_v46 = vsel %vm728_vm0, %v727_v40, 0.0  ;;  %v1823_v40 = vld [vmem:[%s5748_s19 + $0x128] sm:$0xff]  ;;  %vm6155_vm0 = vcmask 851712  }
 0x2bf   : > { %4271 = vmatpush3.bf16.msra.mxu1 %v4270_v13  ;;  %4262 = vmatprep.subr.bf16.mxu0 %v4261_v39  ;;  %v1825_v13 = vld [vmem:[%s5748_s19 + $0x138] sm:$0xff] }
 0x2c0   : > { %v5857_v1 = vsel %vm2200_vm2, %v3686_v11, %v5770_v21  ;;  %v5861_v35 = vsel %vm6154_vm10, %v3647_v57, %v5753_v44  ;;  %1651 = vadd.xlane.f32.xlu1 %v1650_v14  ;;  %1777 = vadd.xlane.f32.xlu0 %v1776_v19  ;;  %v4263_v21 = vpack.c.bf16 %v1799_v2, %v1798_v25  ;;  %v1821_v44 = vld [vmem:[%s5748_s19 + $0x118] sm:$0xff]  ;;  %v1824_v57 = vld [vmem:[%s5748_s19 + $0x130] sm:$0xff] }
 0x2c1   : > { %v1730_v6 = vpop.xlane.xlu1 %1729  ;;  %v1679_v63 = vpop.xlane.xlu0 %1678  ;;  %4272 = vmatprep.subr.bf16.mxu1 %v4347_v27  ;;  %v4273_v42 = vpack.c.bf16 %v1821_v44, %v1820_v36  ;;  %v4267_v19 = vpack.c.bf16 %v1801_v7, %v1800_v24 }
 0x2c2   : > { %v3859_v56 = vrot.slane %v1730_v6, %v4602_v33  ;;  %v3775_v18 = vrot.slane %v1679_v63, %v4605_v34  ;;  %4264 = vmatpush3.bf16.msra.mxu0 %v4263_v21  ;;  %v1826_v6 = vld [vmem:[%s5748_s19 + $0x140] sm:$0xff]  ;;  %v1827_v63 = vld [vmem:[%s5748_s19 + $0x148] sm:$0xff] }
 0x2c3   : > { %4274 = vmatpush3.bf16.msra.mxu1 %v4273_v42  ;;  %4266 = vmatprep.subr.bf16.mxu0 %v4265_v23  ;;  %v4282_v21 = vpack.c.bf16 %v1827_v63, %v1826_v6 }
 0x2c4   : > { %v5876_v49 = vsel %vm2249_vm9, %v3859_v56, %v5784_v3  ;;  %v5880_v14 = vsel %vm2242_vm8, %v3775_v18, %v5788_v4  ;;  %1780 = vadd.xlane.f32.xlu0 %v1779_v38  ;;  %1783 = vadd.xlane.f32.xlu1 %v1782_v46  ;;  %v4276_v4 = vpack.c.bf16 %v1823_v40, %v1822_v16  ;;  %v1828_v56 = vld [vmem:[%s5748_s19 + $0x150] sm:$0xff]  ;;  %v1829_v18 = vld [vmem:[%s5748_s19 + $0x158] sm:$0xff] }
 0x2c5   : > { %v1754_v26 = vpop.xlane.xlu1 %1753  ;;  %v1751_v47 = vpop.xlane.xlu0 %1750  ;;  %4275 = vmatprep.subr.bf16.mxu1 %v4347_v27  ;;  %v4285_v32 = vpack.c.bf16 %v1829_v18, %v1828_v56 }
 0x2c6   : > { %v3898_v3 = vrot.slane %v1754_v26, %v4558_v52  ;;  %v3894_v29 = vrot.slane %v1751_v47, %v4552_v50  ;;  %4268 = vmatpush3.bf16.msra.mxu0 %v4267_v19  ;;  %v4279_v50 = vpack.c.bf16 %v1825_v13, %v1824_v57  ;;  %v4349_v47 = vmov 0.0  }
 0x2c7   : > { %4277 = vmatpush3.bf16.msra.mxu1 %v4276_v4 }
 0x2c8   : > { %v3899_v41 = vsel %vm2193_vm1, %v3898_v3, %v3894_v29  ;;  %4278 = vmatprep.subr.bf16.mxu1 %v4347_v27  ;;  %vm6156_vm1 = vmmov %vm6154_vm10  ;;  %vm4348_vm10 = vmmov 0  }
 0x2c9   : > { %v1370_v37 = vpop.xlane.xlu1 %1369  ;;  %v1346_v11 = vpop.xlane.xlu0 %1345  ;;  %4234 = vmatprep.mubr.msk.f32.mxu1 %vm4348_vm10, %v4349_v47 }
 0x2ca   : > { %v3267_v48 = vrot.slane %v1370_v37, %v4566_v60  ;;  %v3228_v52 = vrot.slane %v1346_v11, %v4633_v8 }
 0x2cb   : > { %4280 = vmatpush3.bf16.msra.mxu1 %v4279_v50 }
 0x2cc   : > { %v3268_v54 = vsel %vm2221_vm5, %v3267_v48, %v5802_v58  ;;  %v3229_v39 = vsel %vm2277_vm13, %v3228_v52, %v5806_v5  ;;  %4281 = vmatprep.subr.bf16.mxu1 %v4347_v27 }
 0x2cd   : > { %v1475_v25 = vpop.xlane.xlu1 %1474  ;;  %v1424_v2 = vpop.xlane.xlu0 %1423 }
 0x2ce   : > { %v3440_v38 = vrot.slane %v1475_v25, %v4636_v9  ;;  %v3356_v46 = vrot.slane %v1424_v2, %v4622_v59 }
 0x2cf   : > { %4283 = vmatpush3.bf16.msra.mxu1 %v4282_v21 }
 0x2d0   : > { %v3441_v58 = vsel %vm6155_vm0, %v3440_v38, %v5820_v20  ;;  %v3357_v36 = vsel %vm2263_vm11, %v3356_v46, %v5824_v55  ;;  %4284 = vmatprep.subr.bf16.mxu1 %v4347_v27  ;;  %vm6157_vm0 = vmmov %vm6156_vm1 }
 0x2d1   : > { %v1553_v5 = vpop.xlane.xlu1 %1552  ;;  %v1499_v44 = vpop.xlane.xlu0 %1498  ;;  %vm6160_vm10 = vmmov %vm6157_vm0 }
 0x2d2   : > { %v3568_v42 = vrot.slane %v1553_v5, %v4625_v62  ;;  %v3479_v10 = vrot.slane %v1499_v44, %v4569_v61 }
 0x2d3   : > { %4286 = vmatpush3.bf16.msra.mxu1 %v4285_v32 }
 0x2d4   : > { %v3569_v23 = vsel %vm6156_vm1, %v3568_v42, %v5838_v12  ;;  %v3480_v20 = vsel %vm2214_vm4, %v3479_v10, %v5842_v17  ;;  %vm6158_vm1 = vcmask 851712  }
 0x2d5   : > { %v1628_v24 = vpop.xlane.xlu1 %1627  ;;  %v1604_v55 = vpop.xlane.xlu0 %1603 }
 0x2d6   : > { %v3691_v7 = vrot.slane %v1628_v24, %v4555_v51  ;;  %v3652_v26 = vrot.slane %v1604_v55, %v4622_v59 }
 0x2d8   : > { %v3692_v27 = vsel %vm2207_vm3, %v3691_v7, %v5857_v1  ;;  %v3653_v19 = vsel %vm2263_vm11, %v3652_v26, %v5861_v35 }
 0x2d9   : > { %v1733_v12 = vpop.xlane.xlu1 %1732  ;;  %v1682_v16 = vpop.xlane.xlu0 %1681 }
 0x2da   : > { %v3864_v17 = vrot.slane %v1733_v12, %v4625_v62  ;;  %v3780_v40 = vrot.slane %v1682_v16, %v4602_v33 }
 0x2dc   : > { %v3865_v3 = vsel %vm6157_vm0, %v3864_v17, %v5876_v49  ;;  %v3781_v29 = vsel %vm2249_vm9, %v3780_v40, %v5880_v14  ;;  %vm3958_vm0 = vcmask 1045509  }
 0x2dd   : > { %v1349_v4 = vpop.xlane.xlu1 %1348  ;;  %v1757_v37 = vpop.xlane.xlu0 %1756 }
 0x2de   : > { %v3233_v11 = vrot.slane %v1349_v4, %v4655_v31  ;;  %v3903_v1 = vrot.slane %v1757_v37, %v4561_v53 }
 0x2e0   : > { %v3234_v35 = vsel %vm2284_vm14, %v3233_v11, %v3229_v39  ;;  %v3904_v57 = vsel %vm2200_vm2, %v3903_v1, %v3899_v41  ;;  %vm6159_vm2 = vmmov %vm6158_vm1 }
 0x2e1   : > { %v1427_v13 = vpop.xlane.xlu1 %1426  ;;  %v1373_v48 = vpop.xlane.xlu0 %1372 }
 0x2e2   : > { %v3361_v52 = vrot.slane %v1427_v13, %v4636_v9  ;;  %v3272_v50 = vrot.slane %v1373_v48, %v4593_v22 }
 0x2e4   : > { %v3362_v49 = vsel %vm6158_vm1, %v3361_v52, %v3357_v36  ;;  %v3273_v14 = vsel %vm2228_vm6, %v3272_v50, %v3268_v54 }
 0x2e5   : > { %v1502_v25 = vpop.xlane.xlu1 %1501  ;;  %v1478_v2 = vpop.xlane.xlu0 %1477 }
 0x2e6   : > { %v3484_v6 = vrot.slane %v1502_v25, %v4566_v60  ;;  %v3445_v53 = vrot.slane %v1478_v2, %v4633_v8 }
 0x2e8   : > { %v3485_v39 = vsel %vm2221_vm5, %v3484_v6, %v3480_v20  ;;  %v3446_v41 = vsel %vm2277_vm13, %v3445_v53, %v3441_v58 }
 0x2e9   : > { %v1607_v63 = vpop.xlane.xlu1 %1606  ;;  %v1556_v38 = vpop.xlane.xlu0 %1555 }
 0x2ea   : > { %v3657_v46 = vrot.slane %v1607_v63, %v4636_v9  ;;  %v3573_v21 = vrot.slane %v1556_v38, %v4622_v59 }
 0x2ec   : > { %v5944_v36 = vsel %vm6159_vm2, %v3657_v46, %v3653_v19  ;;  %v3574_v54 = vsel %vm2263_vm11, %v3573_v21, %v3569_v23  ;;  %vm3962_vm2 = vcmask 1047559  }
 0x2ed   : > { %v1685_v5 = vpop.xlane.xlu1 %1684  ;;  %v1631_v44 = vpop.xlane.xlu0 %1630 }
 0x2ee   : > { %v3785_v56 = vrot.slane %v1685_v5, %v4625_v62  ;;  %v3696_v18 = vrot.slane %v1631_v44, %v4569_v61 }
 0x2f0   : > { %v5950_v42 = vsel %vm6160_vm10, %v3785_v56, %v3781_v29  ;;  %v3697_v58 = vsel %vm2214_vm4, %v3696_v18, %v3692_v27 }
 0x2f1   : > { %v1760_v10 = vpop.xlane.xlu1 %1759  ;;  %v1736_v32 = vpop.xlane.xlu0 %1735 }
 0x2f2   : > { %v3908_v20 = vrot.slane %v1760_v10, %v4555_v51  ;;  %v3869_v24 = vrot.slane %v1736_v32, %v4622_v59 }
 0x2f4   : > { %v3909_v55 = vsel %vm2207_vm3, %v3908_v20, %v3904_v57  ;;  %v5957_v23 = vsel %vm2263_vm11, %v3869_v24, %v3865_v3  ;;  %vm6161_vm3 = vmmov %vm6158_vm1 }
 0x2f5   : > { %v1376_v7 = vpop.xlane.xlu1 %1375  ;;  %v1352_v26 = vpop.xlane.xlu0 %1351 }
 0x2f6   : > { %v3277_v47 = vrot.slane %v1376_v7, %v4584_v15  ;;  %v3238_v19 = vrot.slane %v1352_v26, %v4652_v30 }
 0x2f8   : > { %v3278_v12 = vsel %vm2235_vm7, %v3277_v47, %v3273_v14  ;;  %v3239_v27 = vsel %vm2291_vm15, %v3238_v19, %v3234_v35 }
 0x2f9   : > { %v1481_v16 = vpop.xlane.xlu1 %1480  ;;  %v1430_v17 = vpop.xlane.xlu0 %1429  ;;  %v3967_v51 = vsel %vm3956_vm12, %v3239_v27, %v5292_v45 }
 0x2fa   : > { %v3366_v40 = vrot.slane %v1430_v17, %v4633_v8  ;;  %v3450_v6 = vrot.slane %v1481_v16, %v4655_v31 }
 0x2fc   : > { %v3367_v3 = vsel %vm2277_vm13, %v3366_v40, %v3362_v49  ;;  %v3451_v21 = vsel %vm2284_vm14, %v3450_v6, %v3446_v41 }
 0x2fd   : > { %v1559_v29 = vpop.xlane.xlu1 %1558  ;;  %v1505_v4 = vpop.xlane.xlu0 %1504 }
 0x2fe   : > { %v3578_v37 = vrot.slane %v1559_v29, %v4636_v9  ;;  %v3489_v11 = vrot.slane %v1505_v4, %v4593_v22 }
 0x300   : > { %v3579_v1 = vsel %vm6161_vm3, %v3578_v37, %v3574_v54  ;;  %v5971_v57 = vsel %vm2228_vm6, %v3489_v11, %v3485_v39  ;;  %vm6162_vm3 = vmmov %vm6158_vm1 }
 0x301   : > { %v1634_v35 = vpop.xlane.xlu1 %1633  ;;  %v1610_v13 = vpop.xlane.xlu0 %1609 }
 0x302   : > { %v3701_v48 = vrot.slane %v1634_v35, %v4566_v60  ;;  %v3662_v7 = vrot.slane %v1610_v13, %v4633_v8 }
 0x304   : > { %v5975_v45 = vsel %vm2221_vm5, %v3701_v48, %v3697_v58 }
 0x305   : > { %v1739_v52 = vpop.xlane.xlu1 %1738  ;;  %v5977_v50 = vpop.xlane.xlu0 %1687 }
 0x309   : > { %v1379_v49 = vpop.xlane.xlu1 %1378  ;;  %v1763_v14 = vpop.xlane.xlu0 %1762 }
 0x30a   : > { %v3282_v25 = vrot.slane %v1379_v49, %v4605_v34  ;;  %v3913_v2 = vrot.slane %v1763_v14, %v4569_v61  ;;  %v3874_v14 = vrot.slane %v1739_v52, %v4636_v9 }
 0x30c   : > { %v5983_v53 = vsel %vm2242_vm8, %v3282_v25, %v3278_v12  ;;  %v5986_v39 = vsel %vm2214_vm4, %v3913_v2, %v3909_v55  ;;  %vm3960_vm4 = vcmask 1046534  }
 0x30d   : > { %v1484_v63 = vpop.xlane.xlu1 %1483  ;;  %v1433_v38 = vpop.xlane.xlu0 %1432 }
 0x30e   : > { %v3455_v46 = vrot.slane %v1484_v63, %v4652_v30  ;;  %v3371_v24 = vrot.slane %v1433_v38, %v4655_v31 }
 0x310   : > { %v3456_v54 = vsel %vm2291_vm15, %v3455_v46, %v3451_v21  ;;  %v3372_v47 = vsel %vm2284_vm14, %v3371_v24, %v3367_v3 }
 0x311   : > { %v1562_v5 = vpop.xlane.xlu1 %1561  ;;  %v5991_v44 = vpop.xlane.xlu0 %1507  ;;  %v3968_v61 = vsel %vm3958_vm0, %v3456_v54, %v3967_v51  ;;  %v3663_v51 = vsel %vm2277_vm13, %v3662_v7, %v5944_v36 }
 0x312   : > { %v3583_v49 = vrot.slane %v1562_v5, %v4633_v8  ;;  %v3875_v5 = vsel %vm6158_vm1, %v3874_v14, %v5957_v23 }
 0x314   : > { %v3584_v6 = vsel %vm2277_vm13, %v3583_v49, %v3579_v1 }
 0x315   : > { %v5994_v56 = vpop.xlane.xlu1 %1636  ;;  %v1613_v18 = vpop.xlane.xlu0 %1612 }
 0x316   : > { %v3667_v19 = vrot.slane %v1613_v18, %v4655_v31 }
 0x318   : > { %v3668_v29 = vsel %vm2284_vm14, %v3667_v19, %v3663_v51 }
 0x319   : > { %v1742_v58 = vpop.xlane.xlu1 %1741  ;;  %v5996_v10 = vpop.xlane.xlu0 %1690 }
 0x31a   : > { %v3879_v63 = vrot.slane %v1742_v58, %v4633_v8  ;;  %v3795_v51 = vrot.slane %v5996_v10, %v4636_v9 }
 0x31c   : > { %v3880_v24 = vsel %vm2277_vm13, %v3879_v63, %v3875_v5 }
 0x31d   : > { %v1382_v32 = vpop.xlane.xlu1 %1381  ;;  %v5998_v20 = vpop.xlane.xlu0 %1765 }
 0x31e   : > { %v3287_v1 = vrot.slane %v1382_v32, %v4602_v33 }
 0x321   : > { %v6001_v55 = vpop.xlane.xlu1 %1510  ;;  %v1436_v41 = vpop.xlane.xlu0 %1435 }
 0x322   : > { %v3376_v26 = vrot.slane %v1436_v41, %v4652_v30  ;;  %v3499_v9 = vrot.slane %v6001_v55, %v4605_v34 }
 0x324   : > { %v3377_v12 = vsel %vm2291_vm15, %v3376_v26, %v3372_v47 }
 0x325   : > { %v1616_v27 = vpop.xlane.xlu1 %1615  ;;  %v1565_v16 = vpop.xlane.xlu0 %1564  ;;  %v3959_v17 = vsel %vm3958_vm0, %v3377_v12, %v5410_v43  ;;  %v3288_v12 = vsel %vm2249_vm9, %v3287_v1, %v5983_v53 }
 0x326   : > { %v3672_v40 = vrot.slane %v1616_v27, %v4652_v30  ;;  %v3588_v36 = vrot.slane %v1565_v16, %v4655_v31  ;;  %v3790_v16 = vrot.slane %v5977_v50, %v4622_v59  ;;  %v3494_v50 = vrot.slane %v5991_v44, %v4584_v15 }
 0x328   : > { %v3673_v4 = vsel %vm2291_vm15, %v3672_v40, %v3668_v29  ;;  %v3589_v46 = vsel %vm2284_vm14, %v3588_v36, %v3584_v6 }
 0x329   : > { %v1694_v3 = vpop.xlane.xlu1 %1693  ;;  %v6015_v37 = vpop.xlane.xlu0 %1639  ;;  %v3969_v11 = vsel %vm3960_vm4, %v3673_v4, %v3968_v61 }
 0x32a   : > { %v3800_v53 = vrot.slane %v1694_v3, %v4633_v8  ;;  %v3495_v3 = vsel %vm2235_vm7, %v3494_v50, %v5971_v57  ;;  %v3711_v55 = vrot.slane %v6015_v37, %v4584_v15 }
 0x32d   : > { %v6018_v35 = vpop.xlane.xlu1 %1768  ;;  %v1745_v13 = vpop.xlane.xlu0 %1744 }
 0x32e   : > { %v3884_v21 = vrot.slane %v1745_v13, %v4655_v31  ;;  %v3791_v13 = vsel %vm2263_vm11, %v3790_v16, %v5950_v42  ;;  %v3923_v5 = vrot.slane %v6018_v35, %v4593_v22 }
 0x330   : > { %v3885_v7 = vsel %vm2284_vm14, %v3884_v21, %v3880_v24 }
 0x331   : > { %v1514_v48 = vpop.xlane.xlu1 %1513  ;;  %v1385_v43 = vpop.xlane.xlu0 %1384 }
 0x332   : > { %v3292_v41 = vrot.slane %v1385_v43, %v4625_v62  ;;  %v3796_v43 = vsel %vm6162_vm3, %v3795_v51, %v3791_v13  ;;  %v3504_v36 = vrot.slane %v1514_v48, %v4602_v33 }
 0x334   : > { %v3293_v32 = vsel %vm6160_vm10, %v3292_v41, %v3288_v12 }
 0x335   : > { %v6023_v25 = vpop.xlane.xlu1 %1642  ;;  %v1568_v2 = vpop.xlane.xlu0 %1567 }
 0x336   : > { %v3593_v38 = vrot.slane %v1568_v2, %v4652_v30  ;;  %v3500_v2 = vsel %vm2242_vm8, %v3499_v9, %v3495_v3 }
 0x337   : > { %v3505_v63 = vsel %vm2249_vm9, %v3504_v36, %v3500_v2 }
 0x338   : > { %v3594_v54 = vsel %vm2291_vm15, %v3593_v38, %v3589_v46  ;;  %v3918_v46 = vrot.slane %v5998_v20, %v4566_v60 }
 0x339   : > { %v1748_v61 = vpop.xlane.xlu1 %1747  ;;  %v1697_v52 = vpop.xlane.xlu0 %1696  ;;  %v3961_v18 = vsel %vm3960_vm4, %v3594_v54, %v3959_v17 }
 0x33a   : > { %v3889_v58 = vrot.slane %v1748_v61, %v4652_v30  ;;  %v3919_v41 = vsel %vm2221_vm5, %v3918_v46, %v5986_v39  ;;  %vm6165_vm5 = vmmov %vm6160_vm10 }
 0x33c   : > { %v3890_v26 = vsel %vm2291_vm15, %v3889_v58, %v3885_v7  ;;  %v3924_v7 = vsel %vm2228_vm6, %v3923_v5, %v3919_v41 }
 0x33d   : > { %v1388_v47 = vpop.xlane.xlu1 %1387  ;;  %v1772_v19 = vpop.xlane.xlu0 %1771  ;;  %v3970_v23 = vsel %vm3962_vm2, %v3890_v26, %v3969_v11  ;;  %v3805_v11 = vrot.slane %v1697_v52, %v4655_v31  ;;  %v3706_v31 = vrot.slane %v5994_v56, %v4593_v22 }
 0x33e   : > { %v3297_v27 = vrot.slane %v1388_v47, %v4622_v59  ;;  %4047 = vmatprep.mubr.f32.mxu0 %v3970_v23 }
 0x33f   : > { %v3707_v37 = vsel %vm2228_vm6, %v3706_v31, %v5975_v45  ;;  %vm4132_vm6 = vcmask (%p17_p0), 80896  }
 0x340   : > { %v3298_v17 = vsel %vm2263_vm11, %v3297_v27, %v3293_v32  ;;  %v3712_v54 = vsel %vm2235_vm7, %v3711_v55, %v3707_v37 }
 0x341   : > { %v3974_v40 = vsel %vm3956_vm12, %v3298_v17, %v5343_v28  ;;  %v1646_v29 = vpop.xlane.xlu1 %1645  ;;  %v1517_v4 = vpop.xlane.xlu0 %1516  ;;  %v3801_v28 = vsel %vm2277_vm13, %v3800_v53, %v3796_v43  ;;  %vm6163_vm13 = vmmov %vm6160_vm10 }
 0x342   : > { %v3806_v42 = vsel %vm2284_vm14, %v3805_v11, %v3801_v28  ;;  %v3509_v44 = vrot.slane %v1517_v4, %v4625_v62  ;;  %v3721_v38 = vrot.slane %v1646_v29, %v4602_v33  ;;  %vm6164_vm14 = vmmov %vm6160_vm10 }
 0x344   : > { %v3510_v21 = vsel %vm6163_vm13, %v3509_v44, %v3505_v63 }
 0x345   : > { %v1775_v10 = vpop.xlane.xlu1 %1774  ;;  %v1700_v49 = vpop.xlane.xlu0 %1699 }
 0x346   : > { %v3810_v8 = vrot.slane %v1700_v49, %v4652_v30  ;;  %v3716_v30 = vrot.slane %v6023_v25, %v4605_v34  ;;  %v3933_v20 = vrot.slane %v1775_v10, %v4605_v34 }
 0x348   : > { %v3811_v14 = vsel %vm2291_vm15, %v3810_v8, %v3806_v42  ;;  %v3717_v52 = vsel %vm2242_vm8, %v3716_v30, %v3712_v54  ;;  %vm3980_vm15 = vcmask 785408  }
 0x349   : > { %v1649_v48 = vpop.xlane.xlu1 %1648  ;;  %v1520_v6 = vpop.xlane.xlu0 %1519  ;;  %v3963_v56 = vsel %vm3962_vm2, %v3811_v14, %v3961_v18  ;;  %v3928_v18 = vrot.slane %v1772_v19, %v4584_v15  ;;  %v3722_v60 = vsel %vm2249_vm9, %v3721_v38, %v3717_v52 }
 0x34a   : > { %v3514_v57 = vrot.slane %v1520_v6, %v4622_v59  ;;  %4048 = vmatmul.mubr.f32.vlgmr.msra.gmra.mrb[0].mxu0 %v3963_v56  ;;  %v3726_v25 = vrot.slane %v1649_v48, %v4625_v62 }
 0x34b   : > { %v3929_v26 = vsel %vm2235_vm7, %v3928_v18, %v3924_v7 }
 0x34c   : > { %v3515_v61 = vsel %vm2263_vm11, %v3514_v57, %v3510_v21  ;;  %v3727_v22 = vsel %vm6164_vm14, %v3726_v25, %v3722_v60  ;;  %v3934_v34 = vsel %vm2242_vm8, %v3933_v20, %v3929_v26 }
 0x34d   : > { %v3975_v45 = vsel %vm3958_vm0, %v3515_v61, %v3974_v40  ;;  %v1652_v24 = vpop.xlane.xlu1 %1651  ;;  %v1778_v1 = vpop.xlane.xlu0 %1777 }
 0x34e   : > { %v3731_v58 = vrot.slane %v1652_v24, %v4622_v59  ;;  %v3938_v35 = vrot.slane %v1778_v1, %v4602_v33 }
 0x350   : > { %v3732_v15 = vsel %vm2263_vm11, %v3731_v58, %v3727_v22  ;;  %v3939_v27 = vsel %vm2249_vm9, %v3938_v35, %v3934_v34 }
 0x351   : > { %v1781_v47 = vpop.xlane.xlu0 %1780  ;;  %v1784_v19 = vpop.xlane.xlu1 %1783  ;;  %v3976_v23 = vsel %vm3960_vm4, %v3732_v15, %v3975_v45 }
 0x352   : > { %v3943_v12 = vrot.slane %v1781_v47, %v4625_v62  ;;  %v3948_v39 = vrot.slane %v1784_v19, %v4622_v59  ;;  %v4161_v59 = vld [vmem:[%s6134_s2] ss:$0 sm:$0xff] (%p17_p0) }
 0x354   : > { %v3944_v33 = vsel %vm6165_vm5, %v3943_v12, %v3939_v27 }
 0x355   : > { %v3949_v32 = vsel %vm2263_vm11, %v3948_v39, %v3944_v33 }
 0x356   : > { %v3977_v16 = vsel %vm3962_vm2, %v3949_v32, %v3976_v23 }
 0x357   : > { %4235 = vmatmul.mubr.msk.f32.vlgmr.msra.gmra.mrb[0].mxu1 %vm3980_vm15, %v3977_v16 }
 0x41d   : > { %v4194_v17 = vpop.f32.mrb[0].mxu0 }
 0x41e   : > { %v4195_v51 = vpop.f32.mrb[1].mxu0 }
 0x41f   : > { %v4196_v40 = vadd.f32 %v4195_v51, %v4194_v17 }
 0x429   :  { %19 = sbr.rel (!%p17_p0) target bundleno = 1 (0x1), region = 41 }
 0x42a   : > { %v4119_v29 = vpop.f32.mrb[0].mxu1 }
 0x42b   : > { %v4120_v4 = vadd.f32 %v4196_v40, %v4119_v29  ;;  %v4236_v53 = vpop.f32.mrb[1].mxu1 }
 0x42d   : > { %v4123_v62 = vadd.f32 %v4341_v0, %v4120_v4  }
 0x42f   : > { %v6166_v0 = vmov %v4123_v62  ;;  %v4131_v11 = vadd.f32 (%p17_p0), %v4161_v59, %v4123_v62 }
 0x431   :  { %4133 = vst.msk [vmem:[#allocation2] sm:$0xff] %vm4132_vm6, %v4131_v11 }
 0x432   :  { %4318 = shalt.err (!%p4315_p5)
}
 0x433   :  { %s4319_s0 = scalar_lea.hbm %s6135_s3, 128 }
 0x434   :  { %p4320_p6 = scmp.ne.s32.totalorder %s6135_s3, %s4319_s0  ;;  %p4323_p7 = scmp.lt.u32.totalorder %s4319_s0, %s6135_s3 }
 0x436   :  { %p4325_p8 = pnand %p4323_p7, %p4320_p6 }
 0x438   :  { %4328 = shalt.err (!%p4325_p8)
}
 0x439   :  { %4143 = dma.vmem_to_hbm [thread:$0]  %s4141_s23, 128, %s6135_s3, [#allocation3]  }
 0x43a   :  { %4337 = dma.done.wait [#allocation3], 128  }
 0x43b   :  { %4338 = vsyncadd [#allocation3], 4294967168 }
 0x43c   :  { %4147 = vsyncpa [#allocation3], 1 }

</bundles_post_ra>
